<compile_context>
chip_gen: v5e
topology: v5e:2x2
jax: 0.10.0
libtpu: 0.0.40
codegen_flags: <defaults>
</compile_context>

<pallas_src>
import jax
import jax.numpy as jnp
from jax.experimental import pallas as pl
from jax.experimental.pallas import tpu as pltpu

C_IN, C1, C2, C3 = 28, 32, 48, 64   # 24+4 -> 32 -> 48 -> 64
CPAD = 64                           # all PointNet channels padded to 64
HID = 64
NUM_LAYERS = 3
FC_HID = 16
FC_OUT = 2


# ----------------------------------------------------------------------------
# Fused kernel: PointNet (padded 1x1-conv MLP, BN folded, ReLU, lane-dense
# attention pool) -> 3-layer LSTM (time-major, register-resident sequence,
# hoisted bf16 input projection) -> FC head (64 -> 16 -> 2).
# ----------------------------------------------------------------------------
def _global_module_kernel(x_ref, wpn_ref, vecs_ref, wih_ref, whh_ref, b_ref,
                          h0_ref, c0_ref, fcw_ref,
                          gvec_ref, gloc_ref, attn_ref, hn_ref, cn_ref):
    N, P = attn_ref.shape            # N = B*T samples, P points per sample
    B, T, H = gvec_ref.shape         # batch, length, hidden

    vecs = vecs_ref[...]             # (8, 64) packed small params
    t1 = vecs[0:1, :]                # BN-folded shifts (zero-padded beyond C1/C2)
    t2 = vecs[1:2, :]
    t3 = vecs[2:3, :]
    wa = vecs[3:4, :].reshape(1, 1, CPAD)   # attn Linear(64,1) weight row
    fc1b = vecs[4:5, :FC_HID]
    fc2b = vecs[5:6, :FC_OUT]
    ba = vecs[6:7, 0:1]                      # attn bias (scalar)

    # ----------------- PointNet over all N*P rows (bf16 MXU, f32 acc) --------
    x = x_ref[...]                                                   # (N*P, 64) bf16
    h1 = jnp.maximum(
        jnp.dot(x, wpn_ref[0], preferred_element_type=jnp.float32) + t1, 0.0)
    h2 = jnp.maximum(
        jnp.dot(h1.astype(jnp.bfloat16), wpn_ref[1],
                preferred_element_type=jnp.float32) + t2, 0.0)
    h3 = jnp.maximum(
        jnp.dot(h2.astype(jnp.bfloat16), wpn_ref[2],
                preferred_element_type=jnp.float32) + t3, 0.0)       # (N*P, 64) f32

    # Lane-dense attention: scores (N, P); softmax over the lane (point) axis.
    h3_3d = h3.reshape(N, P, CPAD)
    scores = jnp.sum(h3_3d * wa, axis=-1) + ba                       # (N, P) VPU+XLU
    m = jnp.max(scores, axis=-1, keepdims=True)
    e = jnp.exp(scores - m)
    w = e / jnp.sum(e, axis=-1, keepdims=True)                       # (N, P)
    attn_ref[...] = w

    vec = jnp.sum(h3_3d * w[:, :, None], axis=1)                     # (N, 64) f32

    # ----------------- 3-layer LSTM, time-major, register-resident ----------
    vec3d = vec.reshape(B, T, H)
    seq = [vec3d[:, t, :] for t in range(T)]                         # T x (B, H) f32
    hn_list, cn_list = [], []
    for layer in range(NUM_LAYERS):
        wih_l = wih_ref[layer]                                       # (H, 4H) bf16
        whh_l = whh_ref[layer]                                       # (H, 4H) f32
        b_l = b_ref[layer:layer + 1, :]                              # (1, 4H) = b_ih+b_hh

        # Hoisted input projection on a time-major slab: one bf16 matmul / layer.
        x_tm = jnp.concatenate([s.reshape(1, B, H) for s in seq], axis=0)  # (T, B, H)
        gx = (jnp.dot(x_tm.reshape(T * B, H).astype(jnp.bfloat16), wih_l,
                      preferred_element_type=jnp.float32)
              + b_l).reshape(T, B, 4 * H)                            # (T, B, 4H) f32

        h = h0_ref[layer]                                            # (B, H) f32
        c = c0_ref[layer]
        new_seq = []
        for t in range(T):                                           # static unroll
            gates = gx[t] + jnp.dot(h, whh_l,
                                    preferred_element_type=jnp.float32)  # (B, 4H)
            sig = jax.nn.sigmoid(gates[:, :3 * H])                   # i, f, o (one EUP call)
            g_g = jnp.tanh(gates[:, 3 * H:])                         # g
            i_g = sig[:, 0 * H:1 * H]
            f_g = sig[:, 1 * H:2 * H]
            o_g = sig[:, 2 * H:3 * H]
            c = f_g * c + i_g * g_g
            h = o_g * jnp.tanh(c)
            new_seq.append(h)
        seq = new_seq
        hn_list.append(h)
        cn_list.append(c)

    # Single writes for every output (no per-timestep stores).
    seq_bm = jnp.concatenate([s.reshape(B, 1, H) for s in seq], axis=1)   # (B, T, H)
    gvec_ref[...] = seq_bm
    hn_ref[...] = jnp.concatenate([h.reshape(1, B, H) for h in hn_list], axis=0)
    cn_ref[...] = jnp.concatenate([c.reshape(1, B, H) for c in cn_list], axis=0)

    # ----------------- FC head (64 -> 16 -> 2) on the final-layer sequence ---
    fcw = fcw_ref[...]                                               # (80, 16) packed
    fc1w = fcw[:HID, :]                                              # (64, 16)
    fc2w = fcw[HID:HID + FC_HID, :FC_OUT]                            # (16, 2)
    flat = seq_bm.reshape(B * T, H)
    hid = jnp.maximum(
        jnp.dot(flat, fc1w, preferred_element_type=jnp.float32) + fc1b, 0.0)
    gloc_ref[...] = jnp.dot(hid, fc2w, preferred_element_type=jnp.float32) + fc2b


# ----------------------------------------------------------------------------
# Wrapper: one pallas_call, everything VMEM-resident (tiny shapes).
# ----------------------------------------------------------------------------
def global_module_forward(x, h0, c0, batch_size, length_size, params):
    wpn, vecs, wih, whh, b_lstm, fcw = params
    N, P, c_in = x.shape
    assert N == batch_size * length_size, "x rows must be (batch, length) batch-major"
    assert c_in == C_IN

    # Pad 28 -> 64 channels (weights are zero-padded to match) and cast to bf16.
    x_flat = jnp.pad(x.reshape(N * P, C_IN),
                     ((0, 0), (0, CPAD - C_IN))).astype(jnp.bfloat16)

    vmem = lambda: pl.BlockSpec(memory_space=pltpu.MemorySpace.VMEM)
    g_vec, g_loc2d, attn2d, hn, cn = pl.pallas_call(
        _global_module_kernel,
        out_shape=(jax.ShapeDtypeStruct((batch_size, length_size, HID), jnp.float32),
                   jax.ShapeDtypeStruct((N, FC_OUT), jnp.float32),
                   jax.ShapeDtypeStruct((N, P), jnp.float32),
                   jax.ShapeDtypeStruct((NUM_LAYERS, batch_size, HID), jnp.float32),
                   jax.ShapeDtypeStruct((NUM_LAYERS, batch_size, HID), jnp.float32)),
        in_specs=[vmem() for _ in range(9)],
        out_specs=tuple(vmem() for _ in range(5)),
    )(x_flat, wpn, vecs, wih, whh, b_lstm, h0, c0, fcw)

    g_loc = g_loc2d.reshape(batch_size, length_size, FC_OUT)
    attn_weights = attn2d[..., None]        # match PyTorch (N, P, 1) layout
    return g_vec, g_loc, attn_weights, hn, cn


# ----------------------------------------------------------------------------
# Parameters (deterministic, synthetic) — packed for the kernel at init time.
# ----------------------------------------------------------------------------
def _reorder_gates_ifgo_to_ifog(w):
    """Reorder the 4H gate axis from PyTorch order [i,f,g,o] to kernel order [i,f,o,g]."""
    i, f, g, o = jnp.split(w, 4, axis=-1)
    return jnp.concatenate([i, f, o, g], axis=-1)


def init_params(key):
    ks = list(jax.random.split(key, 24))

    def nrm(k, shape, scale):
        return jax.random.normal(k, shape, dtype=jnp.float32) * scale

    eps = 1e-5

    def conv_bn_folded(kw, kb, cin, cout):
        w = nrm(kw, (cin, cout), 1.0 / float(cin) ** 0.5)   # conv weight (in, out)
        bias = nrm(kb, (cout,), 0.05)
        r = jnp.arange(cout, dtype=jnp.float32)
        gamma = 1.0 + 0.01 * r
        beta = 0.02 * jnp.sin(r)
        mean = 0.01 * jnp.cos(r)
        var = 1.0 + 0.05 * (r % 3)
        s = gamma / jnp.sqrt(var + eps)                     # eval-mode BN fold
        w_fold = w * s[None, :]                             # scale folded into weight
        t = (bias - mean) * s + beta                        # remaining shift
        return w_fold, t

    w1, t1 = conv_bn_folded(ks[0], ks[1], C_IN, C1)
    w2, t2 = conv_bn_folded(ks[2], ks[3], C1, C2)
    w3, t3 = conv_bn_folded(ks[4], ks[5], C2, C3)
    wa = nrm(ks[6], (C3,), 0.1)        # attn Linear(64,1) weight row
    ba = nrm(ks[7], (1,), 0.1)

    # PointNet weights zero-padded and packed into one (3, 64, 64) bf16 slab.
    wpn = jnp.zeros((3, CPAD, CPAD), jnp.float32)
    wpn = wpn.at[0, :C_IN, :C1].set(w1)
    wpn = wpn.at[1, :C1, :C2].set(w2)
    wpn = wpn.at[2, :C2, :C3].set(w3)
    wpn = wpn.astype(jnp.bfloat16)

    # LSTM weights pre-transposed to (input_dim, 4*hidden), PyTorch gate order i,f,g,o
    # with b = b_ih + b_hh; then re-packed to [i,f,o,g] for the kernel.
    wih = jnp.stack([nrm(ks[8 + l], (HID, 4 * HID), 0.08) for l in range(NUM_LAYERS)])
    whh = jnp.stack([nrm(ks[11 + l], (HID, 4 * HID), 0.08) for l in range(NUM_LAYERS)])
    bb = jnp.stack([nrm(ks[14 + l], (4 * HID,), 0.05) for l in range(NUM_LAYERS)])
    wih = _reorder_gates_ifgo_to_ifog(wih).astype(jnp.bfloat16)   # bf16 input projection
    whh = _reorder_gates_ifgo_to_ifog(whh)                        # recurrence stays f32
    bb = _reorder_gates_ifgo_to_ifog(bb)                          # (3, 4H) f32

    fc1w = nrm(ks[17], (HID, FC_HID), 0.1)
    fc1b = nrm(ks[18], (FC_HID,), 0.05)
    fc2w = nrm(ks[19], (FC_HID, FC_OUT), 0.1)
    fc2b = nrm(ks[20], (FC_OUT,), 0.05)

    # FC weights packed into one (80, 16) slab: rows 0:64 = fc1w, rows 64:80[:, :2] = fc2w.
    fcw = jnp.zeros((HID + FC_HID, FC_HID), jnp.float32)
    fcw = fcw.at[:HID, :].set(fc1w)
    fcw = fcw.at[HID:, :FC_OUT].set(fc2w)

    # All small bias-like vectors packed into one (8, 64) slab.
    def row(v):
        v = v.reshape(-1)
        return jnp.pad(v, (0, CPAD - v.shape[0]))
    vecs = jnp.stack([row(t1), row(t2), row(t3), row(wa), row(fc1b), row(fc2b),
                      row(ba), jnp.zeros((CPAD,), jnp.float32)])

    return wpn, vecs, wih, whh, bb, fcw


if __name__ == "__main__":
    batch_size, length_size, num_points = 2, 4, 16
    N = batch_size * length_size

    key = jax.random.PRNGKey(0)
    kx, kh, kc, kp = jax.random.split(key, 4)
    x = jax.random.normal(kx, (N, num_points, C_IN), dtype=jnp.float32)
    h0 = jax.random.normal(kh, (NUM_LAYERS, batch_size, HID), dtype=jnp.float32) * 0.1
    c0 = jax.random.normal(kc, (NUM_LAYERS, batch_size, HID), dtype=jnp.float32) * 0.1
    params = init_params(kp)

    g_vec, g_loc, attn_weights, hn, cn = global_module_forward(
        x, h0, c0, batch_size, length_size, params)
    jax.block_until_ready((g_vec, g_loc, attn_weights, hn, cn))

    assert g_vec.shape == (batch_size, length_size, HID)
    assert g_loc.shape == (batch_size, length_size, 2)
    assert attn_weights.shape == (N, num_points, 1)
    assert hn.shape == (NUM_LAYERS, batch_size, HID)
    assert cn.shape == (NUM_LAYERS, batch_size, HID)
    # TODO(synk): BatchNorm is eval-mode (running stats folded into the weights/shift);
    # LSTM inter-layer dropout (p=0.1) is training-only and omitted.
    print("KERNEL_OK")
</pallas_src>

<mosaic_0001>
module attributes {stable_mosaic.version = 11 : i64} {
  func.func @_global_module_kernel(%arg0: memref<128x64xbf16, #tpu.memory_space<vmem>>, %arg1: memref<3x64x64xbf16, #tpu.memory_space<vmem>>, %arg2: memref<8x64xf32, #tpu.memory_space<vmem>>, %arg3: memref<3x64x256xbf16, #tpu.memory_space<vmem>>, %arg4: memref<3x64x256xf32, #tpu.memory_space<vmem>>, %arg5: memref<3x256xf32, #tpu.memory_space<vmem>>, %arg6: memref<3x2x64xf32, #tpu.memory_space<vmem>>, %arg7: memref<3x2x64xf32, #tpu.memory_space<vmem>>, %arg8: memref<80x16xf32, #tpu.memory_space<vmem>>, %arg9: memref<2x4x64xf32, #tpu.memory_space<vmem>>, %arg10: memref<8x2xf32, #tpu.memory_space<vmem>>, %arg11: memref<8x16xf32, #tpu.memory_space<vmem>>, %arg12: memref<3x2x64xf32, #tpu.memory_space<vmem>>, %arg13: memref<3x2x64xf32, #tpu.memory_space<vmem>>) attributes {dimension_semantics = [], scalar_prefetch = 0 : i64, scratch_operands = 0 : i64, tpu.core_type = #tpu.core_type<tc>} {
    %c0 = arith.constant 0 : index
    %c0_0 = arith.constant 0 : index
    %0 = vector.load %arg2[%c0, %c0_0] : memref<8x64xf32, #tpu.memory_space<vmem>>, vector<8x64xf32>
    %1 = vector.extract_strided_slice %0 {offsets = [0, 0], sizes = [1, 64], strides = [1, 1]} : vector<8x64xf32> to vector<1x64xf32>
    %2 = vector.extract_strided_slice %0 {offsets = [1, 0], sizes = [1, 64], strides = [1, 1]} : vector<8x64xf32> to vector<1x64xf32>
    %3 = vector.extract_strided_slice %0 {offsets = [2, 0], sizes = [1, 64], strides = [1, 1]} : vector<8x64xf32> to vector<1x64xf32>
    %4 = vector.extract_strided_slice %0 {offsets = [3, 0], sizes = [1, 64], strides = [1, 1]} : vector<8x64xf32> to vector<1x64xf32>
    %5 = vector.shape_cast %4 : vector<1x64xf32> to vector<1x1x64xf32>
    %6 = vector.extract_strided_slice %0 {offsets = [4, 0], sizes = [1, 16], strides = [1, 1]} : vector<8x64xf32> to vector<1x16xf32>
    %7 = vector.extract_strided_slice %0 {offsets = [5, 0], sizes = [1, 2], strides = [1, 1]} : vector<8x64xf32> to vector<1x2xf32>
    %8 = vector.extract_strided_slice %0 {offsets = [6, 0], sizes = [1, 1], strides = [1, 1]} : vector<8x64xf32> to vector<1x1xf32>
    %c0_1 = arith.constant 0 : index
    %c0_2 = arith.constant 0 : index
    %9 = vector.load %arg0[%c0_1, %c0_2] : memref<128x64xbf16, #tpu.memory_space<vmem>>, vector<128x64xbf16>
    %c0_3 = arith.constant 0 : index
    %c0_4 = arith.constant 0 : index
    %c0_5 = arith.constant 0 : index
    %10 = vector.load %arg1[%c0_3, %c0_4, %c0_5] : memref<3x64x64xbf16, #tpu.memory_space<vmem>>, vector<1x64x64xbf16>
    %11 = vector.shape_cast %10 : vector<1x64x64xbf16> to vector<64x64xbf16>
    %cst = arith.constant dense<0.000000e+00> : vector<128x64xf32>
    %12 = tpu.matmul %9, %11, %cst {dimension_numbers = #tpu.dot_dimension_numbers<[1], [0], [0], [1], [0, 0, 1, 1], [], []>} : vector<128x64xbf16>, vector<64x64xbf16>, vector<128x64xf32> -> vector<128x64xf32>
    %13 = vector.broadcast %1 : vector<1x64xf32> to vector<128x64xf32>
    %14 = arith.addf %12, %13 : vector<128x64xf32>
    %cst_6 = arith.constant 0.000000e+00 : f32
    %15 = vector.broadcast %cst_6 : f32 to vector<128x64xf32>
    %16 = arith.maximumf %14, %15 : vector<128x64xf32>
    %17 = arith.truncf %16 : vector<128x64xf32> to vector<128x64xbf16>
    %c1 = arith.constant 1 : index
    %c0_7 = arith.constant 0 : index
    %c0_8 = arith.constant 0 : index
    %18 = vector.load %arg1[%c1, %c0_7, %c0_8] : memref<3x64x64xbf16, #tpu.memory_space<vmem>>, vector<1x64x64xbf16>
    %19 = vector.shape_cast %18 : vector<1x64x64xbf16> to vector<64x64xbf16>
    %cst_9 = arith.constant dense<0.000000e+00> : vector<128x64xf32>
    %20 = tpu.matmul %17, %19, %cst_9 {dimension_numbers = #tpu.dot_dimension_numbers<[1], [0], [0], [1], [0, 0, 1, 1], [], []>} : vector<128x64xbf16>, vector<64x64xbf16>, vector<128x64xf32> -> vector<128x64xf32>
    %21 = vector.broadcast %2 : vector<1x64xf32> to vector<128x64xf32>
    %22 = arith.addf %20, %21 : vector<128x64xf32>
    %cst_10 = arith.constant 0.000000e+00 : f32
    %23 = vector.broadcast %cst_10 : f32 to vector<128x64xf32>
    %24 = arith.maximumf %22, %23 : vector<128x64xf32>
    %25 = arith.truncf %24 : vector<128x64xf32> to vector<128x64xbf16>
    %c2 = arith.constant 2 : index
    %c0_11 = arith.constant 0 : index
    %c0_12 = arith.constant 0 : index
    %26 = vector.load %arg1[%c2, %c0_11, %c0_12] : memref<3x64x64xbf16, #tpu.memory_space<vmem>>, vector<1x64x64xbf16>
    %27 = vector.shape_cast %26 : vector<1x64x64xbf16> to vector<64x64xbf16>
    %cst_13 = arith.constant dense<0.000000e+00> : vector<128x64xf32>
    %28 = tpu.matmul %25, %27, %cst_13 {dimension_numbers = #tpu.dot_dimension_numbers<[1], [0], [0], [1], [0, 0, 1, 1], [], []>} : vector<128x64xbf16>, vector<64x64xbf16>, vector<128x64xf32> -> vector<128x64xf32>
    %29 = vector.broadcast %3 : vector<1x64xf32> to vector<128x64xf32>
    %30 = arith.addf %28, %29 : vector<128x64xf32>
    %cst_14 = arith.constant 0.000000e+00 : f32
    %31 = vector.broadcast %cst_14 : f32 to vector<128x64xf32>
    %32 = arith.maximumf %30, %31 : vector<128x64xf32>
    %33 = vector.shape_cast %32 : vector<128x64xf32> to vector<8x16x64xf32>
    %34 = vector.broadcast %5 : vector<1x1x64xf32> to vector<8x16x64xf32>
    %35 = arith.mulf %33, %34 : vector<8x16x64xf32>
    %cst_15 = arith.constant dense<0.000000e+00> : vector<8x16xf32>
    %36 = vector.multi_reduction <add>, %35, %cst_15 [2] : vector<8x16x64xf32> to vector<8x16xf32>
    %37 = vector.broadcast %8 : vector<1x1xf32> to vector<8x16xf32>
    %38 = arith.addf %36, %37 : vector<8x16xf32>
    %cst_16 = arith.constant dense<0xFF800000> : vector<8xf32>
    %39 = vector.multi_reduction <maximumf>, %38, %cst_16 [1] : vector<8x16xf32> to vector<8xf32>
    %40 = vector.shape_cast %39 : vector<8xf32> to vector<8x1xf32>
    %41 = vector.broadcast %40 : vector<8x1xf32> to vector<8x16xf32>
    %42 = arith.subf %38, %41 : vector<8x16xf32>
    %43 = math.exp %42 : vector<8x16xf32>
    %cst_17 = arith.constant dense<0.000000e+00> : vector<8xf32>
    %44 = vector.multi_reduction <add>, %43, %cst_17 [1] : vector<8x16xf32> to vector<8xf32>
    %45 = vector.shape_cast %44 : vector<8xf32> to vector<8x1xf32>
    %46 = vector.broadcast %45 : vector<8x1xf32> to vector<8x16xf32>
    %47 = arith.divf %43, %46 : vector<8x16xf32>
    %c0_18 = arith.constant 0 : index
    %c0_19 = arith.constant 0 : index
    %48 = vector.load %arg11[%c0_18, %c0_19] : memref<8x16xf32, #tpu.memory_space<vmem>>, vector<8x16xf32>
    tpu.vector_store %arg11[%c0_18, %c0_19], %47 {strides = array<i32>} : memref<8x16xf32, #tpu.memory_space<vmem>>, vector<8x16xf32>,
    %49 = vector.shape_cast %47 : vector<8x16xf32> to vector<8x16x1xf32>
    %50 = vector.broadcast %49 : vector<8x16x1xf32> to vector<8x16x64xf32>
    %51 = arith.mulf %33, %50 : vector<8x16x64xf32>
    %cst_20 = arith.constant dense<0.000000e+00> : vector<8x64xf32>
    %52 = vector.multi_reduction <add>, %51, %cst_20 [1] : vector<8x16x64xf32> to vector<8x64xf32>
    %53 = vector.shape_cast %52 : vector<8x64xf32> to vector<2x4x64xf32>
    %54 = vector.extract_strided_slice %53 {offsets = [0, 0, 0], sizes = [2, 1, 64], strides = [1, 1, 1]} : vector<2x4x64xf32> to vector<2x1x64xf32>
    %55 = vector.shape_cast %54 : vector<2x1x64xf32> to vector<2x64xf32>
    %56 = vector.extract_strided_slice %53 {offsets = [0, 1, 0], sizes = [2, 1, 64], strides = [1, 1, 1]} : vector<2x4x64xf32> to vector<2x1x64xf32>
    %57 = vector.shape_cast %56 : vector<2x1x64xf32> to vector<2x64xf32>
    %58 = vector.extract_strided_slice %53 {offsets = [0, 2, 0], sizes = [2, 1, 64], strides = [1, 1, 1]} : vector<2x4x64xf32> to vector<2x1x64xf32>
    %59 = vector.shape_cast %58 : vector<2x1x64xf32> to vector<2x64xf32>
    %60 = vector.extract_strided_slice %53 {offsets = [0, 3, 0], sizes = [2, 1, 64], strides = [1, 1, 1]} : vector<2x4x64xf32> to vector<2x1x64xf32>
    %61 = vector.shape_cast %60 : vector<2x1x64xf32> to vector<2x64xf32>
    %c0_21 = arith.constant 0 : index
    %c0_22 = arith.constant 0 : index
    %c0_23 = arith.constant 0 : index
    %62 = vector.load %arg3[%c0_21, %c0_22, %c0_23] : memref<3x64x256xbf16, #tpu.memory_space<vmem>>, vector<1x64x256xbf16>
    %63 = vector.shape_cast %62 : vector<1x64x256xbf16> to vector<64x256xbf16>
    %c0_24 = arith.constant 0 : index
    %c0_25 = arith.constant 0 : index
    %c0_26 = arith.constant 0 : index
    %64 = vector.load %arg4[%c0_24, %c0_25, %c0_26] : memref<3x64x256xf32, #tpu.memory_space<vmem>>, vector<1x64x256xf32>
    %65 = vector.shape_cast %64 : vector<1x64x256xf32> to vector<64x256xf32>
    %c0_27 = arith.constant 0 : index
    %c0_28 = arith.constant 0 : index
    %66 = vector.load %arg5[%c0_27, %c0_28] : memref<3x256xf32, #tpu.memory_space<vmem>>, vector<1x256xf32>
    %67 = vector.shape_cast %55 : vector<2x64xf32> to vector<1x2x64xf32>
    %68 = vector.shape_cast %57 : vector<2x64xf32> to vector<1x2x64xf32>
    %69 = vector.shape_cast %59 : vector<2x64xf32> to vector<1x2x64xf32>
    %70 = vector.shape_cast %61 : vector<2x64xf32> to vector<1x2x64xf32>
    %71 = tpu.concatenate %67, %68, %69, %70 in 0 : vector<1x2x64xf32>, vector<1x2x64xf32>, vector<1x2x64xf32>, vector<1x2x64xf32> -> vector<4x2x64xf32>
    %72 = vector.shape_cast %71 : vector<4x2x64xf32> to vector<8x64xf32>
    %73 = arith.truncf %72 : vector<8x64xf32> to vector<8x64xbf16>
    %cst_29 = arith.constant dense<0.000000e+00> : vector<8x256xf32>
    %74 = tpu.matmul %73, %63, %cst_29 {dimension_numbers = #tpu.dot_dimension_numbers<[1], [0], [0], [1], [0, 0, 1, 1], [], []>} : vector<8x64xbf16>, vector<64x256xbf16>, vector<8x256xf32> -> vector<8x256xf32>
    %75 = vector.broadcast %66 : vector<1x256xf32> to vector<8x256xf32>
    %76 = arith.addf %74, %75 : vector<8x256xf32>
    %77 = vector.shape_cast %76 : vector<8x256xf32> to vector<4x2x256xf32>
    %c0_30 = arith.constant 0 : index
    %c0_31 = arith.constant 0 : index
    %c0_32 = arith.constant 0 : index
    %78 = vector.load %arg6[%c0_30, %c0_31, %c0_32] : memref<3x2x64xf32, #tpu.memory_space<vmem>>, vector<1x2x64xf32>
    %79 = vector.shape_cast %78 : vector<1x2x64xf32> to vector<2x64xf32>
    %c0_33 = arith.constant 0 : index
    %c0_34 = arith.constant 0 : index
    %c0_35 = arith.constant 0 : index
    %80 = vector.load %arg7[%c0_33, %c0_34, %c0_35] : memref<3x2x64xf32, #tpu.memory_space<vmem>>, vector<1x2x64xf32>
    %81 = vector.shape_cast %80 : vector<1x2x64xf32> to vector<2x64xf32>
    %82 = vector.extract_strided_slice %77 {offsets = [0, 0, 0], sizes = [1, 2, 256], strides = [1, 1, 1]} : vector<4x2x256xf32> to vector<1x2x256xf32>
    %83 = vector.shape_cast %82 : vector<1x2x256xf32> to vector<2x256xf32>
    %cst_36 = arith.constant dense<0.000000e+00> : vector<2x256xf32>
    %84 = tpu.matmul %79, %65, %cst_36 {dimension_numbers = #tpu.dot_dimension_numbers<[1], [0], [0], [1], [0, 0, 1, 1], [], []>} : vector<2x64xf32>, vector<64x256xf32>, vector<2x256xf32> -> vector<2x256xf32>
    %85 = arith.addf %83, %84 : vector<2x256xf32>
    %86 = vector.extract_strided_slice %85 {offsets = [0, 0], sizes = [2, 192], strides = [1, 1]} : vector<2x256xf32> to vector<2x192xf32>
    %87 = arith.negf %86 : vector<2x192xf32>
    %88 = math.exp %87 : vector<2x192xf32>
    %cst_37 = arith.constant 1.000000e+00 : f32
    %89 = vector.broadcast %cst_37 : f32 to vector<2x192xf32>
    %90 = arith.addf %89, %88 : vector<2x192xf32>
    %91 = arith.divf %89, %90 : vector<2x192xf32>
    %92 = vector.extract_strided_slice %85 {offsets = [0, 192], sizes = [2, 64], strides = [1, 1]} : vector<2x256xf32> to vector<2x64xf32>
    %93 = math.tanh %92 : vector<2x64xf32>
    %94 = vector.extract_strided_slice %91 {offsets = [0, 0], sizes = [2, 64], strides = [1, 1]} : vector<2x192xf32> to vector<2x64xf32>
    %95 = vector.extract_strided_slice %91 {offsets = [0, 64], sizes = [2, 64], strides = [1, 1]} : vector<2x192xf32> to vector<2x64xf32>
    %96 = vector.extract_strided_slice %91 {offsets = [0, 128], sizes = [2, 64], strides = [1, 1]} : vector<2x192xf32> to vector<2x64xf32>
    %97 = arith.mulf %95, %81 : vector<2x64xf32>
    %98 = arith.mulf %94, %93 : vector<2x64xf32>
    %99 = arith.addf %97, %98 : vector<2x64xf32>
    %100 = math.tanh %99 : vector<2x64xf32>
    %101 = arith.mulf %96, %100 : vector<2x64xf32>
    %102 = vector.extract_strided_slice %77 {offsets = [1, 0, 0], sizes = [1, 2, 256], strides = [1, 1, 1]} : vector<4x2x256xf32> to vector<1x2x256xf32>
    %103 = vector.shape_cast %102 : vector<1x2x256xf32> to vector<2x256xf32>
    %cst_38 = arith.constant dense<0.000000e+00> : vector<2x256xf32>
    %104 = tpu.matmul %101, %65, %cst_38 {dimension_numbers = #tpu.dot_dimension_numbers<[1], [0], [0], [1], [0, 0, 1, 1], [], []>} : vector<2x64xf32>, vector<64x256xf32>, vector<2x256xf32> -> vector<2x256xf32>
    %105 = arith.addf %103, %104 : vector<2x256xf32>
    %106 = vector.extract_strided_slice %105 {offsets = [0, 0], sizes = [2, 192], strides = [1, 1]} : vector<2x256xf32> to vector<2x192xf32>
    %107 = arith.negf %106 : vector<2x192xf32>
    %108 = math.exp %107 : vector<2x192xf32>
    %cst_39 = arith.constant 1.000000e+00 : f32
    %109 = vector.broadcast %cst_39 : f32 to vector<2x192xf32>
    %110 = arith.addf %109, %108 : vector<2x192xf32>
    %111 = arith.divf %109, %110 : vector<2x192xf32>
    %112 = vector.extract_strided_slice %105 {offsets = [0, 192], sizes = [2, 64], strides = [1, 1]} : vector<2x256xf32> to vector<2x64xf32>
    %113 = math.tanh %112 : vector<2x64xf32>
    %114 = vector.extract_strided_slice %111 {offsets = [0, 0], sizes = [2, 64], strides = [1, 1]} : vector<2x192xf32> to vector<2x64xf32>
    %115 = vector.extract_strided_slice %111 {offsets = [0, 64], sizes = [2, 64], strides = [1, 1]} : vector<2x192xf32> to vector<2x64xf32>
    %116 = vector.extract_strided_slice %111 {offsets = [0, 128], sizes = [2, 64], strides = [1, 1]} : vector<2x192xf32> to vector<2x64xf32>
    %117 = arith.mulf %115, %99 : vector<2x64xf32>
    %118 = arith.mulf %114, %113 : vector<2x64xf32>
    %119 = arith.addf %117, %118 : vector<2x64xf32>
    %120 = math.tanh %119 : vector<2x64xf32>
    %121 = arith.mulf %116, %120 : vector<2x64xf32>
    %122 = vector.extract_strided_slice %77 {offsets = [2, 0, 0], sizes = [1, 2, 256], strides = [1, 1, 1]} : vector<4x2x256xf32> to vector<1x2x256xf32>
    %123 = vector.shape_cast %122 : vector<1x2x256xf32> to vector<2x256xf32>
    %cst_40 = arith.constant dense<0.000000e+00> : vector<2x256xf32>
    %124 = tpu.matmul %121, %65, %cst_40 {dimension_numbers = #tpu.dot_dimension_numbers<[1], [0], [0], [1], [0, 0, 1, 1], [], []>} : vector<2x64xf32>, vector<64x256xf32>, vector<2x256xf32> -> vector<2x256xf32>
    %125 = arith.addf %123, %124 : vector<2x256xf32>
    %126 = vector.extract_strided_slice %125 {offsets = [0, 0], sizes = [2, 192], strides = [1, 1]} : vector<2x256xf32> to vector<2x192xf32>
    %127 = arith.negf %126 : vector<2x192xf32>
    %128 = math.exp %127 : vector<2x192xf32>
    %cst_41 = arith.constant 1.000000e+00 : f32
    %129 = vector.broadcast %cst_41 : f32 to vector<2x192xf32>
    %130 = arith.addf %129, %128 : vector<2x192xf32>
    %131 = arith.divf %129, %130 : vector<2x192xf32>
    %132 = vector.extract_strided_slice %125 {offsets = [0, 192], sizes = [2, 64], strides = [1, 1]} : vector<2x256xf32> to vector<2x64xf32>
    %133 = math.tanh %132 : vector<2x64xf32>
    %134 = vector.extract_strided_slice %131 {offsets = [0, 0], sizes = [2, 64], strides = [1, 1]} : vector<2x192xf32> to vector<2x64xf32>
    %135 = vector.extract_strided_slice %131 {offsets = [0, 64], sizes = [2, 64], strides = [1, 1]} : vector<2x192xf32> to vector<2x64xf32>
    %136 = vector.extract_strided_slice %131 {offsets = [0, 128], sizes = [2, 64], strides = [1, 1]} : vector<2x192xf32> to vector<2x64xf32>
    %137 = arith.mulf %135, %119 : vector<2x64xf32>
    %138 = arith.mulf %134, %133 : vector<2x64xf32>
    %139 = arith.addf %137, %138 : vector<2x64xf32>
    %140 = math.tanh %139 : vector<2x64xf32>
    %141 = arith.mulf %136, %140 : vector<2x64xf32>
    %142 = vector.extract_strided_slice %77 {offsets = [3, 0, 0], sizes = [1, 2, 256], strides = [1, 1, 1]} : vector<4x2x256xf32> to vector<1x2x256xf32>
    %143 = vector.shape_cast %142 : vector<1x2x256xf32> to vector<2x256xf32>
    %cst_42 = arith.constant dense<0.000000e+00> : vector<2x256xf32>
    %144 = tpu.matmul %141, %65, %cst_42 {dimension_numbers = #tpu.dot_dimension_numbers<[1], [0], [0], [1], [0, 0, 1, 1], [], []>} : vector<2x64xf32>, vector<64x256xf32>, vector<2x256xf32> -> vector<2x256xf32>
    %145 = arith.addf %143, %144 : vector<2x256xf32>
    %146 = vector.extract_strided_slice %145 {offsets = [0, 0], sizes = [2, 192], strides = [1, 1]} : vector<2x256xf32> to vector<2x192xf32>
    %147 = arith.negf %146 : vector<2x192xf32>
    %148 = math.exp %147 : vector<2x192xf32>
    %cst_43 = arith.constant 1.000000e+00 : f32
    %149 = vector.broadcast %cst_43 : f32 to vector<2x192xf32>
    %150 = arith.addf %149, %148 : vector<2x192xf32>
    %151 = arith.divf %149, %150 : vector<2x192xf32>
    %152 = vector.extract_strided_slice %145 {offsets = [0, 192], sizes = [2, 64], strides = [1, 1]} : vector<2x256xf32> to vector<2x64xf32>
    %153 = math.tanh %152 : vector<2x64xf32>
    %154 = vector.extract_strided_slice %151 {offsets = [0, 0], sizes = [2, 64], strides = [1, 1]} : vector<2x192xf32> to vector<2x64xf32>
    %155 = vector.extract_strided_slice %151 {offsets = [0, 64], sizes = [2, 64], strides = [1, 1]} : vector<2x192xf32> to vector<2x64xf32>
    %156 = vector.extract_strided_slice %151 {offsets = [0, 128], sizes = [2, 64], strides = [1, 1]} : vector<2x192xf32> to vector<2x64xf32>
    %157 = arith.mulf %155, %139 : vector<2x64xf32>
    %158 = arith.mulf %154, %153 : vector<2x64xf32>
    %159 = arith.addf %157, %158 : vector<2x64xf32>
    %160 = math.tanh %159 : vector<2x64xf32>
    %161 = arith.mulf %156, %160 : vector<2x64xf32>
    %c1_44 = arith.constant 1 : index
    %c0_45 = arith.constant 0 : index
    %c0_46 = arith.constant 0 : index
    %162 = vector.load %arg3[%c1_44, %c0_45, %c0_46] : memref<3x64x256xbf16, #tpu.memory_space<vmem>>, vector<1x64x256xbf16>
    %163 = vector.shape_cast %162 : vector<1x64x256xbf16> to vector<64x256xbf16>
    %c1_47 = arith.constant 1 : index
    %c0_48 = arith.constant 0 : index
    %c0_49 = arith.constant 0 : index
    %164 = vector.load %arg4[%c1_47, %c0_48, %c0_49] : memref<3x64x256xf32, #tpu.memory_space<vmem>>, vector<1x64x256xf32>
    %165 = vector.shape_cast %164 : vector<1x64x256xf32> to vector<64x256xf32>
    %c1_50 = arith.constant 1 : index
    %c0_51 = arith.constant 0 : index
    %166 = vector.load %arg5[%c1_50, %c0_51] : memref<3x256xf32, #tpu.memory_space<vmem>>, vector<1x256xf32>
    %167 = vector.shape_cast %101 : vector<2x64xf32> to vector<1x2x64xf32>
    %168 = vector.shape_cast %121 : vector<2x64xf32> to vector<1x2x64xf32>
    %169 = vector.shape_cast %141 : vector<2x64xf32> to vector<1x2x64xf32>
    %170 = vector.shape_cast %161 : vector<2x64xf32> to vector<1x2x64xf32>
    %171 = tpu.concatenate %167, %168, %169, %170 in 0 : vector<1x2x64xf32>, vector<1x2x64xf32>, vector<1x2x64xf32>, vector<1x2x64xf32> -> vector<4x2x64xf32>
    %172 = vector.shape_cast %171 : vector<4x2x64xf32> to vector<8x64xf32>
    %173 = arith.truncf %172 : vector<8x64xf32> to vector<8x64xbf16>
    %cst_52 = arith.constant dense<0.000000e+00> : vector<8x256xf32>
    %174 = tpu.matmul %173, %163, %cst_52 {dimension_numbers = #tpu.dot_dimension_numbers<[1], [0], [0], [1], [0, 0, 1, 1], [], []>} : vector<8x64xbf16>, vector<64x256xbf16>, vector<8x256xf32> -> vector<8x256xf32>
    %175 = vector.broadcast %166 : vector<1x256xf32> to vector<8x256xf32>
    %176 = arith.addf %174, %175 : vector<8x256xf32>
    %177 = vector.shape_cast %176 : vector<8x256xf32> to vector<4x2x256xf32>
    %c1_53 = arith.constant 1 : index
    %c0_54 = arith.constant 0 : index
    %c0_55 = arith.constant 0 : index
    %178 = vector.load %arg6[%c1_53, %c0_54, %c0_55] : memref<3x2x64xf32, #tpu.memory_space<vmem>>, vector<1x2x64xf32>
    %179 = vector.shape_cast %178 : vector<1x2x64xf32> to vector<2x64xf32>
    %c1_56 = arith.constant 1 : index
    %c0_57 = arith.constant 0 : index
    %c0_58 = arith.constant 0 : index
    %180 = vector.load %arg7[%c1_56, %c0_57, %c0_58] : memref<3x2x64xf32, #tpu.memory_space<vmem>>, vector<1x2x64xf32>
    %181 = vector.shape_cast %180 : vector<1x2x64xf32> to vector<2x64xf32>
    %182 = vector.extract_strided_slice %177 {offsets = [0, 0, 0], sizes = [1, 2, 256], strides = [1, 1, 1]} : vector<4x2x256xf32> to vector<1x2x256xf32>
    %183 = vector.shape_cast %182 : vector<1x2x256xf32> to vector<2x256xf32>
    %cst_59 = arith.constant dense<0.000000e+00> : vector<2x256xf32>
    %184 = tpu.matmul %179, %165, %cst_59 {dimension_numbers = #tpu.dot_dimension_numbers<[1], [0], [0], [1], [0, 0, 1, 1], [], []>} : vector<2x64xf32>, vector<64x256xf32>, vector<2x256xf32> -> vector<2x256xf32>
    %185 = arith.addf %183, %184 : vector<2x256xf32>
    %186 = vector.extract_strided_slice %185 {offsets = [0, 0], sizes = [2, 192], strides = [1, 1]} : vector<2x256xf32> to vector<2x192xf32>
    %187 = arith.negf %186 : vector<2x192xf32>
    %188 = math.exp %187 : vector<2x192xf32>
    %cst_60 = arith.constant 1.000000e+00 : f32
    %189 = vector.broadcast %cst_60 : f32 to vector<2x192xf32>
    %190 = arith.addf %189, %188 : vector<2x192xf32>
    %191 = arith.divf %189, %190 : vector<2x192xf32>
    %192 = vector.extract_strided_slice %185 {offsets = [0, 192], sizes = [2, 64], strides = [1, 1]} : vector<2x256xf32> to vector<2x64xf32>
    %193 = math.tanh %192 : vector<2x64xf32>
    %194 = vector.extract_strided_slice %191 {offsets = [0, 0], sizes = [2, 64], strides = [1, 1]} : vector<2x192xf32> to vector<2x64xf32>
    %195 = vector.extract_strided_slice %191 {offsets = [0, 64], sizes = [2, 64], strides = [1, 1]} : vector<2x192xf32> to vector<2x64xf32>
    %196 = vector.extract_strided_slice %191 {offsets = [0, 128], sizes = [2, 64], strides = [1, 1]} : vector<2x192xf32> to vector<2x64xf32>
    %197 = arith.mulf %195, %181 : vector<2x64xf32>
    %198 = arith.mulf %194, %193 : vector<2x64xf32>
    %199 = arith.addf %197, %198 : vector<2x64xf32>
    %200 = math.tanh %199 : vector<2x64xf32>
    %201 = arith.mulf %196, %200 : vector<2x64xf32>
    %202 = vector.extract_strided_slice %177 {offsets = [1, 0, 0], sizes = [1, 2, 256], strides = [1, 1, 1]} : vector<4x2x256xf32> to vector<1x2x256xf32>
    %203 = vector.shape_cast %202 : vector<1x2x256xf32> to vector<2x256xf32>
    %cst_61 = arith.constant dense<0.000000e+00> : vector<2x256xf32>
    %204 = tpu.matmul %201, %165, %cst_61 {dimension_numbers = #tpu.dot_dimension_numbers<[1], [0], [0], [1], [0, 0, 1, 1], [], []>} : vector<2x64xf32>, vector<64x256xf32>, vector<2x256xf32> -> vector<2x256xf32>
    %205 = arith.addf %203, %204 : vector<2x256xf32>
    %206 = vector.extract_strided_slice %205 {offsets = [0, 0], sizes = [2, 192], strides = [1, 1]} : vector<2x256xf32> to vector<2x192xf32>
    %207 = arith.negf %206 : vector<2x192xf32>
    %208 = math.exp %207 : vector<2x192xf32>
    %cst_62 = arith.constant 1.000000e+00 : f32
    %209 = vector.broadcast %cst_62 : f32 to vector<2x192xf32>
    %210 = arith.addf %209, %208 : vector<2x192xf32>
    %211 = arith.divf %209, %210 : vector<2x192xf32>
    %212 = vector.extract_strided_slice %205 {offsets = [0, 192], sizes = [2, 64], strides = [1, 1]} : vector<2x256xf32> to vector<2x64xf32>
    %213 = math.tanh %212 : vector<2x64xf32>
    %214 = vector.extract_strided_slice %211 {offsets = [0, 0], sizes = [2, 64], strides = [1, 1]} : vector<2x192xf32> to vector<2x64xf32>
    %215 = vector.extract_strided_slice %211 {offsets = [0, 64], sizes = [2, 64], strides = [1, 1]} : vector<2x192xf32> to vector<2x64xf32>
    %216 = vector.extract_strided_slice %211 {offsets = [0, 128], sizes = [2, 64], strides = [1, 1]} : vector<2x192xf32> to vector<2x64xf32>
    %217 = arith.mulf %215, %199 : vector<2x64xf32>
    %218 = arith.mulf %214, %213 : vector<2x64xf32>
    %219 = arith.addf %217, %218 : vector<2x64xf32>
    %220 = math.tanh %219 : vector<2x64xf32>
    %221 = arith.mulf %216, %220 : vector<2x64xf32>
    %222 = vector.extract_strided_slice %177 {offsets = [2, 0, 0], sizes = [1, 2, 256], strides = [1, 1, 1]} : vector<4x2x256xf32> to vector<1x2x256xf32>
    %223 = vector.shape_cast %222 : vector<1x2x256xf32> to vector<2x256xf32>
    %cst_63 = arith.constant dense<0.000000e+00> : vector<2x256xf32>
    %224 = tpu.matmul %221, %165, %cst_63 {dimension_numbers = #tpu.dot_dimension_numbers<[1], [0], [0], [1], [0, 0, 1, 1], [], []>} : vector<2x64xf32>, vector<64x256xf32>, vector<2x256xf32> -> vector<2x256xf32>
    %225 = arith.addf %223, %224 : vector<2x256xf32>
    %226 = vector.extract_strided_slice %225 {offsets = [0, 0], sizes = [2, 192], strides = [1, 1]} : vector<2x256xf32> to vector<2x192xf32>
    %227 = arith.negf %226 : vector<2x192xf32>
    %228 = math.exp %227 : vector<2x192xf32>
    %cst_64 = arith.constant 1.000000e+00 : f32
    %229 = vector.broadcast %cst_64 : f32 to vector<2x192xf32>
    %230 = arith.addf %229, %228 : vector<2x192xf32>
    %231 = arith.divf %229, %230 : vector<2x192xf32>
    %232 = vector.extract_strided_slice %225 {offsets = [0, 192], sizes = [2, 64], strides = [1, 1]} : vector<2x256xf32> to vector<2x64xf32>
    %233 = math.tanh %232 : vector<2x64xf32>
    %234 = vector.extract_strided_slice %231 {offsets = [0, 0], sizes = [2, 64], strides = [1, 1]} : vector<2x192xf32> to vector<2x64xf32>
    %235 = vector.extract_strided_slice %231 {offsets = [0, 64], sizes = [2, 64], strides = [1, 1]} : vector<2x192xf32> to vector<2x64xf32>
    %236 = vector.extract_strided_slice %231 {offsets = [0, 128], sizes = [2, 64], strides = [1, 1]} : vector<2x192xf32> to vector<2x64xf32>
    %237 = arith.mulf %235, %219 : vector<2x64xf32>
    %238 = arith.mulf %234, %233 : vector<2x64xf32>
    %239 = arith.addf %237, %238 : vector<2x64xf32>
    %240 = math.tanh %239 : vector<2x64xf32>
    %241 = arith.mulf %236, %240 : vector<2x64xf32>
    %242 = vector.extract_strided_slice %177 {offsets = [3, 0, 0], sizes = [1, 2, 256], strides = [1, 1, 1]} : vector<4x2x256xf32> to vector<1x2x256xf32>
    %243 = vector.shape_cast %242 : vector<1x2x256xf32> to vector<2x256xf32>
    %cst_65 = arith.constant dense<0.000000e+00> : vector<2x256xf32>
    %244 = tpu.matmul %241, %165, %cst_65 {dimension_numbers = #tpu.dot_dimension_numbers<[1], [0], [0], [1], [0, 0, 1, 1], [], []>} : vector<2x64xf32>, vector<64x256xf32>, vector<2x256xf32> -> vector<2x256xf32>
    %245 = arith.addf %243, %244 : vector<2x256xf32>
    %246 = vector.extract_strided_slice %245 {offsets = [0, 0], sizes = [2, 192], strides = [1, 1]} : vector<2x256xf32> to vector<2x192xf32>
    %247 = arith.negf %246 : vector<2x192xf32>
    %248 = math.exp %247 : vector<2x192xf32>
    %cst_66 = arith.constant 1.000000e+00 : f32
    %249 = vector.broadcast %cst_66 : f32 to vector<2x192xf32>
    %250 = arith.addf %249, %248 : vector<2x192xf32>
    %251 = arith.divf %249, %250 : vector<2x192xf32>
    %252 = vector.extract_strided_slice %245 {offsets = [0, 192], sizes = [2, 64], strides = [1, 1]} : vector<2x256xf32> to vector<2x64xf32>
    %253 = math.tanh %252 : vector<2x64xf32>
    %254 = vector.extract_strided_slice %251 {offsets = [0, 0], sizes = [2, 64], strides = [1, 1]} : vector<2x192xf32> to vector<2x64xf32>
    %255 = vector.extract_strided_slice %251 {offsets = [0, 64], sizes = [2, 64], strides = [1, 1]} : vector<2x192xf32> to vector<2x64xf32>
    %256 = vector.extract_strided_slice %251 {offsets = [0, 128], sizes = [2, 64], strides = [1, 1]} : vector<2x192xf32> to vector<2x64xf32>
    %257 = arith.mulf %255, %239 : vector<2x64xf32>
    %258 = arith.mulf %254, %253 : vector<2x64xf32>
    %259 = arith.addf %257, %258 : vector<2x64xf32>
    %260 = math.tanh %259 : vector<2x64xf32>
    %261 = arith.mulf %256, %260 : vector<2x64xf32>
    %c2_67 = arith.constant 2 : index
    %c0_68 = arith.constant 0 : index
    %c0_69 = arith.constant 0 : index
    %262 = vector.load %arg3[%c2_67, %c0_68, %c0_69] : memref<3x64x256xbf16, #tpu.memory_space<vmem>>, vector<1x64x256xbf16>
    %263 = vector.shape_cast %262 : vector<1x64x256xbf16> to vector<64x256xbf16>
    %c2_70 = arith.constant 2 : index
    %c0_71 = arith.constant 0 : index
    %c0_72 = arith.constant 0 : index
    %264 = vector.load %arg4[%c2_70, %c0_71, %c0_72] : memref<3x64x256xf32, #tpu.memory_space<vmem>>, vector<1x64x256xf32>
    %265 = vector.shape_cast %264 : vector<1x64x256xf32> to vector<64x256xf32>
    %c2_73 = arith.constant 2 : index
    %c0_74 = arith.constant 0 : index
    %266 = vector.load %arg5[%c2_73, %c0_74] : memref<3x256xf32, #tpu.memory_space<vmem>>, vector<1x256xf32>
    %267 = vector.shape_cast %201 : vector<2x64xf32> to vector<1x2x64xf32>
    %268 = vector.shape_cast %221 : vector<2x64xf32> to vector<1x2x64xf32>
    %269 = vector.shape_cast %241 : vector<2x64xf32> to vector<1x2x64xf32>
    %270 = vector.shape_cast %261 : vector<2x64xf32> to vector<1x2x64xf32>
    %271 = tpu.concatenate %267, %268, %269, %270 in 0 : vector<1x2x64xf32>, vector<1x2x64xf32>, vector<1x2x64xf32>, vector<1x2x64xf32> -> vector<4x2x64xf32>
    %272 = vector.shape_cast %271 : vector<4x2x64xf32> to vector<8x64xf32>
    %273 = arith.truncf %272 : vector<8x64xf32> to vector<8x64xbf16>
    %cst_75 = arith.constant dense<0.000000e+00> : vector<8x256xf32>
    %274 = tpu.matmul %273, %263, %cst_75 {dimension_numbers = #tpu.dot_dimension_numbers<[1], [0], [0], [1], [0, 0, 1, 1], [], []>} : vector<8x64xbf16>, vector<64x256xbf16>, vector<8x256xf32> -> vector<8x256xf32>
    %275 = vector.broadcast %266 : vector<1x256xf32> to vector<8x256xf32>
    %276 = arith.addf %274, %275 : vector<8x256xf32>
    %277 = vector.shape_cast %276 : vector<8x256xf32> to vector<4x2x256xf32>
    %c2_76 = arith.constant 2 : index
    %c0_77 = arith.constant 0 : index
    %c0_78 = arith.constant 0 : index
    %278 = vector.load %arg6[%c2_76, %c0_77, %c0_78] : memref<3x2x64xf32, #tpu.memory_space<vmem>>, vector<1x2x64xf32>
    %279 = vector.shape_cast %278 : vector<1x2x64xf32> to vector<2x64xf32>
    %c2_79 = arith.constant 2 : index
    %c0_80 = arith.constant 0 : index
    %c0_81 = arith.constant 0 : index
    %280 = vector.load %arg7[%c2_79, %c0_80, %c0_81] : memref<3x2x64xf32, #tpu.memory_space<vmem>>, vector<1x2x64xf32>
    %281 = vector.shape_cast %280 : vector<1x2x64xf32> to vector<2x64xf32>
    %282 = vector.extract_strided_slice %277 {offsets = [0, 0, 0], sizes = [1, 2, 256], strides = [1, 1, 1]} : vector<4x2x256xf32> to vector<1x2x256xf32>
    %283 = vector.shape_cast %282 : vector<1x2x256xf32> to vector<2x256xf32>
    %cst_82 = arith.constant dense<0.000000e+00> : vector<2x256xf32>
    %284 = tpu.matmul %279, %265, %cst_82 {dimension_numbers = #tpu.dot_dimension_numbers<[1], [0], [0], [1], [0, 0, 1, 1], [], []>} : vector<2x64xf32>, vector<64x256xf32>, vector<2x256xf32> -> vector<2x256xf32>
    %285 = arith.addf %283, %284 : vector<2x256xf32>
    %286 = vector.extract_strided_slice %285 {offsets = [0, 0], sizes = [2, 192], strides = [1, 1]} : vector<2x256xf32> to vector<2x192xf32>
    %287 = arith.negf %286 : vector<2x192xf32>
    %288 = math.exp %287 : vector<2x192xf32>
    %cst_83 = arith.constant 1.000000e+00 : f32
    %289 = vector.broadcast %cst_83 : f32 to vector<2x192xf32>
    %290 = arith.addf %289, %288 : vector<2x192xf32>
    %291 = arith.divf %289, %290 : vector<2x192xf32>
    %292 = vector.extract_strided_slice %285 {offsets = [0, 192], sizes = [2, 64], strides = [1, 1]} : vector<2x256xf32> to vector<2x64xf32>
    %293 = math.tanh %292 : vector<2x64xf32>
    %294 = vector.extract_strided_slice %291 {offsets = [0, 0], sizes = [2, 64], strides = [1, 1]} : vector<2x192xf32> to vector<2x64xf32>
    %295 = vector.extract_strided_slice %291 {offsets = [0, 64], sizes = [2, 64], strides = [1, 1]} : vector<2x192xf32> to vector<2x64xf32>
    %296 = vector.extract_strided_slice %291 {offsets = [0, 128], sizes = [2, 64], strides = [1, 1]} : vector<2x192xf32> to vector<2x64xf32>
    %297 = arith.mulf %295, %281 : vector<2x64xf32>
    %298 = arith.mulf %294, %293 : vector<2x64xf32>
    %299 = arith.addf %297, %298 : vector<2x64xf32>
    %300 = math.tanh %299 : vector<2x64xf32>
    %301 = arith.mulf %296, %300 : vector<2x64xf32>
    %302 = vector.extract_strided_slice %277 {offsets = [1, 0, 0], sizes = [1, 2, 256], strides = [1, 1, 1]} : vector<4x2x256xf32> to vector<1x2x256xf32>
    %303 = vector.shape_cast %302 : vector<1x2x256xf32> to vector<2x256xf32>
    %cst_84 = arith.constant dense<0.000000e+00> : vector<2x256xf32>
    %304 = tpu.matmul %301, %265, %cst_84 {dimension_numbers = #tpu.dot_dimension_numbers<[1], [0], [0], [1], [0, 0, 1, 1], [], []>} : vector<2x64xf32>, vector<64x256xf32>, vector<2x256xf32> -> vector<2x256xf32>
    %305 = arith.addf %303, %304 : vector<2x256xf32>
    %306 = vector.extract_strided_slice %305 {offsets = [0, 0], sizes = [2, 192], strides = [1, 1]} : vector<2x256xf32> to vector<2x192xf32>
    %307 = arith.negf %306 : vector<2x192xf32>
    %308 = math.exp %307 : vector<2x192xf32>
    %cst_85 = arith.constant 1.000000e+00 : f32
    %309 = vector.broadcast %cst_85 : f32 to vector<2x192xf32>
    %310 = arith.addf %309, %308 : vector<2x192xf32>
    %311 = arith.divf %309, %310 : vector<2x192xf32>
    %312 = vector.extract_strided_slice %305 {offsets = [0, 192], sizes = [2, 64], strides = [1, 1]} : vector<2x256xf32> to vector<2x64xf32>
    %313 = math.tanh %312 : vector<2x64xf32>
    %314 = vector.extract_strided_slice %311 {offsets = [0, 0], sizes = [2, 64], strides = [1, 1]} : vector<2x192xf32> to vector<2x64xf32>
    %315 = vector.extract_strided_slice %311 {offsets = [0, 64], sizes = [2, 64], strides = [1, 1]} : vector<2x192xf32> to vector<2x64xf32>
    %316 = vector.extract_strided_slice %311 {offsets = [0, 128], sizes = [2, 64], strides = [1, 1]} : vector<2x192xf32> to vector<2x64xf32>
    %317 = arith.mulf %315, %299 : vector<2x64xf32>
    %318 = arith.mulf %314, %313 : vector<2x64xf32>
    %319 = arith.addf %317, %318 : vector<2x64xf32>
    %320 = math.tanh %319 : vector<2x64xf32>
    %321 = arith.mulf %316, %320 : vector<2x64xf32>
    %322 = vector.extract_strided_slice %277 {offsets = [2, 0, 0], sizes = [1, 2, 256], strides = [1, 1, 1]} : vector<4x2x256xf32> to vector<1x2x256xf32>
    %323 = vector.shape_cast %322 : vector<1x2x256xf32> to vector<2x256xf32>
    %cst_86 = arith.constant dense<0.000000e+00> : vector<2x256xf32>
    %324 = tpu.matmul %321, %265, %cst_86 {dimension_numbers = #tpu.dot_dimension_numbers<[1], [0], [0], [1], [0, 0, 1, 1], [], []>} : vector<2x64xf32>, vector<64x256xf32>, vector<2x256xf32> -> vector<2x256xf32>
    %325 = arith.addf %323, %324 : vector<2x256xf32>
    %326 = vector.extract_strided_slice %325 {offsets = [0, 0], sizes = [2, 192], strides = [1, 1]} : vector<2x256xf32> to vector<2x192xf32>
    %327 = arith.negf %326 : vector<2x192xf32>
    %328 = math.exp %327 : vector<2x192xf32>
    %cst_87 = arith.constant 1.000000e+00 : f32
    %329 = vector.broadcast %cst_87 : f32 to vector<2x192xf32>
    %330 = arith.addf %329, %328 : vector<2x192xf32>
    %331 = arith.divf %329, %330 : vector<2x192xf32>
    %332 = vector.extract_strided_slice %325 {offsets = [0, 192], sizes = [2, 64], strides = [1, 1]} : vector<2x256xf32> to vector<2x64xf32>
    %333 = math.tanh %332 : vector<2x64xf32>
    %334 = vector.extract_strided_slice %331 {offsets = [0, 0], sizes = [2, 64], strides = [1, 1]} : vector<2x192xf32> to vector<2x64xf32>
    %335 = vector.extract_strided_slice %331 {offsets = [0, 64], sizes = [2, 64], strides = [1, 1]} : vector<2x192xf32> to vector<2x64xf32>
    %336 = vector.extract_strided_slice %331 {offsets = [0, 128], sizes = [2, 64], strides = [1, 1]} : vector<2x192xf32> to vector<2x64xf32>
    %337 = arith.mulf %335, %319 : vector<2x64xf32>
    %338 = arith.mulf %334, %333 : vector<2x64xf32>
    %339 = arith.addf %337, %338 : vector<2x64xf32>
    %340 = math.tanh %339 : vector<2x64xf32>
    %341 = arith.mulf %336, %340 : vector<2x64xf32>
    %342 = vector.extract_strided_slice %277 {offsets = [3, 0, 0], sizes = [1, 2, 256], strides = [1, 1, 1]} : vector<4x2x256xf32> to vector<1x2x256xf32>
    %343 = vector.shape_cast %342 : vector<1x2x256xf32> to vector<2x256xf32>
    %cst_88 = arith.constant dense<0.000000e+00> : vector<2x256xf32>
    %344 = tpu.matmul %341, %265, %cst_88 {dimension_numbers = #tpu.dot_dimension_numbers<[1], [0], [0], [1], [0, 0, 1, 1], [], []>} : vector<2x64xf32>, vector<64x256xf32>, vector<2x256xf32> -> vector<2x256xf32>
    %345 = arith.addf %343, %344 : vector<2x256xf32>
    %346 = vector.extract_strided_slice %345 {offsets = [0, 0], sizes = [2, 192], strides = [1, 1]} : vector<2x256xf32> to vector<2x192xf32>
    %347 = arith.negf %346 : vector<2x192xf32>
    %348 = math.exp %347 : vector<2x192xf32>
    %cst_89 = arith.constant 1.000000e+00 : f32
    %349 = vector.broadcast %cst_89 : f32 to vector<2x192xf32>
    %350 = arith.addf %349, %348 : vector<2x192xf32>
    %351 = arith.divf %349, %350 : vector<2x192xf32>
    %352 = vector.extract_strided_slice %345 {offsets = [0, 192], sizes = [2, 64], strides = [1, 1]} : vector<2x256xf32> to vector<2x64xf32>
    %353 = math.tanh %352 : vector<2x64xf32>
    %354 = vector.extract_strided_slice %351 {offsets = [0, 0], sizes = [2, 64], strides = [1, 1]} : vector<2x192xf32> to vector<2x64xf32>
    %355 = vector.extract_strided_slice %351 {offsets = [0, 64], sizes = [2, 64], strides = [1, 1]} : vector<2x192xf32> to vector<2x64xf32>
    %356 = vector.extract_strided_slice %351 {offsets = [0, 128], sizes = [2, 64], strides = [1, 1]} : vector<2x192xf32> to vector<2x64xf32>
    %357 = arith.mulf %355, %339 : vector<2x64xf32>
    %358 = arith.mulf %354, %353 : vector<2x64xf32>
    %359 = arith.addf %357, %358 : vector<2x64xf32>
    %360 = math.tanh %359 : vector<2x64xf32>
    %361 = arith.mulf %356, %360 : vector<2x64xf32>
    %362 = vector.shape_cast %301 : vector<2x64xf32> to vector<2x1x64xf32>
    %363 = vector.shape_cast %321 : vector<2x64xf32> to vector<2x1x64xf32>
    %364 = vector.shape_cast %341 : vector<2x64xf32> to vector<2x1x64xf32>
    %365 = vector.shape_cast %361 : vector<2x64xf32> to vector<2x1x64xf32>
    %366 = tpu.concatenate %362, %363, %364, %365 in 1 : vector<2x1x64xf32>, vector<2x1x64xf32>, vector<2x1x64xf32>, vector<2x1x64xf32> -> vector<2x4x64xf32>
    %c0_90 = arith.constant 0 : index
    %c0_91 = arith.constant 0 : index
    %c0_92 = arith.constant 0 : index
    %367 = vector.load %arg9[%c0_90, %c0_91, %c0_92] : memref<2x4x64xf32, #tpu.memory_space<vmem>>, vector<2x4x64xf32>
    tpu.vector_store %arg9[%c0_90, %c0_91, %c0_92], %366 {strides = array<i32>} : memref<2x4x64xf32, #tpu.memory_space<vmem>>, vector<2x4x64xf32>,
    %368 = vector.shape_cast %161 : vector<2x64xf32> to vector<1x2x64xf32>
    %369 = vector.shape_cast %261 : vector<2x64xf32> to vector<1x2x64xf32>
    %370 = vector.shape_cast %361 : vector<2x64xf32> to vector<1x2x64xf32>
    %371 = tpu.concatenate %368, %369, %370 in 0 : vector<1x2x64xf32>, vector<1x2x64xf32>, vector<1x2x64xf32> -> vector<3x2x64xf32>
    %c0_93 = arith.constant 0 : index
    %c0_94 = arith.constant 0 : index
    %c0_95 = arith.constant 0 : index
    %372 = vector.load %arg12[%c0_93, %c0_94, %c0_95] : memref<3x2x64xf32, #tpu.memory_space<vmem>>, vector<3x2x64xf32>
    tpu.vector_store %arg12[%c0_93, %c0_94, %c0_95], %371 {strides = array<i32>} : memref<3x2x64xf32, #tpu.memory_space<vmem>>, vector<3x2x64xf32>,
    %373 = vector.shape_cast %159 : vector<2x64xf32> to vector<1x2x64xf32>
    %374 = vector.shape_cast %259 : vector<2x64xf32> to vector<1x2x64xf32>
    %375 = vector.shape_cast %359 : vector<2x64xf32> to vector<1x2x64xf32>
    %376 = tpu.concatenate %373, %374, %375 in 0 : vector<1x2x64xf32>, vector<1x2x64xf32>, vector<1x2x64xf32> -> vector<3x2x64xf32>
    %c0_96 = arith.constant 0 : index
    %c0_97 = arith.constant 0 : index
    %c0_98 = arith.constant 0 : index
    %377 = vector.load %arg13[%c0_96, %c0_97, %c0_98] : memref<3x2x64xf32, #tpu.memory_space<vmem>>, vector<3x2x64xf32>
    tpu.vector_store %arg13[%c0_96, %c0_97, %c0_98], %376 {strides = array<i32>} : memref<3x2x64xf32, #tpu.memory_space<vmem>>, vector<3x2x64xf32>,
    %c0_99 = arith.constant 0 : index
    %c0_100 = arith.constant 0 : index
    %378 = vector.load %arg8[%c0_99, %c0_100] : memref<80x16xf32, #tpu.memory_space<vmem>>, vector<80x16xf32>
    %379 = vector.extract_strided_slice %378 {offsets = [0, 0], sizes = [64, 16], strides = [1, 1]} : vector<80x16xf32> to vector<64x16xf32>
    %380 = vector.extract_strided_slice %378 {offsets = [64, 0], sizes = [16, 2], strides = [1, 1]} : vector<80x16xf32> to vector<16x2xf32>
    %381 = vector.shape_cast %366 : vector<2x4x64xf32> to vector<8x64xf32>
    %cst_101 = arith.constant dense<0.000000e+00> : vector<8x16xf32>
    %382 = tpu.matmul %381, %379, %cst_101 {dimension_numbers = #tpu.dot_dimension_numbers<[1], [0], [0], [1], [0, 0, 1, 1], [], []>} : vector<8x64xf32>, vector<64x16xf32>, vector<8x16xf32> -> vector<8x16xf32>
    %383 = vector.broadcast %6 : vector<1x16xf32> to vector<8x16xf32>
    %384 = arith.addf %382, %383 : vector<8x16xf32>
    %cst_102 = arith.constant 0.000000e+00 : f32
    %385 = vector.broadcast %cst_102 : f32 to vector<8x16xf32>
    %386 = arith.maximumf %384, %385 : vector<8x16xf32>
    %cst_103 = arith.constant dense<0.000000e+00> : vector<8x2xf32>
    %387 = tpu.matmul %386, %380, %cst_103 {dimension_numbers = #tpu.dot_dimension_numbers<[1], [0], [0], [1], [0, 0, 1, 1], [], []>} : vector<8x16xf32>, vector<16x2xf32>, vector<8x2xf32> -> vector<8x2xf32>
    %388 = vector.broadcast %7 : vector<1x2xf32> to vector<8x2xf32>
    %389 = arith.addf %387, %388 : vector<8x2xf32>
    %c0_104 = arith.constant 0 : index
    %c0_105 = arith.constant 0 : index
    %390 = vector.load %arg10[%c0_104, %c0_105] : memref<8x2xf32, #tpu.memory_space<vmem>>, vector<8x2xf32>
    tpu.vector_store %arg10[%c0_104, %c0_105], %389 {strides = array<i32>} : memref<8x2xf32, #tpu.memory_space<vmem>>, vector<8x2xf32>,
    return
  }
}

</mosaic_0001>

<bundles_post_ra>
// kernel: tpu_custom_call.1
= control target key start
LH: loop header
LB: loop body
LE: loop exit
PB: predicated region body
PF: predicated region fallthrough
CT: control target
= control target key end

     0   :  { %19 = vsyncpa [#allocation3], 0  ;;  %s4843_s0 = inlined_call_operand.vmem [shape: bf16[128,64], index: 0, kind: input, shape index: {}]   ;;  %s4844_s1 = inlined_call_operand.vmem [shape: bf16[3,64,64], index: 1, kind: input, shape index: {}]   ;;  %s4845_s2 = inlined_call_operand.vmem [shape: f32[8,64], index: 2, kind: input, shape index: {}]   ;;  %s4846_s3 = inlined_call_operand.hbm [shape: bf16[3,64,256], index: 3, kind: input, shape index: {}]   ;;  %s4847_s4 = inlined_call_operand.hbm [shape: f32[3,64,256], index: 4, kind: input, shape index: {}]   ;;  %s4848_s5 = inlined_call_operand.vmem [shape: f32[3,256], index: 5, kind: input, shape index: {}]   ;;  %s4849_s6 = inlined_call_operand.vmem [shape: f32[3,2,64], index: 6, kind: input, shape index: {}]   ;;  %s4850_s7 = inlined_call_operand.vmem [shape: f32[3,2,64], index: 7, kind: input, shape index: {}]   ;;  %s4851_s8 = inlined_call_operand.vmem [shape: f32[80,16], index: 8, kind: input, shape index: {}]   ;;  %s4852_s9 = inlined_call_operand.hbm [shape: f32[2,4,64], index: 9, kind: output, shape index: {0}]   ;;  %s4853_s10 = inlined_call_operand.vmem [shape: f32[8,2], index: 10, kind: output, shape index: {1}]   ;;  %s4854_s11 = inlined_call_operand.hbm [shape: f32[8,16], index: 11, kind: output, shape index: {2}]   ;;  %s4855_s12 = inlined_call_operand.hbm [shape: f32[3,2,64], index: 12, kind: output, shape index: {3}]   ;;  %s4856_s13 = inlined_call_operand.hbm [shape: f32[3,2,64], index: 13, kind: output, shape index: {4}]  }
   0x1   :  { %20 = vsyncpa [#allocation6], 0 }
   0x2   :  { %21 = vsyncpa [#allocation4], 0 }
   0x3   :  { %22 = vsyncpa [#allocation9], 0 }
   0x4   :  { %23 = vsyncpa [#allocation12], 0  ;;  %s34_s27 = sshll.u32 %s4846_s3, 4  ;;  %s3549_s28 = smov [#allocation2]   ;;  %s35_s27 = int_to_ptr.hbm [resolvable:$true] %s34_s27 }
   0x5   :  { %s36_s29 = sshll.u32 %s3549_s28, 4  ;;  %s47_s15 = sshll.u32 %s4847_s4, 4  ;;  %s37_s29 = int_to_ptr.vmem [resolvable:$true] %s36_s29  ;;  %s48_s15 = int_to_ptr.hbm [resolvable:$true] %s47_s15 }
   0x6   :  { %s3550_s16 = smov 128   ;;  %s3551_s17 = smov 8  }
   0x7   :  { %42 = dma.hbm_to_vmem [thread:$0]  %s35_s27, 3072, %s37_s29, [#allocation3], %s3550_s16, %s3550_s16, %s3551_s17  }
   0x8   :  { %s3552_s18 = smov [#allocation5]   ;;  %s3553_s20 = smov 256  }
   0x9   :  { %s49_s19 = sshll.u32 %s3552_s18, 4  ;;  %s3554_s21 = smov 16   ;;  %s50_s19 = int_to_ptr.vmem [resolvable:$true] %s49_s19 }
   0xa   :  { %55 = dma.hbm_to_vmem [thread:$0]  %s48_s15, 6144, %s50_s19, [#allocation6], %s3553_s20, %s3553_s20, %s3554_s21  }
   0xb   :  { %3539 = dma.done.wait [#allocation3], 3072  }
   0xc   :  { %3540 = vsyncadd [#allocation3], 4294964224 }
   0xd   :  { %3541 = dma.done.wait [#allocation6], 6144  }
   0xe   :  { %3542 = vsyncadd [#allocation6], 4294961152  ;;  %v3197_v0 = vld [vmem:[%s4844_s1 + $0x18] sm:$0xff]  ;;  %v3196_v1 = vld [vmem:[%s4844_s1 + $0x10] sm:$0xff]  ;;  %vm163_vm0 = vcmask 523264   ;;  %vm622_vm1 = vcmask 130112  }
   0xf   :  { %192 = vmatpush.bf16.msra.mxu0 %v3197_v0  ;;  %v3195_v2 = vld [vmem:[%s4844_s1 + $0x8] sm:$0xff]  ;;  %v3194_v3 = vld [vmem:[%s4844_s1] sm:$0xff]  ;;  %v3188_v6 = vld [vmem:[%s4843_s0 + $0x10] sm:$0xff]  ;;  %vm645_vm2 = vcmask 1041409   ;;  %vm647_vm3 = vcmask 1042434   ;;  %vm649_vm4 = vcmask 1043459  }
  0x10   :  { %v3186_v4 = vld [vmem:[%s4843_s0] sm:$0xff]  ;;  %v3187_v5 = vld [vmem:[%s4843_s0 + $0x8] sm:$0xff]  ;;  %v3189_v7 = vld [vmem:[%s4843_s0 + $0x18] sm:$0xff]  ;;  %vm651_vm5 = vcmask 1044484   ;;  %vm4876_vm6 = vcmask 1045509   ;;  %vm4872_vm7 = vcmask 1046534  }
  0x11   :  { %v3190_v8 = vld [vmem:[%s4843_s0 + $0x20] sm:$0xff]  ;;  %v3191_v9 = vld [vmem:[%s4843_s0 + $0x28] sm:$0xff]  ;;  %v3201_v10 = vld [vmem:[%s4844_s1 + $0x38] sm:$0xff]  ;;  %vm4871_vm8 = vcmask 1047559   ;;  %vm4867_vm9 = vcmask 130048   ;;  %s3556_s25 = smov 64  }
  0x12   :  { %v3192_v11 = vld [vmem:[%s4843_s0 + $0x30] sm:$0xff]  ;;  %323 = vmatpush.bf16.msra.mxu1 %v3201_v10  ;;  %v3199_v13 = vld [vmem:[%s4844_s1 + $0x28] sm:$0xff]  ;;  %v3198_v14 = vld [vmem:[%s4844_s1 + $0x20] sm:$0xff]  ;;  %s2867_s3 = sshll.u32 %s4854_s11, 4  ;;  %s3557_s22 = smov [#allocation8]   ;;  %s2868_s3 = int_to_ptr.hbm [resolvable:$true] %s2867_s3 }
  0x13   :  { %193 = vmatpush.bf16.msra.mxu0 %v3196_v1  ;;  %v3200_v12 = vld [vmem:[%s4844_s1 + $0x30] sm:$0xff]  ;;  %v3193_v15 = vld [vmem:[%s4843_s0 + $0x38] sm:$0xff]  ;;  %v3699_v16 = vld [vmem:[%s4845_s2] sm:$0xff]  ;;  %s2865_s4 = sshll.u32 %s3557_s22, 4  ;;  %s3559_s26 = smov 4   ;;  %s2866_s4 = int_to_ptr.vmem [resolvable:$true] %s2865_s4 }
  0x14   :  { %v3702_v18 = vperm.slane %v3699_v16, 0  ;;  %v3205_v0 = vld [vmem:[%s4844_s1 + $0x58] sm:$0xff]  ;;  %s3560_s27 = smov [#allocation10]   ;;  %s2877_s30 = sshll.u32 %s4855_s12, 4  ;;  %s2878_s30 = int_to_ptr.hbm [resolvable:$true] %s2877_s30 }
  0x15   :  { %454 = vmatpush.bf16.msra.mxu2 %v3205_v0  ;;  %s2875_s28 = sshll.u32 %s3560_s27, 4  ;;  %s3561_s14 = smov 32   ;;  %s2876_s28 = int_to_ptr.vmem [resolvable:$true] %s2875_s28 }
  0x16   :  { %324 = vmatpush.bf16.msra.mxu1 %v3200_v12  ;;  %s3562_s15 = smov 2   ;;  %s3563_s0 = smov [#allocation11]  }
  0x17   :  { %194 = vmatpush.bf16.msra.mxu0 %v3195_v2  ;;  %s2888_s18 = sshll.u32 %s3563_s0, 4  ;;  %s2889_s18 = int_to_ptr.vmem [resolvable:$true] %s2888_s18 }
  0x1a   :  { %325 = vmatpush.bf16.msra.mxu1 %v3199_v13 }
  0x1b   :  { %195 = vmatpush.bf16.msra.mxu0 %v3194_v3 }
  0x1e   :  { %2968 = vmatmul.msk.bf16.vlgmr.msra.gmra.mxu0 %vm163_vm0, %v3186_v4  ;;  %326 = vmatpush.bf16.msra.mxu1 %v3198_v14  ;;  %v3204_v4 = vld [vmem:[%s4844_s1 + $0x50] sm:$0xff] }
  0x1f   :  { %455 = vmatpush.bf16.msra.mxu2 %v3204_v4 }
  0x2e   :  { %2969 = vmatmul.msk.bf16.gmra.mxu0 %vm163_vm0, %v3187_v5 }
  0x3e   :  { %2970 = vmatmul.msk.bf16.gmra.mxu0 %vm163_vm0, %v3188_v6  ;;  %v3203_v6 = vld [vmem:[%s4844_s1 + $0x48] sm:$0xff] }
  0x3f   :  { %456 = vmatpush.bf16.msra.mxu2 %v3203_v6 }
  0x4e   :  { %2971 = vmatmul.msk.bf16.gmra.mxu0 %vm163_vm0, %v3189_v7  ;;  %v3202_v7 = vld [vmem:[%s4844_s1 + $0x40] sm:$0xff] }
  0x4f   :  { %457 = vmatpush.bf16.msra.mxu2 %v3202_v7 }
  0x5e   :  { %2972 = vmatmul.msk.bf16.gmra.mxu0 %vm163_vm0, %v3190_v8 }
  0x6e   :  { %2973 = vmatmul.msk.bf16.gmra.mxu0 %vm163_vm0, %v3191_v9 }
  0x7e   :  { %2974 = vmatmul.msk.bf16.gmra.mxu0 %vm163_vm0, %v3192_v11 }
  0x8e   :  { %2975 = vmatmul.msk.bf16.gmra.mxu0 %vm163_vm0, %v3193_v15  ;;  %v270_v15 = vperm.slane %v3699_v16, 1 }
  0x9b   :  { %v197_v17 = vpop.f32.mrf.mxu0 }
  0x9c   :  { %v198_v19 = vadd.f32 %v197_v17, %v3702_v18 }
  0x9e   :  { %v237_v22 = vmax.f32 %v198_v19, 0.0 }
  0xa3   :  { %v199_v20 = vpop.f32.mrf.mxu0 }
  0xa4   :  { %v200_v21 = vadd.f32 %v199_v20, %v3702_v18 }
  0xa6   :  { %v238_v23 = vmax.f32 %v200_v21, 0.0 }
  0xa8   :  { %v253_v24 = vpack.c.bf16 %v238_v23, %v237_v22 }
  0xaa   :  { %3000 = vmatmul.msk.bf16.vlgmr.msra.gmra.mxu1 %vm163_vm0, %v253_v24 }
  0xab   :  { %v202_v25 = vpop.f32.mrf.mxu0 }
  0xac   :  { %v203_v26 = vadd.f32 %v202_v25, %v3702_v18 }
  0xae   :  { %v239_v29 = vmax.f32 %v203_v26, 0.0 }
  0xb3   :  { %v204_v27 = vpop.f32.mrf.mxu0 }
  0xb4   :  { %v205_v28 = vadd.f32 %v204_v27, %v3702_v18 }
  0xb6   :  { %v240_v30 = vmax.f32 %v205_v28, 0.0 }
  0xb8   :  { %v254_v31 = vpack.c.bf16 %v240_v30, %v239_v29 }
  0xba   :  { %3001 = vmatmul.msk.bf16.gmra.mxu1 %vm163_vm0, %v254_v31 }
  0xbb   :  { %v207_v32 = vpop.f32.mrf.mxu0 }
  0xbc   :  { %v208_v33 = vadd.f32 %v207_v32, %v3702_v18 }
  0xbe   :  { %v241_v36 = vmax.f32 %v208_v33, 0.0 }
  0xc3   :  { %v209_v34 = vpop.f32.mrf.mxu0 }
  0xc4   :  { %v210_v35 = vadd.f32 %v209_v34, %v3702_v18 }
  0xc6   :  { %v242_v37 = vmax.f32 %v210_v35, 0.0 }
  0xc8   :  { %v255_v38 = vpack.c.bf16 %v242_v37, %v241_v36 }
  0xca   :  { %3002 = vmatmul.msk.bf16.gmra.mxu1 %vm163_vm0, %v255_v38 }
  0xcb   :  { %v212_v39 = vpop.f32.mrf.mxu0 }
  0xcc   :  { %v213_v40 = vadd.f32 %v212_v39, %v3702_v18 }
  0xce   :  { %v243_v43 = vmax.f32 %v213_v40, 0.0 }
  0xd3   :  { %v214_v41 = vpop.f32.mrf.mxu0 }
  0xd4   :  { %v215_v42 = vadd.f32 %v214_v41, %v3702_v18 }
  0xd6   :  { %v244_v44 = vmax.f32 %v215_v42, 0.0 }
  0xd8   :  { %v256_v45 = vpack.c.bf16 %v244_v44, %v243_v43 }
  0xda   :  { %3003 = vmatmul.msk.bf16.gmra.mxu1 %vm163_vm0, %v256_v45 }
  0xdb   :  { %v217_v46 = vpop.f32.mrf.mxu0 }
  0xdc   :  { %v218_v47 = vadd.f32 %v217_v46, %v3702_v18 }
  0xde   :  { %v245_v50 = vmax.f32 %v218_v47, 0.0 }
  0xe3   :  { %v219_v48 = vpop.f32.mrf.mxu0 }
  0xe4   :  { %v220_v49 = vadd.f32 %v219_v48, %v3702_v18 }
  0xe6   :  { %v246_v51 = vmax.f32 %v220_v49, 0.0 }
  0xe8   :  { %v257_v52 = vpack.c.bf16 %v246_v51, %v245_v50 }
  0xea   :  { %3004 = vmatmul.msk.bf16.gmra.mxu1 %vm163_vm0, %v257_v52 }
  0xeb   :  { %v222_v53 = vpop.f32.mrf.mxu0 }
  0xec   :  { %v223_v54 = vadd.f32 %v222_v53, %v3702_v18 }
  0xee   :  { %v247_v57 = vmax.f32 %v223_v54, 0.0 }
  0xf3   :  { %v224_v55 = vpop.f32.mrf.mxu0 }
  0xf4   :  { %v225_v56 = vadd.f32 %v224_v55, %v3702_v18 }
  0xf6   :  { %v248_v58 = vmax.f32 %v225_v56, 0.0 }
  0xf8   :  { %v258_v59 = vpack.c.bf16 %v248_v58, %v247_v57 }
  0xfa   :  { %3005 = vmatmul.msk.bf16.gmra.mxu1 %vm163_vm0, %v258_v59 }
  0xfb   :  { %v227_v60 = vpop.f32.mrf.mxu0 }
  0xfc   :  { %v228_v61 = vadd.f32 %v227_v60, %v3702_v18 }
  0xfe   :  { %v249_v1 = vmax.f32 %v228_v61, 0.0 }
 0x103   :  { %v229_v62 = vpop.f32.mrf.mxu0 }
 0x104   :  { %v230_v63 = vadd.f32 %v229_v62, %v3702_v18 }
 0x106   :  { %v250_v2 = vmax.f32 %v230_v63, 0.0 }
 0x108   :  { %v259_v3 = vpack.c.bf16 %v250_v2, %v249_v1 }
 0x10a   :  { %3006 = vmatmul.msk.bf16.gmra.mxu1 %vm163_vm0, %v259_v3 }
 0x10b   :  { %v232_v5 = vpop.f32.mrf.mxu0 }
 0x10c   :  { %v233_v8 = vadd.f32 %v232_v5, %v3702_v18 }
 0x10e   :  { %v251_v11 = vmax.f32 %v233_v8, 0.0  ;;  %v3750_v8 = vperm.slane %v3699_v16, 2 }
 0x113   :  { %v234_v9 = vpop.f32.mrf.mxu0 }
 0x114   :  { %v235_v10 = vadd.f32 %v234_v9, %v3702_v18 }
 0x116   :  { %v252_v12 = vmax.f32 %v235_v10, 0.0 }
 0x118   :  { %v260_v13 = vpack.c.bf16 %v252_v12, %v251_v11  ;;  %v3756_v11 = vperm.slane %v3699_v16, 3 }
 0x11a   :  { %3007 = vmatmul.msk.bf16.gmra.mxu1 %vm163_vm0, %v260_v13 }
 0x127   :  { %v328_v14 = vpop.f32.mrf.mxu1 }
 0x128   :  { %v329_v17 = vadd.f32 %v328_v14, %v270_v15 }
 0x12a   :  { %v368_v21 = vmax.f32 %v329_v17, 0.0 }
 0x12f   :  { %v330_v19 = vpop.f32.mrf.mxu1 }
 0x130   :  { %v331_v20 = vadd.f32 %v330_v19, %v270_v15 }
 0x132   :  { %v369_v22 = vmax.f32 %v331_v20, 0.0 }
 0x134   :  { %v384_v23 = vpack.c.bf16 %v369_v22, %v368_v21 }
 0x136   :  { %3032 = vmatmul.msk.bf16.vlgmr.msra.gmra.mxu2 %vm163_vm0, %v384_v23 }
 0x137   :  { %v333_v24 = vpop.f32.mrf.mxu1 }
 0x138   :  { %v334_v25 = vadd.f32 %v333_v24, %v270_v15 }
 0x13a   :  { %v370_v27 = vmax.f32 %v334_v25, 0.0 }
 0x13f   :  { %v335_v26 = vpop.f32.mrf.mxu1 }
 0x140   :  { %v336_v18 = vadd.f32 %v335_v26, %v270_v15 }
 0x142   :  { %v371_v28 = vmax.f32 %v336_v18, 0.0 }
 0x144   :  { %v385_v29 = vpack.c.bf16 %v371_v28, %v370_v27 }
 0x146   :  { %3033 = vmatmul.msk.bf16.gmra.mxu2 %vm163_vm0, %v385_v29 }
 0x147   :  { %v338_v30 = vpop.f32.mrf.mxu1 }
 0x148   :  { %v339_v31 = vadd.f32 %v338_v30, %v270_v15 }
 0x14a   :  { %v372_v34 = vmax.f32 %v339_v31, 0.0 }
 0x14f   :  { %v340_v32 = vpop.f32.mrf.mxu1 }
 0x150   :  { %v341_v33 = vadd.f32 %v340_v32, %v270_v15 }
 0x152   :  { %v373_v35 = vmax.f32 %v341_v33, 0.0 }
 0x154   :  { %v386_v36 = vpack.c.bf16 %v373_v35, %v372_v34 }
 0x156   :  { %3034 = vmatmul.msk.bf16.gmra.mxu2 %vm163_vm0, %v386_v36  ;;  %v581_v36 = vrot.slane %v3699_v16, 6 }
 0x157   :  { %v343_v37 = vpop.f32.mrf.mxu1 }
 0x158   :  { %v344_v38 = vadd.f32 %v343_v37, %v270_v15  ;;  %3230 = vpush %v581_v36 }
 0x15a   :  { %v374_v41 = vmax.f32 %v344_v38, 0.0 }
 0x15f   :  { %v345_v39 = vpop.f32.mrf.mxu1 }
 0x160   :  { %v346_v40 = vadd.f32 %v345_v39, %v270_v15 }
 0x162   :  { %v375_v42 = vmax.f32 %v346_v40, 0.0 }
 0x164   :  { %v387_v43 = vpack.c.bf16 %v375_v42, %v374_v41 }
 0x166   :  { %3035 = vmatmul.msk.bf16.gmra.mxu2 %vm163_vm0, %v387_v43 }
 0x167   :  { %v348_v44 = vpop.f32.mrf.mxu1 }
 0x168   :  { %v349_v45 = vadd.f32 %v348_v44, %v270_v15 }
 0x16a   :  { %v376_v48 = vmax.f32 %v349_v45, 0.0 }
 0x16f   :  { %v350_v46 = vpop.f32.mrf.mxu1 }
 0x170   :  { %v351_v47 = vadd.f32 %v350_v46, %v270_v15 }
 0x172   :  { %v377_v49 = vmax.f32 %v351_v47, 0.0 }
 0x174   :  { %v388_v50 = vpack.c.bf16 %v377_v49, %v376_v48 }
 0x176   :  { %3036 = vmatmul.msk.bf16.gmra.mxu2 %vm163_vm0, %v388_v50 }
 0x177   :  { %v353_v51 = vpop.f32.mrf.mxu1 }
 0x178   :  { %v354_v52 = vadd.f32 %v353_v51, %v270_v15 }
 0x17a   :  { %v378_v55 = vmax.f32 %v354_v52, 0.0 }
 0x17f   :  { %v355_v53 = vpop.f32.mrf.mxu1 }
 0x180   :  { %v356_v54 = vadd.f32 %v355_v53, %v270_v15 }
 0x182   :  { %v379_v56 = vmax.f32 %v356_v54, 0.0 }
 0x184   :  { %v389_v57 = vpack.c.bf16 %v379_v56, %v378_v55 }
 0x186   :  { %3037 = vmatmul.msk.bf16.gmra.mxu2 %vm163_vm0, %v389_v57 }
 0x187   :  { %v358_v58 = vpop.f32.mrf.mxu1 }
 0x188   :  { %v359_v59 = vadd.f32 %v358_v58, %v270_v15 }
 0x189   :  { %s3231_s1 = spop %3230 }
 0x18a   :  { %v380_v62 = vmax.f32 %v359_v59, 0.0 }
 0x18f   :  { %v360_v60 = vpop.f32.mrf.mxu1 }
 0x190   :  { %v361_v61 = vadd.f32 %v360_v60, %v270_v15 }
 0x192   :  { %v381_v63 = vmax.f32 %v361_v61, 0.0 }
 0x194   :  { %v390_v0 = vpack.c.bf16 %v381_v63, %v380_v62 }
 0x196   :  { %3038 = vmatmul.msk.bf16.gmra.mxu2 %vm163_vm0, %v390_v0 }
 0x197   :  { %v363_v1 = vpop.f32.mrf.mxu1 }
 0x198   :  { %v364_v2 = vadd.f32 %v363_v1, %v270_v15 }
 0x19a   :  { %v382_v5 = vmax.f32 %v364_v2, 0.0 }
 0x19f   :  { %v365_v3 = vpop.f32.mrf.mxu1 }
 0x1a0   :  { %v366_v4 = vadd.f32 %v365_v3, %v270_v15 }
 0x1a2   :  { %v383_v6 = vmax.f32 %v366_v4, 0.0 }
 0x1a4   :  { %v391_v7 = vpack.c.bf16 %v383_v6, %v382_v5 }
 0x1a6   :  { %3039 = vmatmul.msk.bf16.gmra.mxu2 %vm163_vm0, %v391_v7 }
 0x1b9   :  { %v459_v9 = vpop.f32.mrf.mxu2 }
 0x1ba   :  { %v3753_v10 = vadd.f32 %v459_v9, %v3750_v8 }
 0x1bc   :  { %v4869_v12 = vmax.f32 %v3753_v10, 0.0 }
 0x1be   :  { %v516_v13 = vmul.f32 %v3756_v11, %v4869_v12 }
 0x1c0   :  { %v532_v14 = vsel %vm163_vm0, %v516_v13, 0.0 }
 0x1c1   :  { %v461_v15 = vpop.f32.mrf.mxu2  ;;  %533 = vadd.xlane.f32.xlu0 %v532_v14 }
 0x1c2   :  { %v3764_v17 = vadd.f32 %v461_v15, %v3750_v8 }
 0x1c4   :  { %v4866_v19 = vmax.f32 %v3764_v17, 0.0 }
 0x1c6   :  { %v517_v20 = vmul.f32 %v3756_v11, %v4866_v19 }
 0x1c8   :  { %v535_v21 = vsel %vm163_vm0, %v517_v20, 0.0 }
 0x1c9   :  { %v464_v22 = vpop.f32.mrf.mxu2  ;;  %536 = vadd.xlane.f32.xlu0 %v535_v21 }
 0x1ca   :  { %v3772_v23 = vadd.f32 %v464_v22, %v3750_v8 }
 0x1cc   :  { %v4873_v24 = vmax.f32 %v3772_v23, 0.0 }
 0x1ce   :  { %v518_v25 = vmul.f32 %v3756_v11, %v4873_v24 }
 0x1d0   :  { %v538_v26 = vsel %vm163_vm0, %v518_v25, 0.0 }
 0x1d1   :  { %v466_v18 = vpop.f32.mrf.mxu2  ;;  %539 = vadd.xlane.f32.xlu1 %v538_v26 }
 0x1d2   :  { %v3780_v27 = vadd.f32 %v466_v18, %v3750_v8 }
 0x1d4   :  { %v4870_v28 = vmax.f32 %v3780_v27, 0.0 }
 0x1d6   :  { %v519_v29 = vmul.f32 %v3756_v11, %v4870_v28 }
 0x1d8   :  { %v541_v30 = vsel %vm163_vm0, %v519_v29, 0.0 }
 0x1d9   :  { %v469_v31 = vpop.f32.mrf.mxu2  ;;  %542 = vadd.xlane.f32.xlu1 %v541_v30 }
 0x1da   :  { %v3788_v32 = vadd.f32 %v469_v31, %v3750_v8 }
 0x1dc   :  { %v4863_v33 = vmax.f32 %v3788_v32, 0.0 }
 0x1de   :  { %v520_v34 = vmul.f32 %v3756_v11, %v4863_v33 }
 0x1e0   :  { %v544_v35 = vsel %vm163_vm0, %v520_v34, 0.0 }
 0x1e1   :  { %v471_v37 = vpop.f32.mrf.mxu2  ;;  %545 = vadd.xlane.f32.xlu2 %v544_v35 }
 0x1e2   :  { %v3797_v38 = vadd.f32 %v471_v37, %v3750_v8 }
 0x1e4   :  { %v4864_v39 = vmax.f32 %v3797_v38, 0.0 }
 0x1e6   :  { %v521_v40 = vmul.f32 %v3756_v11, %v4864_v39 }
 0x1e8   :  { %v547_v41 = vsel %vm163_vm0, %v521_v40, 0.0 }
 0x1e9   :  { %v474_v42 = vpop.f32.mrf.mxu2  ;;  %548 = vadd.xlane.f32.xlu2 %v547_v41 }
 0x1ea   :  { %v3805_v43 = vadd.f32 %v474_v42, %v3750_v8 }
 0x1ec   :  { %v4860_v16 = vmax.f32 %v3805_v43, 0.0 }
 0x1ee   :  { %v522_v44 = vmul.f32 %v3756_v11, %v4860_v16 }
 0x1f0   :  { %v550_v45 = vsel %vm163_vm0, %v522_v44, 0.0 }
 0x1f1   :  { %v476_v46 = vpop.f32.mrf.mxu2  ;;  %551 = vadd.xlane.f32.xlu0 %v550_v45 }
 0x1f2   :  { %v3813_v47 = vadd.f32 %v476_v46, %v3750_v8 }
 0x1f4   :  { %v4859_v48 = vmax.f32 %v3813_v47, 0.0 }
 0x1f6   :  { %v523_v49 = vmul.f32 %v3756_v11, %v4859_v48 }
 0x1f8   :  { %v553_v50 = vsel %vm163_vm0, %v523_v49, 0.0 }
 0x1f9   :  { %v479_v51 = vpop.f32.mrf.mxu2  ;;  %554 = vadd.xlane.f32.xlu1 %v553_v50 }
 0x1fa   :  { %v3821_v52 = vadd.f32 %v479_v51, %v3750_v8 }
 0x1fc   :  { %v4875_v53 = vmax.f32 %v3821_v52, 0.0 }
 0x1fe   :  { %v524_v54 = vmul.f32 %v3756_v11, %v4875_v53 }
 0x200   :  { %v556_v55 = vsel %vm163_vm0, %v524_v54, 0.0 }
 0x201   :  { %v481_v56 = vpop.f32.mrf.mxu2  ;;  %557 = vadd.xlane.f32.xlu2 %v556_v55 }
 0x202   :  { %v3829_v57 = vadd.f32 %v481_v56, %v3750_v8  ;;  %v617_v56 = vlaneseq }
 0x204   :  { %v4874_v58 = vmax.f32 %v3829_v57, 0.0 }
 0x206   :  { %v525_v59 = vmul.f32 %v3756_v11, %v4874_v58 }
 0x208   :  { %v559_v60 = vsel %vm163_vm0, %v525_v59, 0.0 }
 0x209   :  { %v484_v61 = vpop.f32.mrf.mxu2  ;;  %560 = vadd.xlane.f32.xlu0 %v559_v60  ;;  %v583_v60 = vstv %s3231_s1 }
 0x20a   :  { %v3837_v62 = vadd.f32 %v484_v61, %v3750_v8  ;;  %v3884_v61 = vand.u32 127, %v617_v56 }
 0x20c   :  { %v4868_v63 = vmax.f32 %v3837_v62, 0.0 }
 0x20e   :  { %v526_v0 = vmul.f32 %v3756_v11, %v4868_v63 }
 0x210   :  { %v562_v1 = vsel %vm163_vm0, %v526_v0, 0.0 }
 0x211   :  { %v486_v2 = vpop.f32.mrf.mxu2  ;;  %563 = vadd.xlane.f32.xlu1 %v562_v1  ;;  %v3889_v1 = vadd.s32 4294967288, %v3884_v61 }
 0x212   :  { %v3845_v3 = vadd.f32 %v486_v2, %v3750_v8 }
 0x214   :  { %v4865_v4 = vmax.f32 %v3845_v3, 0.0 }
 0x216   :  { %v527_v5 = vmul.f32 %v3756_v11, %v4865_v4 }
 0x218   :  { %v565_v6 = vsel %vm163_vm0, %v527_v5, 0.0 }
 0x219   :  { %v489_v7 = vpop.f32.mrf.mxu2  ;;  %566 = vadd.xlane.f32.xlu2 %v565_v6 }
 0x21a   :  { %v3853_v9 = vadd.f32 %v489_v7, %v3750_v8 }
 0x21c   :  { %v4862_v13 = vmax.f32 %v3853_v9, 0.0 }
 0x21e   :  { %v528_v14 = vmul.f32 %v3756_v11, %v4862_v13 }
 0x220   :  { %v568_v15 = vsel %vm163_vm0, %v528_v14, 0.0 }
 0x221   :  { %v491_v20 = vpop.f32.mrf.mxu2  ;;  %569 = vadd.xlane.f32.xlu0 %v568_v15 }
 0x222   :  { %v3861_v21 = vadd.f32 %v491_v20, %v3750_v8 }
 0x224   :  { %v4861_v22 = vmax.f32 %v3861_v21, 0.0 }
 0x226   :  { %v529_v25 = vmul.f32 %v3756_v11, %v4861_v22 }
 0x228   :  { %v571_v26 = vsel %vm163_vm0, %v529_v25, 0.0 }
 0x229   :  { %v494_v18 = vpop.f32.mrf.mxu2  ;;  %572 = vadd.xlane.f32.xlu1 %v571_v26 }
 0x22a   :  { %v3869_v29 = vadd.f32 %v494_v18, %v3750_v8 }
 0x22c   :  { %v4858_v30 = vmax.f32 %v3869_v29, 0.0 }
 0x22e   :  { %v530_v31 = vmul.f32 %v3756_v11, %v4858_v30 }
 0x230   :  { %v574_v34 = vsel %vm163_vm0, %v530_v31, 0.0 }
 0x231   :  { %v496_v35 = vpop.f32.mrf.mxu2  ;;  %575 = vadd.xlane.f32.xlu2 %v574_v34 }
 0x232   :  { %v3877_v36 = vadd.f32 %v496_v35, %v3750_v8 }
 0x234   :  { %v4857_v37 = vmax.f32 %v3877_v36, 0.0  ;;  %v534_v44 = vpop.xlane.xlu0 %533 }
 0x235   :  { %v3899_v15 = vadd.f32 %v583_v60, %v534_v44 }
 0x236   :  { %v531_v40 = vmul.f32 %v3756_v11, %v4857_v37 }
 0x238   :  { %v577_v41 = vsel %vm163_vm0, %v531_v40, 0.0 }
 0x239   :  { %578 = vadd.xlane.f32.xlu0 %v577_v41 }
 0x23c   :  { %v537_v49 = vpop.xlane.xlu0 %536 }
 0x23d   :  { %v3891_v2 = vadd.f32 %v583_v60, %v537_v49  ;;  %v619_v49 = vperm.slane %v3899_v15, %v3884_v61 }
 0x23f   :  { %v621_v35 = vperm.slane %v3891_v2, %v3889_v1 }
 0x244   :  { %v540_v42 = vpop.xlane.xlu1 %539 }
 0x245   :  { %v3895_v6 = vadd.f32 %v583_v60, %v540_v42 }
 0x247   :  { %v624_v44 = vperm.slane %v3895_v6, %v3884_v61 }
 0x24c   :  { %v543_v46 = vpop.xlane.xlu1 %542 }
 0x24d   :  { %v3886_v0 = vadd.f32 %v583_v60, %v543_v46 }
 0x24f   :  { %v625_v18 = vperm.slane %v3886_v0, %v3889_v1 }
 0x251   :  { %v626_v56 = vsel %vm622_vm1, %v625_v18, %v624_v44 }
 0x254   :  { %v546_v45 = vpop.xlane.xlu2 %545 }
 0x255   :  { %v3901_v20 = vadd.f32 %v583_v60, %v546_v45 }
 0x25c   :  { %v549_v50 = vpop.xlane.xlu2 %548 }
 0x25d   :  { %v3893_v5 = vadd.f32 %v583_v60, %v549_v50  ;;  %v627_v50 = vperm.slane %v3901_v20, %v3884_v61 }
 0x25f   :  { %v628_v40 = vperm.slane %v3893_v5, %v3889_v1 }
 0x264   :  { %v552_v54 = vpop.xlane.xlu0 %551 }
 0x265   :  { %v3907_v31 = vadd.f32 %v583_v60, %v552_v54 }
 0x26c   :  { %v555_v51 = vpop.xlane.xlu1 %554 }
 0x26d   :  { %v3897_v7 = vadd.f32 %v583_v60, %v555_v51 }
 0x26f   :  { %v631_v45 = vperm.slane %v3897_v7, %v3889_v1 }
 0x274   :  { %v558_v55 = vpop.xlane.xlu2 %557 }
 0x275   :  { %v3915_v41 = vadd.f32 %v583_v60, %v558_v55 }
 0x277   :  { %v633_v37 = vperm.slane %v3915_v41, %v3884_v61 }
 0x27c   :  { %v561_v59 = vpop.xlane.xlu0 %560 }
 0x27d   :  { %v3903_v25 = vadd.f32 %v583_v60, %v561_v59  ;;  %v630_v59 = vperm.slane %v3907_v31, %v3884_v61 }
 0x27f   :  { %v634_v51 = vperm.slane %v3903_v25, %v3889_v1  ;;  %v632_v18 = vsel %vm622_vm1, %v631_v45, %v630_v59 }
 0x284   :  { %v564_v8 = vpop.xlane.xlu1 %563 }
 0x285   :  { %v3923_v46 = vadd.f32 %v583_v60, %v564_v8 }
 0x287   :  { %v636_v44 = vperm.slane %v3923_v46, %v3884_v61 }
 0x28c   :  { %v567_v11 = vpop.xlane.xlu2 %566 }
 0x28d   :  { %v3909_v34 = vadd.f32 %v583_v60, %v567_v11  ;;  %v623_v11 = vsel %vm622_vm1, %v621_v35, %v619_v49  ;;  %v635_v35 = vsel %vm622_vm1, %v634_v51, %v633_v37 }
 0x28e   :  { %v646_v48 = vsel %vm645_vm2, %v626_v56, %v623_v11 }
 0x28f   :  { %v637_v8 = vperm.slane %v3909_v34, %v3889_v1 }
 0x291   :  { %v638_v16 = vsel %vm622_vm1, %v637_v8, %v636_v44 }
 0x294   :  { %v570_v26 = vpop.xlane.xlu0 %569 }
 0x295   :  { %v3931_v54 = vadd.f32 %v583_v60, %v570_v26 }
 0x29c   :  { %v573_v14 = vpop.xlane.xlu1 %572 }
 0x29d   :  { %v3917_v42 = vadd.f32 %v583_v60, %v573_v14  ;;  %v629_v14 = vsel %vm622_vm1, %v628_v40, %v627_v50  ;;  %v639_v40 = vperm.slane %v3931_v54, %v3884_v61 }
 0x29e   :  { %v648_v50 = vsel %vm647_vm3, %v629_v14, %v646_v48  ;;  %v3555_v14 = vmov 0  }
 0x29f   :  { %v640_v26 = vperm.slane %v3917_v42, %v3889_v1  ;;  %v650_v45 = vsel %vm649_vm4, %v632_v18, %v648_v50  ;;  %3249 = vset.pattern.permute.xlu1 %v3555_v14  ;;  %3248 = vset.pattern.permute.xlu0 %v3555_v14 }
 0x2a0   :  { %v652_v56 = vsel %vm651_vm5, %v635_v35, %v650_v45  ;;  %3247 = vset.pattern.permute.xlu2 %v3555_v14 }
 0x2a1   :  { %v654_v48 = vsel %vm4876_vm6, %v638_v16, %v652_v56 }
 0x2a4   :  { %v576_v55 = vpop.xlane.xlu2 %575 }
 0x2a5   :  { %v3947_v30 = vadd.f32 %v583_v60, %v576_v55  ;;  %v641_v55 = vsel %vm622_vm1, %v640_v26, %v639_v40 }
 0x2a6   :  { %v656_v59 = vsel %vm4872_vm7, %v641_v55, %v654_v48 }
 0x2a7   :  { %v642_v37 = vperm.slane %v3947_v30, %v3884_v61 }
 0x2ac   :  { %v579_v49 = vpop.xlane.xlu0 %578 }
 0x2ad   :  { %v3955_v22 = vadd.f32 %v583_v60, %v579_v49 }
 0x2af   :  { %v643_v51 = vperm.slane %v3955_v22, %v3889_v1 }
 0x2b1   :  { %v644_v60 = vsel %vm622_vm1, %v643_v51, %v642_v37 }
 0x2b2   :  { %v658_v8 = vsel %vm4871_vm8, %v644_v60, %v656_v59 }
 0x2b3   :  { %v661_v11 = vsel %vm4867_vm9, %v658_v8, -inf }
 0x2b4   :  { %662 = vmax.xlane.f32.xlu1 %v661_v11 }
 0x327   :  { %v3969_v26 = vpop.xlane.xlu1 %662 }
 0x328   :  { %v666_v18 = vperm.slane %v3969_v26, 1  ;;  %v665_v16 = vperm.slane %v3969_v26, 0  ;;  %v667_v49 = vperm.slane %v3969_v26, 2  ;;  %v669_v50 = vperm.slane %v3969_v26, 4 }
 0x329   :  { %v670_v60 = vperm.slane %v3969_v26, 5 }
 0x32a   :  { %v683_v44 = vsub.f32 %v3895_v6, %v666_v18  ;;  %v682_v35 = vsub.f32 %v3891_v2, %v665_v16  ;;  %v681_v40 = vsub.f32 %v3899_v15, %v665_v16  ;;  %v686_v51 = vsub.f32 %v3893_v5, %v667_v49 }
 0x32b   :  { %v689_v56 = vsub.f32 %v3915_v41, %v669_v50  ;;  %v684_v6 = vsub.f32 %v3886_v0, %v666_v18  ;;  %v668_v2 = vperm.slane %v3969_v26, 3  ;;  %v692_v41 = vsub.f32 %v3909_v34, %v670_v60 }
 0x32c   :  { %v701_v45 = vmul.f32 1.442695, %v683_v44  ;;  %v699_v55 = vmul.f32 1.442695, %v682_v35  ;;  %v697_v37 = vmul.f32 1.442695, %v681_v40  ;;  %v685_v14 = vsub.f32 %v3901_v20, %v667_v49 }
 0x32d   :  { %v707_v48 = vmul.f32 1.442695, %v686_v51  ;;  %v713_v15 = vmul.f32 1.442695, %v689_v56  ;;  %v703_v8 = vmul.f32 1.442695, %v684_v6  ;;  %v688_v0 = vsub.f32 %v3897_v7, %v668_v2 }
 0x32e   :  { %3250 = vpow2.f32 %v701_v45  ;;  %v719_v16 = vmul.f32 1.442695, %v692_v41  ;;  %v672_v44 = vperm.slane %v3969_v26, 7  ;;  %v705_v40 = vmul.f32 1.442695, %v685_v14 }
 0x32f   :  { %3252 = vpow2.f32 %v699_v55  ;;  %v711_v18 = vmul.f32 1.442695, %v688_v0  ;;  %v691_v34 = vsub.f32 %v3923_v46, %v670_v60  ;;  %v687_v49 = vsub.f32 %v3907_v31, %v668_v2 }
 0x330   :  { %3254 = vpow2.f32 %v697_v37  ;;  %v695_v20 = vsub.f32 %v3947_v30, %v672_v44  ;;  %v671_v37 = vperm.slane %v3969_v26, 6  ;;  %v690_v31 = vsub.f32 %v3903_v25, %v669_v50 }
 0x331   :  { %3256 = vpow2.f32 %v707_v48  ;;  %v717_v55 = vmul.f32 1.442695, %v691_v34  ;;  %v709_v6 = vmul.f32 1.442695, %v687_v49  ;;  %v696_v41 = vsub.f32 %v3955_v22, %v672_v44 }
 0x332   :  { %3258 = vpow2.f32 %v713_v15  ;;  %v725_v51 = vmul.f32 1.442695, %v695_v20  ;;  %v694_v30 = vsub.f32 %v3917_v42, %v671_v37  ;;  %v715_v15 = vmul.f32 1.442695, %v690_v31 }
 0x333   :  { %3260 = vpow2.f32 %v703_v8  ;;  %v693_v42 = vsub.f32 %v3931_v54, %v671_v37  ;;  %v727_v14 = vmul.f32 1.442695, %v696_v41 }
 0x334   :  { %v3983_v59 = vpop.eup %3250  ;;  %3262 = vpow2.f32 %v711_v18  ;;  %v723_v26 = vmul.f32 1.442695, %v694_v30 }
 0x335   :  { %v3985_v11 = vpop.eup %3252  ;;  %752 = vperm.xlu1 %3249, %v3983_v59   ;;  %3264 = vpow2.f32 %v719_v16  ;;  %v721_v25 = vmul.f32 1.442695, %v693_v42 }
 0x336   :  { %v3988_v5 = vpop.eup %3254  ;;  %749 = vperm.xlu0 %3248, %v3985_v11   ;;  %3266 = vpow2.f32 %v705_v40 }
 0x337   :  { %746 = vperm.xlu2 %3247, %v3988_v5   ;;  %v3996_v35 = vpop.eup %3256  ;;  %3268 = vpow2.f32 %v717_v55 }
 0x338   :  { %v3998_v45 = vpop.eup %3258  ;;  %3270 = vpow2.f32 %v725_v51 }
 0x339   :  { %v4001_v7 = vpop.eup %3260  ;;  %3272 = vpow2.f32 %v709_v6 }
 0x33a   :  { %v4009_v56 = vpop.eup %3262  ;;  %3274 = vpow2.f32 %v723_v26 }
 0x33b   :  { %v4011_v48 = vpop.eup %3264  ;;  %3276 = vpow2.f32 %v715_v15 }
 0x33c   :  { %v4014_v46 = vpop.eup %3266  ;;  %3278 = vpow2.f32 %v721_v25 }
 0x33d   :  { %761 = vperm.xlu1 %3249, %v3996_v35   ;;  %v4020_v2 = vpop.eup %3268  ;;  %3280 = vpow2.f32 %v727_v14 }
 0x33e   :  { %770 = vperm.xlu0 %3248, %v3998_v45   ;;  %v4022_v60 = vpop.eup %3270 }
 0x33f   :  { %755 = vperm.xlu2 %3247, %v4001_v7   ;;  %v4025_v8 = vpop.eup %3272 }
 0x340   :  { %v4030_v0 = vpop.eup %3274 }
 0x341   :  { %v4033_v50 = vpop.eup %3276 }
 0x342   :  { %v4037_v18 = vpop.eup %3278 }
 0x343   :  { %v4040_v16 = vpop.eup %3280 }
 0x345   :  { %767 = vperm.xlu1 %3249, %v4009_v56  }
 0x346   :  { %779 = vperm.xlu0 %3248, %v4011_v48  }
 0x347   :  { %758 = vperm.xlu2 %3247, %v4014_v46  }
 0x34d   :  { %776 = vperm.xlu1 %3249, %v4020_v2  }
 0x34e   :  { %788 = vperm.xlu0 %3248, %v4022_v60  }
 0x34f   :  { %764 = vperm.xlu2 %3247, %v4025_v8  }
 0x355   :  { %785 = vperm.xlu1 %3249, %v4030_v0  }
 0x357   :  { %773 = vperm.xlu2 %3247, %v4033_v50  }
 0x35f   :  { %782 = vperm.xlu2 %3247, %v4037_v18  }
 0x367   :  { %791 = vperm.xlu2 %3247, %v4040_v16  }
 0x391   :  { %v747_v54 = vpop.permute.xlu2 %746 }
 0x392   :  { %v793_v42 = vperm.slane %v747_v54, %v3884_v61 }
 0x399   :  { %v756_v40 = vpop.permute.xlu2 %755 }
 0x39a   :  { %v797_v25 = vperm.slane %v756_v40, %v3889_v1 }
 0x3a1   :  { %v759_v34 = vpop.permute.xlu2 %758 }
 0x3a2   :  { %v799_v13 = vperm.slane %v759_v34, %v3884_v61 }
 0x3a7   :  { %v753_v20 = vpop.permute.xlu1 %752 }
 0x3a8   :  { %v750_v49 = vpop.permute.xlu0 %749  ;;  %v796_v31 = vperm.slane %v753_v20, %v3884_v61 }
 0x3a9   :  { %v765_v55 = vpop.permute.xlu2 %764  ;;  %v794_v26 = vperm.slane %v750_v49, %v3889_v1 }
 0x3aa   :  { %v798_v33 = vsel %vm622_vm1, %v797_v25, %v796_v31  ;;  %v802_v4 = vperm.slane %v765_v55, %v3884_v61 }
 0x3ab   :  { %v795_v39 = vsel %vm622_vm1, %v794_v26, %v793_v42 }
 0x3ac   :  { %v817_v54 = vsel %vm645_vm2, %v798_v33, %v795_v39 }
 0x3af   :  { %v762_v37 = vpop.permute.xlu1 %761 }
 0x3b0   :  { %v771_v51 = vpop.permute.xlu0 %770  ;;  %v800_v15 = vperm.slane %v762_v37, %v3889_v1 }
 0x3b1   :  { %v774_v6 = vpop.permute.xlu2 %773  ;;  %v805_v40 = vperm.slane %v771_v51, %v3884_v61 }
 0x3b2   :  { %v801_v20 = vsel %vm622_vm1, %v800_v15, %v799_v13 }
 0x3b3   :  { %v818_v31 = vsel %vm647_vm3, %v801_v20, %v817_v54 }
 0x3b7   :  { %v768_v22 = vpop.permute.xlu1 %767 }
 0x3b8   :  { %v780_v44 = vpop.permute.xlu0 %779  ;;  %v803_v41 = vperm.slane %v768_v22, %v3889_v1  ;;  %v806_v22 = vperm.slane %v774_v6, %v3889_v1 }
 0x3b9   :  { %v783_v30 = vpop.permute.xlu2 %782  ;;  %v809_v26 = vperm.slane %v780_v44, %v3889_v1 }
 0x3ba   :  { %v804_v49 = vsel %vm622_vm1, %v803_v41, %v802_v4  ;;  %v807_v33 = vsel %vm622_vm1, %v806_v22, %v805_v40  ;;  %v811_v39 = vperm.slane %v783_v30, %v3884_v61 }
 0x3bb   :  { %v819_v55 = vsel %vm649_vm4, %v804_v49, %v818_v31 }
 0x3bc   :  { %v820_v6 = vsel %vm651_vm5, %v807_v33, %v819_v55 }
 0x3bf   :  { %v777_v14 = vpop.permute.xlu1 %776 }
 0x3c0   :  { %v808_v37 = vperm.slane %v777_v14, %v3884_v61  ;;  %v789_v19 = vpop.permute.xlu0 %788 }
 0x3c1   :  { %v792_v34 = vpop.permute.xlu2 %791  ;;  %v814_v4 = vperm.slane %v789_v19, %v3884_v61 }
 0x3c2   :  { %v810_v13 = vsel %vm622_vm1, %v809_v26, %v808_v37  ;;  %v815_v15 = vperm.slane %v792_v34, %v3889_v1 }
 0x3c3   :  { %v821_v44 = vsel %vm4876_vm6, %v810_v13, %v820_v6 }
 0x3c4   :  { %v816_v41 = vsel %vm622_vm1, %v815_v15, %v814_v4 }
 0x3c7   :  { %v786_v42 = vpop.permute.xlu1 %785 }
 0x3c8   :  { %v812_v51 = vperm.slane %v786_v42, %v3889_v1 }
 0x3ca   :  { %v813_v25 = vsel %vm622_vm1, %v812_v51, %v811_v39 }
 0x3cb   :  { %v822_v14 = vsel %vm4872_vm7, %v813_v25, %v821_v44 }
 0x3cc   :  { %v823_v19 = vsel %vm4871_vm8, %v816_v41, %v822_v14 }
 0x3cd   :  { %v825_v20 = vsel %vm4867_vm9, %v823_v19, 0.0 }
 0x3ce   :  { %826 = vadd.xlane.f32.xlu1 %v825_v20 }
 0x441   :  { %v4075_v49 = vpop.xlane.xlu1 %826 }
 0x442   :  { %v4078_v30 = vperm.slane %v4075_v49, 1  ;;  %v833_v37 = vperm.slane %v4075_v49, 4  ;;  %v4082_v54 = vperm.slane %v4075_v49, 0  ;;  %v835_v40 = vperm.slane %v4075_v49, 6 }
 0x443   :  { %v4089_v26 = vperm.slane %v4075_v49, 5  ;;  %v4097_v14 = vperm.slane %v4075_v49, 2 }
 0x444   :  { %3282 = vrcp.f32 %v4078_v30  ;;  %v918_v39 = vand.u32 2147483647, %v833_v37  ;;  %v920_v51 = vand.u32 2147483648, %v833_v37  ;;  %v950_v19 = vand.u32 2147483647, %v835_v40 }
 0x445   :  { %3284 = vrcp.f32 %v833_v37  ;;  %v952_v20 = vand.u32 2147483648, %v835_v40  ;;  %vm866_vm11 = vweird.f32 %v4078_v30  ;;  %vm914_vm13 = vweird.f32 %v833_v37 }
 0x446   :  { %3286 = vrcp.f32 %v4082_v54  ;;  %vm946_vm14 = vweird.f32 %v835_v40  ;;  %vm919_vm9 = vcmp.eq.f32.partialorder %v918_v39, 8.507059e+37  ;;  %v921_v63 = vor.u32 1.1754944e-38, %v920_v51 }
 0x447   :  { %3288 = vrcp.f32 %v835_v40  ;;  %v953_v24 = vor.u32 1.1754944e-38, %v952_v20  ;;  %v870_v53 = vand.u32 2147483647, %v4078_v30  ;;  %vm951_vm6 = vcmp.eq.f32.partialorder %v950_v19, 8.507059e+37 }
 0x448   :  { %3290 = vrcp.f32 %v4089_v26 }
 0x449   :  { %3292 = vrcp.f32 %v4097_v14 }
 0x44a   :  { %v3283_v22 = vpop.eup %3282 }
 0x44b   :  { %v862_v34 = vmul.f32 %v3283_v22, %v4078_v30  ;;  %v3285_v31 = vpop.eup %3284  ;;  %vm867_vm8 = vweird.f32 %v3283_v22 }
 0x44c   :  { %v4091_v55 = vpop.eup %3286  ;;  %v910_v13 = vmul.f32 %v3285_v31, %v833_v37  ;;  %vm915_vm10 = vweird.f32 %v3285_v31 }
 0x44d   :  { %v863_v4 = vsub.f32 1.0, %v862_v34  ;;  %v3289_v15 = vpop.eup %3288  ;;  %v846_v6 = vmul.f32 %v4091_v55, %v4082_v54  ;;  %vm916_vm15 = vmor %vm914_vm13, %vm915_vm10  ;;  %vm930_vm13 = vweird.f32 %v4089_v26 }
 0x44e   :  { %v942_v42 = vmul.f32 %v3289_v15, %v835_v40  ;;  %v911_v33 = vsub.f32 1.0, %v910_v13  ;;  %vm947_vm12 = vweird.f32 %v3289_v15  ;;  %vm868_vm10 = vmor %vm866_vm11, %vm867_vm8  ;;  %vm850_vm8 = vweird.f32 %v4082_v54 }
 0x44f   :  { %v864_v41 = vmul.f32 %v3283_v22, %v863_v4  ;;  %v847_v12 = vsub.f32 1.0, %v846_v6  ;;  %v4100_v4 = vpop.eup %3290  ;;  %vm948_vm7 = vmor %vm946_vm14, %vm947_vm12 }
 0x450   :  { %v943_v25 = vsub.f32 1.0, %v942_v42  ;;  %v912_v44 = vmul.f32 %v3285_v31, %v911_v33  ;;  %vm931_vm12 = vweird.f32 %v4100_v4 }
 0x451   :  { %v865_v28 = vadd.f32 %v3283_v22, %v864_v41  ;;  %v848_v39 = vmul.f32 %v4091_v55, %v847_v12  ;;  %vm932_vm14 = vmor %vm930_vm13, %vm931_vm12 }
 0x452   :  { %v944_v34 = vmul.f32 %v3289_v15, %v943_v25  ;;  %v913_v13 = vadd.f32 %v3285_v31, %v912_v44  ;;  %v872_v25 = vand.u32 2147483648, %v4078_v30  ;;  %v3293_v30 = vpop.eup %3292 }
 0x453   :  { %v878_v19 = vmul.f32 %v3293_v30, %v4097_v14 }
 0x454   :  { %v945_v42 = vadd.f32 %v3289_v15, %v944_v34  ;;  %v917_v33 = vsel %vm916_vm15, %v3285_v31, %v913_v13  ;;  %v873_v51 = vor.u32 1.1754944e-38, %v872_v25  ;;  %v934_v25 = vand.u32 2147483647, %v4089_v26 }
 0x455   :  { %v922_v58 = vsel %vm919_vm9, %v921_v63, %v917_v33 }
 0x456   :  { %v949_v44 = vsel %vm948_vm7, %v3289_v15, %v945_v42  ;;  %v924_v37 = vmul.f32 %v4033_v50, %v922_v58  ;;  %v923_v40 = vmul.f32 %v3998_v45, %v922_v58  ;;  %v869_v15 = vsel %vm868_vm10, %v3283_v22, %v865_v28 }
 0x457   :  { %v4107_v31 = vsel %vm951_vm6, %v953_v24, %v949_v44  ;;  %v926_v50 = vmul.f32 %v4100_v4, %v4089_v26  ;;  %vm871_vm7 = vcmp.eq.f32.partialorder %v870_v53, 8.507059e+37  ;;  %v4117_v24 = vperm.slane %v4075_v49, 3 }
 0x458   :  { %v955_v63 = vmul.f32 %v4037_v18, %v4107_v31  ;;  %1017 = vperm.xlu2 %3247, %v924_v37   ;;  %1014 = vperm.xlu0 %3248, %v923_v40   ;;  %v874_v58 = vsel %vm871_vm7, %v873_v51, %v869_v15  ;;  %v849_v45 = vadd.f32 %v4091_v55, %v848_v39  ;;  %vm851_vm6 = vweird.f32 %v4091_v55 }
 0x459   :  { %v927_v12 = vsub.f32 1.0, %v926_v50  ;;  %v856_v18 = vand.u32 2147483648, %v4082_v54  ;;  %v876_v28 = vmul.f32 %v4001_v7, %v874_v58  ;;  %v875_v22 = vmul.f32 %v3983_v59, %v874_v58  ;;  %vm852_vm9 = vmor %vm850_vm8, %vm851_vm6 }
 0x45a   :  { %1026 = vperm.xlu1 %3249, %v955_v63   ;;  %v854_v53 = vand.u32 2147483647, %v4082_v54  ;;  %3294 = vrcp.f32 %v4117_v24  ;;  %v853_v6 = vsel %vm852_vm9, %v4091_v55, %v849_v45  ;;  %v4131_v7 = vperm.slane %v4075_v49, 7 }
 0x45b   :  { %v928_v41 = vmul.f32 %v4100_v4, %v927_v12  ;;  %v857_v20 = vor.u32 1.1754944e-38, %v856_v18  ;;  %v879_v54 = vsub.f32 1.0, %v878_v19  ;;  %v936_v42 = vand.u32 2147483648, %v4089_v26 }
 0x45c   :  { %vm855_vm11 = vcmp.eq.f32.partialorder %v854_v53, 8.507059e+37  ;;  %3296 = vrcp.f32 %v4131_v7  ;;  %vm935_vm15 = vcmp.eq.f32.partialorder %v934_v25, 8.507059e+37  ;;  %vm883_vm10 = vweird.f32 %v3293_v30 }
 0x45d   :  { %v858_v59 = vsel %vm855_vm11, %v857_v20, %v853_v6  ;;  %v929_v34 = vadd.f32 %v4100_v4, %v928_v41  ;;  %v880_v44 = vmul.f32 %v3293_v30, %v879_v54  ;;  %v937_v40 = vor.u32 1.1754944e-38, %v936_v42 }
 0x45e   :  { %v860_v55 = vmul.f32 %v3985_v11, %v858_v59  ;;  %v859_v33 = vmul.f32 %v3988_v5, %v858_v59  ;;  %v888_v15 = vand.u32 2147483648, %v4097_v14  ;;  %vm882_vm7 = vweird.f32 %v4097_v14 }
 0x45f   :  { %v933_v49 = vsel %vm932_vm14, %v4100_v4, %v929_v34  ;;  %v881_v11 = vadd.f32 %v3293_v30, %v880_v44  ;;  %v886_v4 = vand.u32 2147483647, %v4097_v14  ;;  %vm884_vm6 = vmor %vm882_vm7, %vm883_vm10  ;;  %vm898_vm11 = vweird.f32 %v4117_v24 }
 0x460   :  { %999 = vperm.xlu2 %3247, %v876_v28   ;;  %996 = vperm.xlu0 %3248, %v875_v22   ;;  %v3295_v13 = vpop.eup %3294  ;;  %v938_v39 = vsel %vm935_vm15, %v937_v40, %v933_v49  ;;  %v889_v12 = vor.u32 1.1754944e-38, %v888_v15  ;;  %v902_v14 = vand.u32 2147483647, %v4117_v24  ;;  %v968_v59 = vand.u32 2147483648, %v4131_v7 }
 0x461   :  { %v894_v37 = vmul.f32 %v3295_v13, %v4117_v24  ;;  %v940_v26 = vmul.f32 %v4011_v48, %v938_v39  ;;  %v939_v50 = vmul.f32 %v4020_v2, %v938_v39  ;;  %v885_v51 = vsel %vm884_vm6, %v3293_v30, %v881_v11 }
 0x462   :  { %v3297_v63 = vpop.eup %3296  ;;  %vm887_vm8 = vcmp.eq.f32.partialorder %v886_v4, 8.507059e+37  ;;  %vm899_vm9 = vweird.f32 %v3295_v13  ;;  %v904_v48 = vand.u32 2147483648, %v4117_v24  ;;  %vm903_vm13 = vcmp.eq.f32.partialorder %v902_v14, 8.507059e+37 }
 0x463   :  { %v895_v5 = vsub.f32 1.0, %v894_v37  ;;  %v958_v45 = vmul.f32 %v3297_v63, %v4131_v7  ;;  %v890_v18 = vsel %vm887_vm8, %v889_v12, %v885_v51  ;;  %vm900_vm12 = vmor %vm898_vm11, %vm899_vm9  ;;  %vm963_vm14 = vweird.f32 %v3297_v63 }
 0x464   :  { %v892_v2 = vmul.f32 %v3996_v35, %v890_v18  ;;  %v891_v53 = vmul.f32 %v4014_v46, %v890_v18  ;;  %v905_v41 = vor.u32 1.1754944e-38, %v904_v48  ;;  %v956_v46 = vmul.f32 %v4030_v0, %v4107_v31 }
 0x465   :  { %v896_v58 = vmul.f32 %v3295_v13, %v895_v5  ;;  %v959_v22 = vsub.f32 1.0, %v958_v45  ;;  %vm962_vm15 = vweird.f32 %v4131_v7  ;;  %v966_v24 = vand.u32 2147483647, %v4131_v7 }
 0x466   :  { %vm964_vm10 = vmor %vm962_vm15, %vm963_vm14  ;;  %v969_v54 = vor.u32 1.1754944e-38, %v968_v59  ;;  %v4879_v5 = vmax.f32 %v3772_v23, 0.0  ;;  %v4883_v23 = vmax.f32 %v3764_v17, 0.0  ;;  %v4885_v48 = vmax.f32 %v3797_v38, 0.0 }
 0x467   :  { %v897_v28 = vadd.f32 %v3295_v13, %v896_v58  ;;  %v960_v6 = vmul.f32 %v3297_v63, %v959_v22  ;;  %vm967_vm7 = vcmp.eq.f32.partialorder %v966_v24, 8.507059e+37  ;;  %v4882_v58 = vmax.f32 %v3837_v62, 0.0 }
 0x468   :  { %993 = vperm.xlu2 %3247, %v860_v55   ;;  %990 = vperm.xlu0 %3248, %v859_v33   ;;  %v4886_v14 = vmax.f32 %v3788_v32, 0.0  ;;  %vm4892_vm6 = vcmask 1045509   ;;  %vm4894_vm8 = vcmask 1046534   ;;  %vm4895_vm9 = vcmask 1047559  }
 0x469   :  { %v901_v30 = vsel %vm900_vm12, %v3295_v13, %v897_v28  ;;  %v961_v20 = vadd.f32 %v3297_v63, %v960_v6  ;;  %v4884_v28 = vmax.f32 %v3845_v3, 0.0  ;;  %vm4896_vm11 = vcmask 130048   ;;  %vm4898_vm12 = vmmov %vm4894_vm8 }
 0x46a   :  { %v906_v19 = vsel %vm903_vm13, %v905_v41, %v901_v30  ;;  %vm4899_vm13 = vmmov %vm4895_vm9  ;;  %vm1320_vm14 = vcmask 1045508   ;;  %vm1323_vm15 = vcmask 1045504  }
 0x46b   :  { %v907_v35 = vmul.f32 %v4025_v8, %v906_v19  ;;  %v965_v34 = vsel %vm964_vm10, %v3297_v63, %v961_v20  ;;  %v908_v55 = vmul.f32 %v4009_v56, %v906_v19  ;;  %vm1315_vm10 = vcmask 1041408  }
 0x46c   :  { %v970_v13 = vsel %vm967_vm7, %v969_v54, %v965_v34  ;;  %v4887_v34 = vmax.f32 %v3853_v9, 0.0 }
 0x46d   :  { %v971_v42 = vmul.f32 %v4022_v60, %v970_v13  ;;  %v972_v8 = vmul.f32 %v4040_v16, %v970_v13  ;;  %v4877_v60 = vmax.f32 %v3821_v52, 0.0  ;;  %v4878_v16 = vmax.f32 %v3829_v57, 0.0  ;;  %v3066_v13 = vld [vmem:[#allocation2 + $0x30] sm:$0xf] }
 0x46e   :  { %v4880_v52 = vmax.f32 %v3780_v27, 0.0 }
 0x470   :  { %1023 = vperm.xlu2 %3247, %v940_v26   ;;  %1020 = vperm.xlu0 %3248, %v939_v50   ;;  %v4881_v50 = vmax.f32 %v3753_v10, 0.0 }
 0x478   :  { %1005 = vperm.xlu2 %3247, %v892_v2   ;;  %1002 = vperm.xlu0 %3248, %v891_v53  }
 0x480   :  { %1008 = vperm.xlu2 %3247, %v907_v35   ;;  %1029 = vperm.xlu0 %3248, %v956_v46  }
 0x488   :  { %1032 = vperm.xlu2 %3247, %v971_v42   ;;  %1011 = vperm.xlu0 %3248, %v908_v55   ;;  %v3213_v42 = vld [vmem:[#allocation2 + $0x34] sm:$0xf0] }
 0x490   :  { %1035 = vperm.xlu0 %3248, %v972_v8   ;;  %v3067_v8 = vor.u32 %v3213_v42, %v3066_v13 }
 0x492   :  { %1290 = vmatpush.bf16.msra.mxu3 %v3067_v8 }
 0x4b2   :  { %v4163_v0 = vpop.permute.xlu2 %1017 }
 0x4b3   :  { %v1095_v37 = vmul.f32 %v4163_v0, %v4878_v16  ;;  %v1050_v16 = vperm.slane %v4163_v0, %v3889_v1 }
 0x4b5   :  { %v1139_v11 = vsel %vm163_vm0, %v1095_v37, 0.0 }
 0x4ba   :  { %v4165_v31 = vpop.permute.xlu2 %999 }
 0x4bb   :  { %v1089_v26 = vmul.f32 %v4165_v31, %v4880_v52  ;;  %v1041_v9 = vperm.slane %v4165_v31, %v3889_v1  ;;  %v4889_v31 = vmax.f32 %v3805_v43, 0.0 }
 0x4bd   :  { %v1112_v27 = vsel %vm163_vm0, %v1089_v26, 0.0 }
 0x4c2   :  { %v4171_v25 = vpop.permute.xlu2 %993 }
 0x4c3   :  { %v1087_v12 = vmul.f32 %v4171_v25, %v4883_v23  ;;  %v3209_v23 = vld [vmem:[#allocation2 + $0x14] sm:$0xf0] }
 0x4c5   :  { %v1103_v6 = vsel %vm163_vm0, %v1087_v12, 0.0 }
 0x4ca   :  { %v4167_v7 = vpop.permute.xlu0 %1014  ;;  %v4178_v44 = vpop.permute.xlu2 %1023 }
 0x4cb   :  { %v1094_v56 = vmul.f32 %v4167_v7, %v4877_v60  ;;  %v1097_v10 = vmul.f32 %v4178_v44, %v4884_v28  ;;  %v3058_v60 = vld [vmem:[#allocation2 + $0x20] sm:$0xf] }
 0x4cc   :  { %v4220_v41 = vpop.permute.xlu1 %1026 }
 0x4cd   :  { %v1138_v40 = vsel %vm163_vm0, %v1094_v56, 0.0  ;;  %v1148_v19 = vsel %vm163_vm0, %v1097_v10, 0.0  ;;  %v1098_v32 = vmul.f32 %v4220_v41, %v4887_v34  ;;  %v3211_v56 = vld [vmem:[#allocation2 + $0x24] sm:$0xf0] }
 0x4ce   :  { %v1140_v15 = vadd.f32 %v1139_v11, %v1138_v40  ;;  %v3059_v26 = vor.u32 %v3211_v56, %v3058_v60 }
 0x4d0   :  { %v1141_v18 = vrot.slane %v1140_v15, 4  ;;  %1291 = vmatpush.bf16.msra.mxu3 %v3059_v26 }
 0x4d2   :  { %v4169_v33 = vpop.permute.xlu0 %996  ;;  %v4197_v51 = vpop.permute.xlu2 %1005  ;;  %v1142_v3 = vadd.f32 %v1141_v18, %v1140_v15  ;;  %v4888_v15 = vmax.f32 %v3861_v21, 0.0 }
 0x4d3   :  { %v1088_v63 = vmul.f32 %v4169_v33, %v4879_v5  ;;  %v1091_v2 = vmul.f32 %v4197_v51, %v4885_v48  ;;  %v1053_v48 = vperm.slane %v4178_v44, %v3889_v1 }
 0x4d4   :  { %v1143_v54 = vrot.slane %v1142_v3, 2 }
 0x4d5   :  { %v1111_v4 = vsel %vm163_vm0, %v1088_v63, 0.0  ;;  %v1121_v35 = vsel %vm163_vm0, %v1091_v2, 0.0 }
 0x4d6   :  { %v1113_v22 = vadd.f32 %v1112_v27, %v1111_v4  ;;  %v4240_v4 = vadd.f32 %v1143_v54, %v1142_v3 }
 0x4d8   :  { %v1114_v59 = vrot.slane %v1113_v22, 4 }
 0x4da   :  { %v4173_v49 = vpop.permute.xlu0 %990  ;;  %v1115_v37 = vadd.f32 %v1114_v59, %v1113_v22  ;;  %v1009_v40 = vpop.permute.xlu2 %1008 }
 0x4db   :  { %v1086_v57 = vmul.f32 %v4173_v49, %v4881_v50  ;;  %v1038_v50 = vperm.slane %v4171_v25, %v3889_v1  ;;  %v1092_v12 = vmul.f32 %v1009_v40, %v4889_v31  ;;  %v1037_v21 = vperm.slane %v4173_v49, %v3884_v61 }
 0x4dc   :  { %v1116_v28 = vrot.slane %v1115_v37, 2  ;;  %v1145_v49 = vrot.slane %v4240_v4, 1 }
 0x4dd   :  { %v1102_v62 = vsel %vm163_vm0, %v1086_v57, 0.0  ;;  %v1156_v57 = vsel %vm163_vm0, %v1098_v32, 0.0  ;;  %v1039_v3 = vsel %vm622_vm1, %v1038_v50, %v1037_v21  ;;  %v4890_v32 = vmax.f32 %v3813_v47, 0.0  ;;  %v3060_v47 = vld [vmem:[#allocation2 + $0x28] sm:$0xf0] }
 0x4de   :  { %v1104_v38 = vadd.f32 %v1103_v6, %v1102_v62  ;;  %v1046_v6 = vperm.slane %v1009_v40, %v3884_v61 }
 0x4e0   :  { %v1105_v55 = vrot.slane %v1104_v38, 4 }
 0x4e2   :  { %v4184_v39 = vpop.permute.xlu0 %1020  ;;  %v1106_v18 = vadd.f32 %v1105_v55, %v1104_v38  ;;  %v3068_v38 = vld [vmem:[#allocation2 + $0x38] sm:$0xf0]  ;;  %v1033_v55 = vpop.permute.xlu2 %1032 }
 0x4e3   :  { %v1096_v45 = vmul.f32 %v4184_v39, %v4882_v58  ;;  %v1040_v58 = vperm.slane %v4169_v33, %v3884_v61  ;;  %v1049_v33 = vperm.slane %v4167_v7, %v3884_v61  ;;  %v1129_v7 = vsel %vm163_vm0, %v1092_v12, 0.0  ;;  %v4286_v12 = vld [vmem:[#allocation5 + $0x60] sm:$0xff] }
 0x4e4   :  { %v1107_v44 = vrot.slane %v1106_v18, 2  ;;  %v1052_v8 = vperm.slane %v4184_v39, %v3884_v61 }
 0x4e5   :  { %v1147_v17 = vsel %vm163_vm0, %v1096_v45, 0.0  ;;  %v3050_v45 = vld [vmem:[#allocation2 + $0x10] sm:$0xf]  ;;  %v1042_v62 = vsel %vm622_vm1, %v1041_v9, %v1040_v58  ;;  %v4891_v58 = vmax.f32 %v3869_v29, 0.0  ;;  %v1146_v29 = vadd.f32 %v1145_v49, %v4240_v4 }
 0x4e6   :  { %v1149_v46 = vadd.f32 %v1148_v19, %v1147_v17  ;;  %v3051_v2 = vor.u32 %v3209_v23, %v3050_v45  ;;  %v1044_v17 = vperm.slane %v4197_v51, %v3889_v1  ;;  %v3212_v19 = vld [vmem:[#allocation2 + $0x34] sm:$0xf]  ;;  %v1061_v42 = vsel %vm645_vm2, %v1042_v62, %v1039_v3 }
 0x4e7   :  { %v3071_v56 = vor.u32 %v3212_v19, %v3068_v38  ;;  %v1100_v45 = vmul.f32 %v1033_v55, %v4891_v58  ;;  %v3206_v19 = vld [vmem:[#allocation2 + $0x4] sm:$0xf]  ;;  %v3044_v38 = vld [vmem:[#allocation2 + $0x8] sm:$0xf0] }
 0x4e8   :  { %v1150_v11 = vrot.slane %v1149_v46, 4  ;;  %1292 = vmatpush.bf16.msra.mxu3 %v3051_v2 }
 0x4ea   :  { %v4213_v53 = vpop.permute.xlu0 %1002  ;;  %v1151_v25 = vadd.f32 %v1150_v11, %v1149_v46 }
 0x4eb   :  { %v1090_v30 = vmul.f32 %v4213_v53, %v4886_v14  ;;  %v1043_v10 = vperm.slane %v4213_v53, %v3884_v61  ;;  %v3207_v53 = vld [vmem:[#allocation2 + $0x4] sm:$0xf0] }
 0x4ec   :  { %v1152_v59 = vrot.slane %v1151_v25, 2 }
 0x4ed   :  { %v1120_v20 = vsel %vm163_vm0, %v1090_v30, 0.0  ;;  %v3042_v30 = vld [vmem:[#allocation2] sm:$0xf] }
 0x4ee   :  { %v1122_v24 = vadd.f32 %v1121_v35, %v1120_v20  ;;  %v4262_v20 = vadd.f32 %v1116_v28, %v1115_v37  ;;  %v1045_v35 = vsel %vm622_vm1, %v1044_v17, %v1043_v10  ;;  %v3043_v13 = vor.u32 %v3207_v53, %v3042_v30  ;;  %v3208_v10 = vld [vmem:[#allocation2 + $0x14] sm:$0xf] }
 0x4ef   :  { %v1108_v37 = vadd.f32 %v1107_v44, %v1106_v18  ;;  %v1062_v40 = vsel %vm647_vm3, %v1045_v35, %v1061_v42  ;;  %v1153_v26 = vadd.f32 %v1152_v59, %v1151_v25  ;;  %v1054_v25 = vsel %vm622_vm1, %v1053_v48, %v1052_v8 }
 0x4f0   :  { %v1123_v63 = vrot.slane %v1122_v24, 4  ;;  %1293 = vmatpush.bf16.msra.mxu3 %v3043_v13  ;;  %v4893_v48 = vmax.f32 %v3877_v36, 0.0  ;;  %v3047_v42 = vor.u32 %v3206_v19, %v3044_v38  ;;  %v4354_v19 = vld [vmem:[#allocation5 + $0x18] sm:$0xff]  ;;  %v4358_v38 = vld [vmem:[#allocation5 + $0x8] sm:$0xff] }
 0x4f1   :  { %v1109_v28 = vrot.slane %v1108_v37, 1 }
 0x4f2   :  { %v4230_v5 = vpop.permute.xlu0 %1029  ;;  %v1124_v43 = vadd.f32 %v1123_v63, %v1122_v24  ;;  %v3210_v63 = vld [vmem:[#allocation2 + $0x24] sm:$0xf] }
 0x4f3   :  { %v1099_v52 = vmul.f32 %v4230_v5, %v4888_v15  ;;  %v4274_v15 = vld [vmem:[#allocation5 + $0x70] sm:$0xff]  ;;  %v1056_v0 = vperm.slane %v4230_v5, %v3889_v1  ;;  %v3063_v18 = vor.u32 %v3210_v63, %v3060_v47  ;;  %v1058_v5 = vperm.slane %v1033_v55, %v3884_v61 }
 0x4f4   :  { %v1125_v51 = vrot.slane %v1124_v43, 2  ;;  %1617 = vmatpush.msrb.mxu0 %v4274_v15  ;;  %1303 = vmatpush.bf16.msrb.mxu3 %v3071_v56 }
 0x4f5   :  { %v1157_v27 = vsel %vm163_vm0, %v1099_v52, 0.0  ;;  %v1051_v52 = vsel %vm622_vm1, %v1050_v16, %v1049_v33  ;;  %v4295_v33 = vld [vmem:[#allocation5 + $0x50] sm:$0xff] }
 0x4f6   :  { %v1158_v22 = vadd.f32 %v1157_v27, %v1156_v57  ;;  %v1118_v57 = vrot.slane %v4262_v20, 1  ;;  %v1126_v23 = vadd.f32 %v1125_v51, %v1124_v43  ;;  %1618 = vmatpush.msrb.mxu0 %v4286_v12  ;;  %v1055_v27 = vperm.slane %v4220_v41, %v3884_v61 }
 0x4f7   :  { %v1154_v43 = vrot.slane %v1153_v26, 1  ;;  %v1165_v41 = vsel %vm163_vm0, %v1100_v45, 0.0  ;;  %v4316_v45 = vld [vmem:[#allocation5 + $0x30] sm:$0xff] }
 0x4f8   :  { %v1159_v14 = vrot.slane %v1158_v22, 4  ;;  %1619 = vmatpush.msrb.mxu0 %v4295_v33  ;;  %v1057_v30 = vsel %vm622_vm1, %v1056_v0, %v1055_v27  ;;  %1304 = vmatpush.bf16.msrb.mxu3 %v3063_v18  ;;  %v1119_v51 = vadd.f32 %v1118_v57, %v4262_v20  ;;  %v4311_v20 = vld [vmem:[#allocation5 + $0x40] sm:$0xff] }
 0x4f9   :  { %v1155_v35 = vadd.f32 %v1154_v43, %v1153_v26  ;;  %v4322_v18 = vld [vmem:[#allocation5 + $0x20] sm:$0xff] }
 0x4fa   :  { %v1160_v46 = vadd.f32 %v1159_v14, %v1158_v22  ;;  %v1012_v24 = vpop.permute.xlu0 %1011  ;;  %v3052_v22 = vld [vmem:[#allocation2 + $0x18] sm:$0xf0]  ;;  %v1127_v14 = vrot.slane %v1126_v23, 1  ;;  %1620 = vmatpush.msrb.mxu0 %v4311_v20 }
 0x4fb   :  { %v1047_v34 = vperm.slane %v1012_v24, %v3889_v1  ;;  %v1093_v54 = vmul.f32 %v1012_v24, %v4890_v32  ;;  %v3055_v61 = vor.u32 %v3208_v10, %v3052_v22  ;;  %v1200_v24 = vpack.c.bf16 %v1146_v29, %v1146_v29 }
 0x4fc   :  { %v1161_v60 = vrot.slane %v1160_v46, 2  ;;  %v1202_v8 = vpack.c.bf16 %v1155_v35, %v1155_v35  ;;  %1621 = vmatpush.msrb.mxu0 %v4316_v45  ;;  %v1330_v35 = vld [vmem:[%s4849_s6] sm:$0x3] }
 0x4fd   :  { %v1048_v11 = vsel %vm622_vm1, %v1047_v34, %v1046_v6  ;;  %v1130_v9 = vsel %vm163_vm0, %v1093_v54, 0.0  ;;  %v1128_v34 = vadd.f32 %v1127_v14, %v1126_v23  ;;  %1305 = vmatpush.bf16.msrb.mxu3 %v3055_v61  ;;  %v4336_v14 = vld [vmem:[#allocation5] sm:$0xff] }
 0x4fe   :  { %v1063_v39 = vsel %vm649_vm4, %v1048_v11, %v1062_v40  ;;  %v1131_v50 = vadd.f32 %v1130_v9, %v1129_v7  ;;  %v1162_v16 = vadd.f32 %v1161_v60, %v1160_v46  ;;  %v1110_v7 = vadd.f32 %v1109_v28, %v1108_v37  ;;  %1622 = vmatpush.msrb.mxu0 %v4322_v18 }
 0x4ff   :  { %v1064_v31 = vsel %vm651_vm5, %v1051_v52, %v1063_v39  ;;  %v1201_v37 = vpack.c.bf16 %v1119_v51, %v1119_v51  ;;  %v1203_v40 = vpack.c.bf16 %v1128_v34, %v1128_v34  ;;  %v1221_v11 = vunpack.c.l.b16 %v1200_v24 }
 0x500   :  { %v1132_v21 = vrot.slane %v1131_v50, 4  ;;  %v1065_v17 = vsel %vm4892_vm6, %v1054_v25, %v1064_v31  ;;  %v1163_v53 = vrot.slane %v1162_v16, 1  ;;  %v1199_v55 = vpack.c.bf16 %v1110_v7, %v1110_v7  ;;  %v4326_v25 = vld [vmem:[#allocation5 + $0x58] sm:$0xff] }
 0x501   :  { %v1066_v59 = vsel %vm4894_vm8, %v1057_v30, %v1065_v17  ;;  %1306 = vmatpush.bf16.msrb.mxu3 %v3047_v42  ;;  %v1223_v26 = vunpack.c.l.b16 %v1202_v8  ;;  %v1222_v57 = vunpack.c.l.b16 %v1201_v37  ;;  %v1224_v58 = vunpack.c.l.b16 %v1203_v40 }
 0x502   :  { %v1133_v2 = vadd.f32 %v1132_v21, %v1131_v50  ;;  %v1036_v62 = vpop.permute.xlu0 %1035  ;;  %v1164_v32 = vadd.f32 %v1163_v53, %v1162_v16  ;;  %v1220_v52 = vunpack.c.l.b16 %v1199_v55  ;;  %v4313_v50 = vld [vmem:[#allocation5 + $0x78] sm:$0xff]  ;;  %v1228_v23 = vrot.slane %v1221_v11, 7  ;;  %v4319_v16 = vld [vmem:[#allocation5 + $0x68] sm:$0xff] }
 0x503   :  { %v1059_v4 = vperm.slane %v1036_v62, %v3889_v1  ;;  %v1101_v49 = vmul.f32 %v1036_v62, %v4893_v48  ;;  %1637 = vmatpush.msrb.mxu1 %v4313_v50  ;;  %v1232_v29 = vrot.slane %v1223_v26, 5  ;;  %v1230_v10 = vrot.slane %v1222_v57, 6  ;;  %v4332_v62 = vld [vmem:[#allocation5 + $0x48] sm:$0xff] }
 0x504   :  { %v1134_v6 = vrot.slane %v1133_v2, 2  ;;  %v1204_v9 = vpack.c.bf16 %v1164_v32, %v1164_v32  ;;  %v1229_v27 = vsel %vm645_vm2, %v1228_v23, %v1220_v52  ;;  %v1234_v22 = vrot.slane %v1224_v58, 4 }
 0x505   :  { %v1060_v3 = vsel %vm622_vm1, %v1059_v4, %v1058_v5  ;;  %v1166_v44 = vsel %vm163_vm0, %v1101_v49, 0.0  ;;  %1638 = vmatpush.msrb.mxu1 %v4319_v16  ;;  %v4329_v5 = vld [vmem:[#allocation5 + $0x10] sm:$0xff]  ;;  %v1231_v17 = vsel %vm647_vm3, %v1230_v10, %v1229_v27  ;;  %vm4897_vm1 = vmmov %vm4892_vm6 }
 0x506   :  { %v1135_v1 = vadd.f32 %v1134_v6, %v1133_v2  ;;  %v1167_v46 = vadd.f32 %v1166_v44, %v1165_v41  ;;  %v1067_v36 = vsel %vm4895_vm9, %v1060_v3, %v1066_v59  ;;  %v1225_v31 = vunpack.c.l.b16 %v1204_v9  ;;  %1623 = vmatpush.msrb.mxu0 %v4329_v5  ;;  %v4346_v3 = vld [vmem:[#allocation5 + $0x38] sm:$0xff]  ;;  %v4350_v44 = vld [vmem:[#allocation5 + $0x28] sm:$0xff] }
 0x507   :  { %1069 = vst.msk [vmem:[#allocation8] sm:$0xff] %vm4896_vm11, %v1067_v36  ;;  %1639 = vmatpush.msrb.mxu1 %v4326_v25  ;;  %v1233_v48 = vsel %vm649_vm4, %v1232_v29, %v1231_v17  ;;  %v1331_v59 = vld [vmem:[%s4850_s7] sm:$0x3] }
 0x508   :  { %v1136_v54 = vrot.slane %v1135_v1, 1  ;;  %v1168_v13 = vrot.slane %v1167_v46, 4  ;;  %v1236_v43 = vrot.slane %v1225_v31, 3  ;;  %1624 = vmatpush.msrb.mxu0 %v4336_v14  ;;  %v1235_v49 = vsel %vm651_vm5, %v1234_v22, %v1233_v48  ;;  %1407 = vrot.lane.b32.xlu1 %v1331_v59, %s3556_s25  ;;  %v1198_v36 = vld [vmem:[%s4848_s5] ss:$4 sm:$0x3] }
 0x509   :  { %1640 = vmatpush.msrb.mxu1 %v4332_v62  ;;  %v1209_v24 = vperm.slane %v1198_v36, 1  ;;  %v1208_v51 = vperm.slane %v1198_v36, 0  ;;  %vm1317_vm5 = vcmask 1043458   ;;  %2870 = dma.vmem_to_hbm [thread:$0]  %s2866_s4, 128, %s2868_s3, [#allocation9]  }
 0x50a   :  { %v1137_v60 = vadd.f32 %v1136_v54, %v1135_v1  ;;  %v1169_v56 = vadd.f32 %v1168_v13, %v1167_v46  ;;  %v1237_v30 = vsel %vm4897_vm1, %v1236_v43, %v1235_v49 }
 0x50b   :  { %1641 = vmatpush.msrb.mxu1 %v4346_v3 }
 0x50c   :  { %v1170_v63 = vrot.slane %v1169_v56, 2  ;;  %v1205_v47 = vpack.c.bf16 %v1137_v60, %v1137_v60 }
 0x50d   :  { %1642 = vmatpush.msrb.mxu1 %v4350_v44 }
 0x50e   :  { %v1171_v39 = vadd.f32 %v1170_v63, %v1169_v56  ;;  %v1226_v21 = vunpack.c.l.b16 %v1205_v47 }
 0x50f   :  { %1643 = vmatpush.msrb.mxu1 %v4354_v19 }
 0x510   :  { %v1172_v0 = vrot.slane %v1171_v39, 1  ;;  %v1238_v41 = vrot.slane %v1226_v21, 2 }
 0x511   :  { %1644 = vmatpush.msrb.mxu1 %v4358_v38 }
 0x512   :  { %v1173_v28 = vadd.f32 %v1172_v0, %v1171_v39  ;;  %v1239_v6 = vsel %vm4898_vm12, %v1238_v41, %v1237_v30 }
 0x514   :  { %v1206_v2 = vpack.c.bf16 %v1173_v28, %v1173_v28 }
 0x516   :  { %v1227_v4 = vunpack.c.l.b16 %v1206_v2 }
 0x518   :  { %v1240_v53 = vrot.slane %v1227_v4, 1 }
 0x51a   :  { %v1241_v61 = vsel %vm4899_vm13, %v1240_v53, %v1239_v6 }
 0x51b   :  { %v1242_v7 = vpack.c.b16 %v1241_v61, %v1241_v61 }
 0x51d   :  { %3072 = vmatmul.msk.bf16.vlgmr.msra.gmra.mxu3 %vm163_vm0, %v1242_v7 }
 0x51e   :  { %1343 = vmatpush.msra.mxu3 %v4274_v15 }
 0x520   :  { %1344 = vmatpush.msra.mxu3 %v4286_v12 }
 0x522   :  { %1345 = vmatpush.msra.mxu3 %v4295_v33 }
 0x524   :  { %1346 = vmatpush.msra.mxu3 %v4311_v20 }
 0x526   :  { %1347 = vmatpush.msra.mxu3 %v4316_v45 }
 0x528   :  { %1348 = vmatpush.msra.mxu3 %v4322_v18 }
 0x52a   :  { %1349 = vmatpush.msra.mxu3 %v4329_v5 }
 0x52c   :  { %1350 = vmatpush.msra.mxu3 %v4336_v14 }
 0x52d   :  { %3073 = vmatmul.msk.bf16.vlgmr.msrb.gmra.mxu3 %vm163_vm0, %v1242_v7 }
 0x52e   :  { %1363 = vmatpush.msrb.mxu3 %v4313_v50 }
 0x530   :  { %1364 = vmatpush.msrb.mxu3 %v4319_v16 }
 0x532   :  { %1365 = vmatpush.msrb.mxu3 %v4326_v25 }
 0x534   :  { %1366 = vmatpush.msrb.mxu3 %v4332_v62 }
 0x536   :  { %1367 = vmatpush.msrb.mxu3 %v4346_v3 }
 0x538   :  { %1368 = vmatpush.msrb.mxu3 %v4350_v44 }
 0x53a   :  { %1369 = vmatpush.msrb.mxu3 %v4354_v19 }
 0x53c   :  { %1370 = vmatpush.msrb.mxu3 %v4358_v38 }
 0x53d   :  { %3074 = vmatmul.msk.f32.vlgmr.msra.gmra.mxu3 %vm163_vm0, %v1330_v35 }
 0x53e   :  { %1437 = vmatpush.msra.mxu3 %v4274_v15 }
 0x540   :  { %1438 = vmatpush.msra.mxu3 %v4286_v12 }
 0x542   :  { %1439 = vmatpush.msra.mxu3 %v4295_v33 }
 0x544   :  { %1440 = vmatpush.msra.mxu3 %v4311_v20 }
 0x545   :  { %3075 = vmatmul.msk.f32.vlgmr.msrb.gmra.mxu3 %vm163_vm0, %v1330_v35 }
 0x546   :  { %1441 = vmatpush.msra.mxu3 %v4316_v45 }
 0x548   :  { %1442 = vmatpush.msra.mxu3 %v4322_v18 }
 0x54a   :  { %1443 = vmatpush.msra.mxu3 %v4329_v5 }
 0x54c   :  { %1444 = vmatpush.msra.mxu3 %v4336_v14 }
 0x54e   :  { %1457 = vmatpush.msrb.mxu3 %v4313_v50 }
 0x550   :  { %1458 = vmatpush.msrb.mxu3 %v4319_v16 }
 0x552   :  { %1459 = vmatpush.msrb.mxu3 %v4326_v25 }
 0x554   :  { %1460 = vmatpush.msrb.mxu3 %v4332_v62 }
 0x556   :  { %1461 = vmatpush.msrb.mxu3 %v4346_v3 }
 0x558   :  { %1462 = vmatpush.msrb.mxu3 %v4350_v44 }
 0x55a   :  { %1463 = vmatpush.msrb.mxu3 %v4354_v19 }
 0x55c   :  { %1464 = vmatpush.msrb.mxu3 %v4358_v38 }
 0x57a   :  { %v1408_v17 = vpop.permute.xlu1 %1407 }
 0x5a0   :  { %v1295_v1 = vpop.f32.mrf.mxu3 }
 0x5a1   :  { %v1296_v54 = vadd.f32 %v1295_v1, %v1208_v51 }
 0x5a8   :  { %v1297_v46 = vpop.f32.mrf.mxu3 }
 0x5b0   :  { %v1308_v34 = vpop.f32.mrf.mxu3 }
 0x5b1   :  { %v1309_v32 = vadd.f32 %v1308_v34, %v1209_v24 }
 0x5b3   :  { %v1314_v13 = vrot.slane %v1309_v32, 6 }
 0x5b5   :  { %v4404_v42 = vsel %vm1317_vm5, %v1296_v54, %v1314_v13  ;;  %v4407_v55 = vsel %vm1320_vm14, %v1296_v54, %v1314_v13  ;;  %v4410_v8 = vsel %vm1323_vm15, %v1314_v13, %v1296_v54  ;;  %v1316_v11 = vsel %vm1315_vm10, %v1296_v54, %v1314_v13 }
 0x5b8   :  { %v1310_v60 = vpop.f32.mrf.mxu3 }
 0x5c0   :  { %v1352_v56 = vpop.f32.mrf.mxu3 }
 0x5c8   :  { %v1372_v37 = vpop.f32.mrf.mxu3 }
 0x5c9   :  { %v1377_v40 = vrot.slane %v1372_v37, 6 }
 0x5cb   :  { %v1378_v9 = vsel %vm1315_vm10, %v1352_v56, %v1377_v40  ;;  %v1322_v40 = vrot.slane %v4407_v55, 4 }
 0x5cc   :  { %v1380_v63 = vadd.f32 %v1378_v9, %v1316_v11 }
 0x5ce   :  { %1401 = vrot.lane.b32.xlu2 %v1380_v63, %s3556_s25  ;;  %v3076_v47 = vmul.f32 -1.442695, %v1380_v63 }
 0x5d0   :  { %3298 = vpow2.f32 %v3076_v47 }
 0x5d6   :  { %v3299_v52 = vpop.eup %3298 }
 0x5d7   :  { %v1384_v26 = vadd.f32 1.0, %v3299_v52 }
 0x5d9   :  { %3300 = vrcp.f32 %v1384_v26  ;;  %v1396_v27 = vand.u32 2147483648, %v1384_v26  ;;  %vm1390_vm6 = vweird.f32 %v1384_v26  ;;  %v1394_v29 = vand.u32 2147483647, %v1384_v26 }
 0x5db   :  { %v1397_v10 = vor.u32 1.1754944e-38, %v1396_v27  ;;  %vm1395_vm9 = vcmp.eq.f32.partialorder %v1394_v29, 8.507059e+37 }
 0x5df   :  { %v3301_v39 = vpop.eup %3300 }
 0x5e0   :  { %v1386_v57 = vmul.f32 %v3301_v39, %v1384_v26  ;;  %vm1391_vm7 = vweird.f32 %v3301_v39 }
 0x5e1   :  { %vm1392_vm8 = vmor %vm1390_vm6, %vm1391_vm7 }
 0x5e2   :  { %v1387_v58 = vsub.f32 1.0, %v1386_v57 }
 0x5e4   :  { %v1388_v23 = vmul.f32 %v3301_v39, %v1387_v58 }
 0x5e6   :  { %v1389_v21 = vadd.f32 %v3301_v39, %v1388_v23 }
 0x5e8   :  { %v1393_v28 = vsel %vm1392_vm8, %v3301_v39, %v1389_v21 }
 0x5e9   :  { %v1398_v43 = vsel %vm1395_vm9, %v1397_v10, %v1393_v28 }
 0x5ea   :  { %v1410_v41 = vmul.f32 %v1408_v17, %v1398_v43  ;;  %v1419_v30 = vrot.slane %v1398_v43, 2 }
 0x628   :  { %v1402_v31 = vpop.permute.xlu2 %1401 }
 0x629   :  { %v1403_v0 = vrot.slane %v1402_v31, 2 }
 0x62b   :  { %3302 = vtanh.f32 %v1403_v0 }
 0x631   :  { %v3303_v22 = vpop.eup %3302 }
 0x632   :  { %v1411_v2 = vmul.f32 %v3303_v22, %v1398_v43 }
 0x634   :  { %1413 = vrot.lane.b32.xlu0 %v1411_v2, %s3556_s25 }
 0x6a6   :  { %v1414_v4 = vpop.permute.xlu0 %1413 }
 0x6a7   :  { %v1416_v48 = vadd.f32 %v1414_v4, %v1410_v41 }
 0x6a9   :  { %3304 = vtanh.f32 %v1416_v48 }
 0x6af   :  { %v3305_v49 = vpop.eup %3304 }
 0x6b0   :  { %1422 = vrot.lane.b32.xlu2 %v3305_v49, %s3556_s25 }
 0x70a   :  { %v1423_v53 = vpop.permute.xlu2 %1422 }
 0x70b   :  { %v1425_v6 = vmul.f32 %v1423_v53, %v1419_v30 }
 0x70d   :  { %1725 = vst [vmem:[#allocation1] ss:$4 sm:$0xff] %v1425_v6  ;;  %3077 = vmatmul.msk.f32.vlgmr.msra.gmra.mxu3 %vm163_vm0, %v1425_v6 }
 0x70e   :  { %1527 = vmatpush.msra.mxu3 %v4274_v15 }
 0x710   :  { %1528 = vmatpush.msra.mxu3 %v4286_v12 }
 0x712   :  { %1529 = vmatpush.msra.mxu3 %v4295_v33 }
 0x714   :  { %1530 = vmatpush.msra.mxu3 %v4311_v20  ;;  %v1319_v20 = vrot.slane %v4404_v42, 2 }
 0x715   :  { %3078 = vmatmul.msk.f32.vlgmr.msrb.gmra.mxu3 %vm163_vm0, %v1425_v6 }
 0x716   :  { %1531 = vmatpush.msra.mxu3 %v4316_v45 }
 0x718   :  { %1532 = vmatpush.msra.mxu3 %v4322_v18 }
 0x71a   :  { %1533 = vmatpush.msra.mxu3 %v4329_v5 }
 0x71c   :  { %1534 = vmatpush.msra.mxu3 %v4336_v14 }
 0x71e   :  { %1547 = vmatpush.msrb.mxu3 %v4313_v50 }
 0x720   :  { %1548 = vmatpush.msrb.mxu3 %v4319_v16 }
 0x722   :  { %1549 = vmatpush.msrb.mxu3 %v4326_v25 }
 0x724   :  { %1550 = vmatpush.msrb.mxu3 %v4332_v62 }
 0x726   :  { %1551 = vmatpush.msrb.mxu3 %v4346_v3 }
 0x728   :  { %1552 = vmatpush.msrb.mxu3 %v4350_v44 }
 0x72a   :  { %1553 = vmatpush.msrb.mxu3 %v4354_v19 }
 0x72c   :  { %1554 = vmatpush.msrb.mxu3 %v4358_v38 }
 0x790   :  { %v1446_v15 = vpop.f32.mrf.mxu3 }
 0x798   :  { %v1466_v12 = vpop.f32.mrf.mxu3 }
 0x799   :  { %v1471_v33 = vrot.slane %v1466_v12, 6 }
 0x79b   :  { %v1472_v50 = vsel %vm1315_vm10, %v1446_v15, %v1471_v33  ;;  %v1325_v15 = vrot.slane %v4410_v8, 6 }
 0x79c   :  { %v1474_v45 = vadd.f32 %v1472_v50, %v1319_v20 }
 0x79e   :  { %1495 = vrot.lane.b32.xlu1 %v1474_v45, %s3556_s25  ;;  %v3079_v16 = vmul.f32 -1.442695, %v1474_v45 }
 0x7a0   :  { %3306 = vpow2.f32 %v3079_v16  ;;  %v3113_v16 = vld [vmem:[#allocation2 + $0x70] sm:$0xf] }
 0x7a6   :  { %v3307_v18 = vpop.eup %3306 }
 0x7a7   :  { %v1478_v25 = vadd.f32 1.0, %v3307_v18  ;;  %v3221_v18 = vld [vmem:[#allocation2 + $0x74] sm:$0xf0] }
 0x7a9   :  { %3308 = vrcp.f32 %v1478_v25  ;;  %v1490_v19 = vand.u32 2147483648, %v1478_v25  ;;  %vm1484_vm1 = vweird.f32 %v1478_v25  ;;  %v1488_v38 = vand.u32 2147483647, %v1478_v25 }
 0x7ab   :  { %v1491_v35 = vor.u32 1.1754944e-38, %v1490_v19  ;;  %vm1489_vm13 = vcmp.eq.f32.partialorder %v1488_v38, 8.507059e+37 }
 0x7af   :  { %v3309_v5 = vpop.eup %3308 }
 0x7b0   :  { %v1480_v62 = vmul.f32 %v3309_v5, %v1478_v25  ;;  %vm1485_vm11 = vweird.f32 %v3309_v5  ;;  %v3114_v25 = vor.u32 %v3221_v18, %v3113_v16  ;;  %v3086_v18 = vld [vmem:[%s4848_s5 + $0x1] ss:$4 sm:$0x3] }
 0x7b1   :  { %vm1486_vm12 = vmor %vm1484_vm1, %vm1485_vm11 }
 0x7b2   :  { %v1481_v14 = vsub.f32 1.0, %v1480_v62  ;;  %1787 = vmatpush.bf16.msrb.mxu2 %v3114_v25 }
 0x7b4   :  { %v1482_v61 = vmul.f32 %v3309_v5, %v1481_v14 }
 0x7b6   :  { %v1483_v44 = vadd.f32 %v3309_v5, %v1482_v61 }
 0x7b8   :  { %v1487_v59 = vsel %vm1486_vm12, %v3309_v5, %v1483_v44 }
 0x7b9   :  { %v1492_v46 = vsel %vm1489_vm13, %v1491_v35, %v1487_v59 }
 0x7ba   :  { %v1500_v24 = vmul.f32 %v1492_v46, %v1416_v48  ;;  %v1509_v54 = vrot.slane %v1492_v46, 2 }
 0x810   :  { %v1496_v7 = vpop.permute.xlu1 %1495 }
 0x811   :  { %v1497_v3 = vrot.slane %v1496_v7, 2 }
 0x813   :  { %3310 = vtanh.f32 %v1497_v3 }
 0x819   :  { %v3311_v1 = vpop.eup %3310 }
 0x81a   :  { %v1501_v36 = vmul.f32 %v3311_v1, %v1492_v46 }
 0x81c   :  { %1503 = vrot.lane.b32.xlu0 %v1501_v36, %s3556_s25  ;;  %v3105_v36 = vld [vmem:[#allocation2 + $0x60] sm:$0xf] }
 0x88e   :  { %v1504_v51 = vpop.permute.xlu0 %1503 }
 0x88f   :  { %v1506_v34 = vadd.f32 %v1504_v51, %v1500_v24  ;;  %v3219_v24 = vld [vmem:[#allocation2 + $0x64] sm:$0xf0]  ;;  %v3097_v51 = vld [vmem:[#allocation2 + $0x50] sm:$0xf] }
 0x891   :  { %3312 = vtanh.f32 %v1506_v34 }
 0x897   :  { %v3313_v32 = vpop.eup %3312 }
 0x898   :  { %1512 = vrot.lane.b32.xlu2 %v3313_v32, %s3556_s25  ;;  %v3217_v32 = vld [vmem:[#allocation2 + $0x54] sm:$0xf0] }
 0x8f2   :  { %v1513_v13 = vpop.permute.xlu2 %1512 }
 0x8f3   :  { %v1515_v42 = vmul.f32 %v1513_v13, %v1509_v54  ;;  %v3220_v54 = vld [vmem:[#allocation2 + $0x74] sm:$0xf]  ;;  %v3115_v13 = vld [vmem:[#allocation2 + $0x78] sm:$0xf0] }
 0x8f5   :  { %1727 = vst [vmem:[#allocation1 + $0x1] ss:$4 sm:$0xff] %v1515_v42  ;;  %3080 = vmatmul.msk.f32.vlgmr.msra.gmra.mxu3 %vm163_vm0, %v1515_v42 }
 0x8fd   :  { %3081 = vmatmul.msk.f32.vlgmr.msrb.gmra.mxu3 %vm163_vm0, %v1515_v42  ;;  %v3098_v42 = vor.u32 %v3217_v32, %v3097_v51 }
 0x978   :  { %v1536_v60 = vpop.f32.mrf.mxu3 }
 0x980   :  { %v1556_v56 = vpop.f32.mrf.mxu3 }
 0x981   :  { %v1561_v37 = vrot.slane %v1556_v56, 6  ;;  %v3089_v56 = vld [vmem:[#allocation2 + $0x40] sm:$0xf] }
 0x983   :  { %v1562_v11 = vsel %vm1315_vm10, %v1536_v60, %v1561_v37  ;;  %v3118_v60 = vor.u32 %v3220_v54, %v3115_v13  ;;  %v3215_v37 = vld [vmem:[#allocation2 + $0x44] sm:$0xf0] }
 0x984   :  { %v1564_v9 = vadd.f32 %v1562_v11, %v1322_v40  ;;  %v3090_v40 = vor.u32 %v3215_v37, %v3089_v56 }
 0x985   :  { %1800 = vmatpush.bf16.msra.mxu3 %v3118_v60 }
 0x986   :  { %1585 = vrot.lane.b32.xlu1 %v1564_v9, %s3556_s25  ;;  %v3082_v63 = vmul.f32 -1.442695, %v1564_v9 }
 0x988   :  { %3314 = vpow2.f32 %v3082_v63 }
 0x98e   :  { %v3315_v47 = vpop.eup %3314 }
 0x98f   :  { %v1568_v52 = vadd.f32 1.0, %v3315_v47 }
 0x991   :  { %3316 = vrcp.f32 %v1568_v52  ;;  %v1580_v55 = vand.u32 2147483648, %v1568_v52  ;;  %vm1574_vm6 = vweird.f32 %v1568_v52  ;;  %v1578_v21 = vand.u32 2147483647, %v1568_v52 }
 0x993   :  { %v1581_v29 = vor.u32 1.1754944e-38, %v1580_v55  ;;  %vm1579_vm9 = vcmp.eq.f32.partialorder %v1578_v21, 8.507059e+37  ;;  %v4469_v21 = vld [vmem:[#allocation5 + $0xe0] sm:$0xff] }
 0x997   :  { %v3317_v26 = vpop.eup %3316 }
 0x998   :  { %v1570_v39 = vmul.f32 %v3317_v26, %v1568_v52  ;;  %vm1575_vm7 = vweird.f32 %v3317_v26  ;;  %v3218_v52 = vld [vmem:[#allocation2 + $0x64] sm:$0xf] }
 0x999   :  { %vm1576_vm8 = vmor %vm1574_vm6, %vm1575_vm7  ;;  %vm2753_vm7 = vcmask 517120  }
 0x99a   :  { %v1571_v57 = vsub.f32 1.0, %v1570_v39  ;;  %v3216_v39 = vld [vmem:[#allocation2 + $0x54] sm:$0xf] }
 0x99c   :  { %v1572_v58 = vmul.f32 %v3317_v26, %v1571_v57 }
 0x99e   :  { %v1573_v0 = vadd.f32 %v3317_v26, %v1572_v58  ;;  %v3099_v58 = vld [vmem:[#allocation2 + $0x58] sm:$0xf0] }
 0x99f   :  { %v3102_v55 = vor.u32 %v3216_v39, %v3099_v58 }
 0x9a0   :  { %v1577_v27 = vsel %vm1576_vm8, %v3317_v26, %v1573_v0  ;;  %v3107_v26 = vld [vmem:[#allocation2 + $0x68] sm:$0xf0] }
 0x9a1   :  { %v1582_v10 = vsel %vm1579_vm9, %v1581_v29, %v1577_v27  ;;  %v3110_v57 = vor.u32 %v3218_v52, %v3107_v26  ;;  %v4467_v0 = vld [vmem:[#allocation5 + $0xe8] sm:$0xff]  ;;  %v4471_v27 = vld [vmem:[#allocation5 + $0xd8] sm:$0xff]  ;;  %v4473_v29 = vld [vmem:[#allocation5 + $0xd0] sm:$0xff] }
 0x9a2   :  { %v1590_v43 = vmul.f32 %v1582_v10, %v1506_v34  ;;  %v1599_v4 = vrot.slane %v1582_v10, 2  ;;  %v3106_v34 = vor.u32 %v3219_v24, %v3105_v36 }
 0x9a3   :  { %1801 = vmatpush.bf16.msra.mxu3 %v3110_v57 }
 0x9a4   :  { %1788 = vmatpush.bf16.msrb.mxu2 %v3106_v34 }
 0x9a7   :  { %1802 = vmatpush.bf16.msra.mxu3 %v3102_v55 }
 0x9a8   :  { %1789 = vmatpush.bf16.msrb.mxu2 %v3098_v42 }
 0x9ac   :  { %1790 = vmatpush.bf16.msrb.mxu2 %v3090_v40 }
 0x9f8   :  { %v1586_v23 = vpop.permute.xlu1 %1585 }
 0x9f9   :  { %v1587_v31 = vrot.slane %v1586_v23, 2  ;;  %v4461_v23 = vld [vmem:[#allocation5 + $0xf8] sm:$0xff] }
 0x9fa   :  { %1858 = vmatpush.msra.mxu1 %v4461_v23 }
 0x9fb   :  { %3318 = vtanh.f32 %v1587_v31  ;;  %v4463_v31 = vld [vmem:[#allocation5 + $0xf0] sm:$0xff] }
 0x9fc   :  { %1838 = vmatpush.msra.mxu0 %v4463_v31  ;;  %1932 = vmatpush.msra.mxu2 %v4463_v31 }
 0x9fd   :  { %1859 = vmatpush.msra.mxu1 %v4467_v0 }
 0x9fe   :  { %1839 = vmatpush.msra.mxu0 %v4469_v21  ;;  %1933 = vmatpush.msra.mxu2 %v4469_v21 }
 0x9ff   :  { %1860 = vmatpush.msra.mxu1 %v4471_v27 }
 0xa00   :  { %1840 = vmatpush.msra.mxu0 %v4473_v29  ;;  %1934 = vmatpush.msra.mxu2 %v4473_v29 }
 0xa01   :  { %v3319_v28 = vpop.eup %3318 }
 0xa02   :  { %v1591_v22 = vmul.f32 %v3319_v28, %v1582_v10  ;;  %v3214_v28 = vld [vmem:[#allocation2 + $0x44] sm:$0xf]  ;;  %v3091_v10 = vld [vmem:[#allocation2 + $0x48] sm:$0xf0] }
 0xa04   :  { %1593 = vrot.lane.b32.xlu0 %v1591_v22, %s3556_s25  ;;  %v4478_v22 = vld [vmem:[#allocation5 + $0xc8] sm:$0xff] }
 0xa05   :  { %1861 = vmatpush.msra.mxu1 %v4478_v22 }
 0xa76   :  { %v1594_v2 = vpop.permute.xlu0 %1593 }
 0xa77   :  { %v1596_v17 = vadd.f32 %v1594_v2, %v1590_v43  ;;  %v3094_v43 = vor.u32 %v3214_v28, %v3091_v10  ;;  %v4485_v2 = vld [vmem:[#allocation5 + $0xc0] sm:$0xff] }
 0xa78   :  { %1841 = vmatpush.msra.mxu0 %v4485_v2  ;;  %1935 = vmatpush.msra.mxu2 %v4485_v2 }
 0xa79   :  { %3320 = vtanh.f32 %v1596_v17  ;;  %1803 = vmatpush.bf16.msra.mxu3 %v3094_v43 }
 0xa7d   :  { %1952 = vmatpush.msrb.mxu3 %v4461_v23 }
 0xa7f   :  { %v3321_v41 = vpop.eup %3320  ;;  %1953 = vmatpush.msrb.mxu3 %v4467_v0 }
 0xa80   :  { %1602 = vrot.lane.b32.xlu2 %v3321_v41, %s3556_s25  ;;  %v4489_v41 = vld [vmem:[#allocation5 + $0xb0] sm:$0xff] }
 0xa81   :  { %1842 = vmatpush.msra.mxu0 %v4489_v41  ;;  %1936 = vmatpush.msra.mxu2 %v4489_v41 }
 0xa82   :  { %1954 = vmatpush.msrb.mxu3 %v4471_v27 }
 0xa84   :  { %1955 = vmatpush.msrb.mxu3 %v4478_v22 }
 0xada   :  { %v1603_v48 = vpop.permute.xlu2 %1602 }
 0xadb   :  { %v1605_v49 = vmul.f32 %v1603_v48, %v1599_v4  ;;  %v4493_v4 = vld [vmem:[#allocation5 + $0xa8] sm:$0xff]  ;;  %v4495_v48 = vld [vmem:[#allocation5 + $0xa0] sm:$0xff] }
 0xadc   :  { %1843 = vmatpush.msra.mxu0 %v4495_v48  ;;  %1937 = vmatpush.msra.mxu2 %v4495_v48 }
 0xadd   :  { %1729 = vst [vmem:[#allocation1 + $0x2] ss:$4 sm:$0xff] %v1605_v49  ;;  %3083 = vmatmul.msk.f32.vlgmr.msrb.gmra.mxu0 %vm163_vm0, %v1605_v49  ;;  %3084 = vmatmul.msk.f32.vlgmr.msrb.gmra.mxu1 %vm163_vm0, %v1605_v49  ;;  %v4497_v49 = vld [vmem:[#allocation5 + $0x98] sm:$0xff] }
 0xb5a   :  { %v1646_v30 = vpop.f32.mrf.mxu1  ;;  %v1626_v6 = vpop.f32.mrf.mxu0 }
 0xb5b   :  { %v1651_v53 = vrot.slane %v1646_v30, 6  ;;  %v3122_v30 = vld [vmem:[%s4850_s7 + $0x2] sm:$0x3] }
 0xb5d   :  { %v1652_v12 = vsel %vm1315_vm10, %v1626_v6, %v1651_v53  ;;  %v1708_v53 = vld [vmem:[#allocation5 + $0x90] sm:$0xff]  ;;  %v4505_v6 = vld [vmem:[#allocation5 + $0x88] sm:$0xff] }
 0xb5e   :  { %v1654_v33 = vadd.f32 %v1652_v12, %v1325_v15  ;;  %v3121_v15 = vld [vmem:[%s4849_s6 + $0x2] sm:$0x3]  ;;  %v1706_v12 = vld [vmem:[#allocation5 + $0x80] sm:$0xff]  ;;  %1844 = vmatpush.msra.mxu0 %v1708_v53  ;;  %1938 = vmatpush.msra.mxu2 %v1708_v53 }
 0xb60   :  { %1675 = vrot.lane.b32.xlu1 %v1654_v33, %s3556_s25  ;;  %v3085_v20 = vmul.f32 -1.442695, %v1654_v33  ;;  %1845 = vmatpush.msra.mxu0 %v1706_v12 }
 0xb61   :  { %3123 = vmatmul.msk.f32.vlgmr.msra.gmra.mxu0 %vm163_vm0, %v3121_v15  ;;  %1939 = vmatpush.msra.mxu2 %v1706_v12 }
 0xb62   :  { %3322 = vpow2.f32 %v3085_v20  ;;  %2022 = vmatpush.msrb.mxu0 %v4463_v31 }
 0xb64   :  { %2023 = vmatpush.msrb.mxu0 %v4469_v21 }
 0xb66   :  { %2024 = vmatpush.msrb.mxu0 %v4473_v29 }
 0xb68   :  { %v3323_v50 = vpop.eup %3322  ;;  %2025 = vmatpush.msrb.mxu0 %v4485_v2 }
 0xb69   :  { %v1658_v45 = vadd.f32 1.0, %v3323_v50 }
 0xb6a   :  { %2026 = vmatpush.msrb.mxu0 %v4489_v41 }
 0xb6b   :  { %3324 = vrcp.f32 %v1658_v45  ;;  %v1670_v44 = vand.u32 2147483648, %v1658_v45  ;;  %vm1664_vm1 = vweird.f32 %v1658_v45  ;;  %v1668_v19 = vand.u32 2147483647, %v1658_v45 }
 0xb6c   :  { %2027 = vmatpush.msrb.mxu0 %v4495_v48 }
 0xb6d   :  { %v1671_v59 = vor.u32 1.1754944e-38, %v1670_v44  ;;  %vm1669_vm13 = vcmp.eq.f32.partialorder %v1668_v19, 8.507059e+37 }
 0xb6e   :  { %2028 = vmatpush.msrb.mxu0 %v1708_v53 }
 0xb70   :  { %2029 = vmatpush.msrb.mxu0 %v1706_v12 }
 0xb71   :  { %v3325_v5 = vpop.eup %3324 }
 0xb72   :  { %v1660_v62 = vmul.f32 %v3325_v5, %v1658_v45  ;;  %vm1665_vm11 = vweird.f32 %v3325_v5 }
 0xb73   :  { %vm1666_vm12 = vmor %vm1664_vm1, %vm1665_vm11 }
 0xb74   :  { %v1661_v14 = vsub.f32 1.0, %v1660_v62  ;;  %v1736_v62 = vperm.slane %v3086_v18, 0 }
 0xb76   :  { %v1662_v61 = vmul.f32 %v3325_v5, %v1661_v14 }
 0xb78   :  { %v1663_v3 = vadd.f32 %v3325_v5, %v1662_v61 }
 0xb7a   :  { %v1667_v38 = vsel %vm1666_vm12, %v3325_v5, %v1663_v3  ;;  %v1737_v5 = vperm.slane %v3086_v18, 1 }
 0xb7b   :  { %v4452_v1 = vsel %vm1669_vm13, %v1671_v59, %v1667_v38 }
 0xb7c   :  { %v1680_v11 = vmul.f32 %v4452_v1, %v1596_v17  ;;  %v4487_v17 = vld [vmem:[#allocation5 + $0xb8] sm:$0xff]  ;;  %v1689_v33 = vrot.slane %v4452_v1, 2 }
 0xb7d   :  { %1862 = vmatpush.msra.mxu1 %v4487_v17  ;;  %1956 = vmatpush.msrb.mxu3 %v4487_v17 }
 0xb7f   :  { %1863 = vmatpush.msra.mxu1 %v4493_v4  ;;  %1957 = vmatpush.msrb.mxu3 %v4493_v4 }
 0xb81   :  { %1864 = vmatpush.msra.mxu1 %v4497_v49  ;;  %1958 = vmatpush.msrb.mxu3 %v4497_v49 }
 0xb83   :  { %1865 = vmatpush.msra.mxu1 %v4505_v6  ;;  %1959 = vmatpush.msrb.mxu3 %v4505_v6 }
 0xb84   :  { %3124 = vmatmul.msk.f32.vlgmr.msra.gmra.mxu1 %vm163_vm0, %v3121_v15 }
 0xb85   :  { %2042 = vmatpush.msrb.mxu1 %v4461_v23 }
 0xb87   :  { %2043 = vmatpush.msrb.mxu1 %v4467_v0 }
 0xb89   :  { %2044 = vmatpush.msrb.mxu1 %v4471_v27 }
 0xb8b   :  { %2045 = vmatpush.msrb.mxu1 %v4478_v22 }
 0xb8d   :  { %2046 = vmatpush.msrb.mxu1 %v4487_v17 }
 0xb8f   :  { %2047 = vmatpush.msrb.mxu1 %v4493_v4 }
 0xb91   :  { %2048 = vmatpush.msrb.mxu1 %v4497_v49 }
 0xb93   :  { %2049 = vmatpush.msrb.mxu1 %v4505_v6 }
 0xbd2   :  { %v1676_v7 = vpop.permute.xlu1 %1675 }
 0xbd3   :  { %v1677_v8 = vrot.slane %v1676_v7, 2 }
 0xbd5   :  { %3326 = vtanh.f32 %v1677_v8 }
 0xbdb   :  { %v3327_v35 = vpop.eup %3326 }
 0xbdc   :  { %v1681_v46 = vmul.f32 %v3327_v35, %v4452_v1 }
 0xbde   :  { %1683 = vrot.lane.b32.xlu0 %v1681_v46, %s3556_s25  ;;  %v1847_v61 = vpop.f32.mrf.mxu0 }
 0xbe6   :  { %1902 = vrot.lane.b32.xlu0 %v3122_v30, %s3556_s25 }
 0xc01   :  { %v1867_v25 = vpop.f32.mrf.mxu1 }
 0xc02   :  { %v1872_v14 = vrot.slane %v1867_v25, 6 }
 0xc04   :  { %v1873_v38 = vsel %vm1315_vm10, %v1847_v61, %v1872_v14 }
 0xc50   :  { %v1684_v9 = vpop.permute.xlu0 %1683 }
 0xc51   :  { %v4457_v63 = vadd.f32 %v1684_v9, %v1680_v11 }
 0xc53   :  { %3328 = vtanh.f32 %v4457_v63 }
 0xc59   :  { %v3329_v47 = vpop.eup %3328 }
 0xc5a   :  { %1692 = vrot.lane.b32.xlu2 %v3329_v47, %s3556_s25 }
 0xcb4   :  { %v1693_v20 = vpop.permute.xlu2 %1692 }
 0xcb5   :  { %v1695_v50 = vmul.f32 %v1693_v20, %v1689_v33 }
 0xcb7   :  { %1731 = vst [vmem:[#allocation1 + $0x3] ss:$4 sm:$0xff] %v1695_v50 }
 0xcb8   :  { %2754 = vst.msk [vmem:[#allocation10] sm:$0x3] %vm2753_vm7, %v1695_v50 }
 0xcbe   :  { %v1732_v45 = vld.sshfl [vmem:[#allocation1] sm:$0xff pattern:$0x73625140] }
 0xcbf   :  { %v1734_v16 = vpack.c.bf16 %v1732_v45, %v1732_v45 }
 0xcc1   :  { %3119 = vmatmul.msk.bf16.vlgmr.msrb.gmra.mxu2 %vm163_vm0, %v1734_v16  ;;  %3120 = vmatmul.msk.bf16.vlgmr.msra.gmra.mxu3 %vm163_vm0, %v1734_v16 }
 0xcc2   :  { %2112 = vmatpush.msrb.mxu2 %v4463_v31  ;;  %2132 = vmatpush.msra.mxu3 %v4461_v23  ;;  %v1903_v23 = vpop.permute.xlu0 %1902 }
 0xcc4   :  { %2113 = vmatpush.msrb.mxu2 %v4469_v21  ;;  %2133 = vmatpush.msra.mxu3 %v4467_v0 }
 0xcc6   :  { %2114 = vmatpush.msrb.mxu2 %v4473_v29  ;;  %2134 = vmatpush.msra.mxu3 %v4471_v27 }
 0xcc8   :  { %2115 = vmatpush.msrb.mxu2 %v4485_v2  ;;  %2135 = vmatpush.msra.mxu3 %v4478_v22 }
 0xcca   :  { %2116 = vmatpush.msrb.mxu2 %v4489_v41  ;;  %2136 = vmatpush.msra.mxu3 %v4487_v17 }
 0xccc   :  { %2117 = vmatpush.msrb.mxu2 %v4495_v48  ;;  %2137 = vmatpush.msra.mxu3 %v4493_v4 }
 0xcce   :  { %2118 = vmatpush.msrb.mxu2 %v1708_v53  ;;  %2138 = vmatpush.msra.mxu3 %v4497_v49 }
 0xcd0   :  { %2119 = vmatpush.msrb.mxu2 %v1706_v12  ;;  %2139 = vmatpush.msra.mxu3 %v4505_v6 }
 0xd44   :  { %v1792_v7 = vpop.f32.mrf.mxu2  ;;  %v1805_v8 = vpop.f32.mrf.mxu3 }
 0xd45   :  { %v1806_v3 = vadd.f32 %v1805_v8, %v1737_v5  ;;  %v1793_v44 = vadd.f32 %v1792_v7, %v1736_v62 }
 0xd47   :  { %v1811_v19 = vrot.slane %v1806_v3, 6 }
 0xd49   :  { %v1812_v59 = vsel %vm1315_vm10, %v1793_v44, %v1811_v19  ;;  %v1813_v35 = vsel %vm1317_vm5, %v1793_v44, %v1811_v19  ;;  %v4565_v1 = vsel %vm1320_vm14, %v1793_v44, %v1811_v19  ;;  %v4568_v46 = vsel %vm1323_vm15, %v1811_v19, %v1793_v44 }
 0xd4a   :  { %v1875_v36 = vadd.f32 %v1873_v38, %v1812_v59  ;;  %v1814_v2 = vrot.slane %v1813_v35, 2 }
 0xd4c   :  { %v1794_v24 = vpop.f32.mrf.mxu2  ;;  %v1807_v51 = vpop.f32.mrf.mxu3  ;;  %1896 = vrot.lane.b32.xlu1 %v1875_v36, %s3556_s25  ;;  %v3125_v34 = vmul.f32 -1.442695, %v1875_v36  ;;  %v1816_v36 = vrot.slane %v4565_v1, 4 }
 0xd4e   :  { %3330 = vpow2.f32 %v3125_v34 }
 0xd54   :  { %v3331_v32 = vpop.eup %3330 }
 0xd55   :  { %v1879_v54 = vadd.f32 1.0, %v3331_v32 }
 0xd57   :  { %3332 = vrcp.f32 %v1879_v54  ;;  %v1891_v9 = vand.u32 2147483648, %v1879_v54  ;;  %vm1885_vm8 = vweird.f32 %v1879_v54  ;;  %v1889_v47 = vand.u32 2147483647, %v1879_v54 }
 0xd59   :  { %v1892_v26 = vor.u32 1.1754944e-38, %v1891_v9  ;;  %vm1890_vm11 = vcmp.eq.f32.partialorder %v1889_v47, 8.507059e+37 }
 0xd5d   :  { %v3333_v13 = vpop.eup %3332 }
 0xd5e   :  { %v1881_v42 = vmul.f32 %v3333_v13, %v1879_v54  ;;  %vm1886_vm6 = vweird.f32 %v3333_v13 }
 0xd5f   :  { %vm1887_vm9 = vmor %vm1885_vm8, %vm1886_vm6 }
 0xd60   :  { %v1882_v60 = vsub.f32 1.0, %v1881_v42 }
 0xd62   :  { %v1883_v56 = vmul.f32 %v3333_v13, %v1882_v60 }
 0xd64   :  { %v1884_v11 = vadd.f32 %v3333_v13, %v1883_v56 }
 0xd66   :  { %v1888_v52 = vsel %vm1887_vm9, %v3333_v13, %v1884_v11 }
 0xd67   :  { %v1893_v57 = vsel %vm1890_vm11, %v1892_v26, %v1888_v52 }
 0xd68   :  { %v1905_v31 = vmul.f32 %v1903_v23, %v1893_v57  ;;  %v1914_v27 = vrot.slane %v1893_v57, 2 }
 0xdbe   :  { %v1897_v37 = vpop.permute.xlu1 %1896 }
 0xdbf   :  { %v1898_v40 = vrot.slane %v1897_v37, 2 }
 0xdc1   :  { %3334 = vtanh.f32 %v1898_v40 }
 0xdc7   :  { %v3335_v39 = vpop.eup %3334 }
 0xdc8   :  { %v1906_v58 = vmul.f32 %v3335_v39, %v1893_v57 }
 0xdca   :  { %1908 = vrot.lane.b32.xlu2 %v1906_v58, %s3556_s25 }
 0xe24   :  { %v1909_v0 = vpop.permute.xlu2 %1908 }
 0xe25   :  { %v1911_v55 = vadd.f32 %v1909_v0, %v1905_v31 }
 0xe27   :  { %3336 = vtanh.f32 %v1911_v55 }
 0xe2d   :  { %v3337_v21 = vpop.eup %3336 }
 0xe2e   :  { %1917 = vrot.lane.b32.xlu1 %v3337_v21, %s3556_s25 }
 0xea0   :  { %v1918_v29 = vpop.permute.xlu1 %1917 }
 0xea1   :  { %v1920_v28 = vmul.f32 %v1918_v29, %v1914_v27 }
 0xea3   :  { %2220 = vst [vmem:[#allocation1] ss:$4 sm:$0xff] %v1920_v28  ;;  %3126 = vmatmul.msk.f32.vlgmr.msra.gmra.mxu2 %vm163_vm0, %v1920_v28  ;;  %3127 = vmatmul.msk.f32.vlgmr.msrb.gmra.mxu3 %vm163_vm0, %v1920_v28 }
 0xf26   :  { %v1961_v10 = vpop.f32.mrf.mxu3  ;;  %v1941_v43 = vpop.f32.mrf.mxu2 }
 0xf27   :  { %v1966_v22 = vrot.slane %v1961_v10, 6 }
 0xf29   :  { %v1967_v17 = vsel %vm1315_vm10, %v1941_v43, %v1966_v22  ;;  %v1818_v22 = vrot.slane %v4568_v46, 6 }
 0xf2a   :  { %v1969_v41 = vadd.f32 %v1967_v17, %v1814_v2 }
 0xf2c   :  { %1990 = vrot.lane.b32.xlu0 %v1969_v41, %s3556_s25  ;;  %v3128_v4 = vmul.f32 -1.442695, %v1969_v41 }
 0xf2e   :  { %3338 = vpow2.f32 %v3128_v4 }
 0xf34   :  { %v3339_v48 = vpop.eup %3338 }
 0xf35   :  { %v1973_v49 = vadd.f32 1.0, %v3339_v48 }
 0xf37   :  { %3340 = vrcp.f32 %v1973_v49  ;;  %v1985_v50 = vand.u32 2147483648, %v1973_v49  ;;  %vm1979_vm12 = vweird.f32 %v1973_v49  ;;  %v1983_v45 = vand.u32 2147483647, %v1973_v49 }
 0xf39   :  { %v1986_v18 = vor.u32 1.1754944e-38, %v1985_v50  ;;  %vm1984_vm6 = vcmp.eq.f32.partialorder %v1983_v45, 8.507059e+37 }
 0xf3d   :  { %v3341_v30 = vpop.eup %3340 }
 0xf3e   :  { %v1975_v53 = vmul.f32 %v3341_v30, %v1973_v49  ;;  %vm1980_vm1 = vweird.f32 %v3341_v30 }
 0xf3f   :  { %vm1981_vm13 = vmor %vm1979_vm12, %vm1980_vm1 }
 0xf40   :  { %v1976_v6 = vsub.f32 1.0, %v1975_v53 }
 0xf42   :  { %v1977_v15 = vmul.f32 %v3341_v30, %v1976_v6 }
 0xf44   :  { %v1978_v20 = vadd.f32 %v3341_v30, %v1977_v15 }
 0xf46   :  { %v1982_v16 = vsel %vm1981_vm13, %v3341_v30, %v1978_v20 }
 0xf47   :  { %v1987_v5 = vsel %vm1984_vm6, %v1986_v18, %v1982_v16 }
 0xf48   :  { %v1995_v14 = vmul.f32 %v1987_v5, %v1911_v55  ;;  %v2004_v3 = vrot.slane %v1987_v5, 2 }
 0xf9e   :  { %v1991_v12 = vpop.permute.xlu0 %1990 }
 0xf9f   :  { %v1992_v33 = vrot.slane %v1991_v12, 2 }
 0xfa1   :  { %3342 = vtanh.f32 %v1992_v33 }
 0xfa7   :  { %v3343_v25 = vpop.eup %3342 }
 0xfa8   :  { %v1996_v62 = vmul.f32 %v3343_v25, %v1987_v5  ;;  %v4598_v25 = vld [vmem:[#allocation5 + $0x178] sm:$0xff]  ;;  %v4600_v5 = vld [vmem:[#allocation5 + $0x170] sm:$0xff] }
 0xfa9   :  { %2353 = vmatpush.msrb.mxu3 %v4598_v25  ;;  %2333 = vmatpush.msra.mxu2 %v4600_v5 }
 0xfaa   :  { %1998 = vrot.lane.b32.xlu2 %v1996_v62, %s3556_s25  ;;  %v4602_v62 = vld [vmem:[#allocation5 + $0x168] sm:$0xff] }
 0xfab   :  { %2354 = vmatpush.msrb.mxu3 %v4602_v62 }
0x1004   :  { %v1999_v61 = vpop.permute.xlu2 %1998 }
0x1005   :  { %v2001_v7 = vadd.f32 %v1999_v61, %v1995_v14  ;;  %v3162_v14 = vld [vmem:[#allocation2 + $0xb0] sm:$0xf]  ;;  %v3229_v61 = vld [vmem:[#allocation2 + $0xb4] sm:$0xf0] }
0x1007   :  { %3344 = vtanh.f32 %v2001_v7 }
0x100d   :  { %v3345_v8 = vpop.eup %3344 }
0x100e   :  { %2007 = vrot.lane.b32.xlu1 %v3345_v8, %s3556_s25  ;;  %v3163_v8 = vor.u32 %v3229_v61, %v3162_v14 }
0x1010   :  { %2282 = vmatpush.bf16.msra.mxu0 %v3163_v8 }
0x1080   :  { %v2008_v44 = vpop.permute.xlu1 %2007 }
0x1081   :  { %v2010_v19 = vmul.f32 %v2008_v44, %v2004_v3  ;;  %v3164_v3 = vld [vmem:[#allocation2 + $0xb8] sm:$0xf0]  ;;  %v4606_v44 = vld [vmem:[#allocation5 + $0x160] sm:$0xff] }
0x1082   :  { %2334 = vmatpush.msra.mxu2 %v4606_v44 }
0x1083   :  { %2222 = vst [vmem:[#allocation1 + $0x1] ss:$4 sm:$0xff] %v2010_v19  ;;  %3129 = vmatmul.msk.f32.vlgmr.msrb.gmra.mxu0 %vm163_vm0, %v2010_v19  ;;  %3130 = vmatmul.msk.f32.vlgmr.msrb.gmra.mxu1 %vm163_vm0, %v2010_v19  ;;  %v4608_v19 = vld [vmem:[#allocation5 + $0x158] sm:$0xff] }
0x1084   :  { %2355 = vmatpush.msrb.mxu3 %v4608_v19 }
0x1100   :  { %v2051_v38 = vpop.f32.mrf.mxu1  ;;  %v2031_v35 = vpop.f32.mrf.mxu0 }
0x1101   :  { %v2056_v59 = vrot.slane %v2051_v38, 6 }
0x1103   :  { %v2057_v24 = vsel %vm1315_vm10, %v2031_v35, %v2056_v59  ;;  %v4612_v59 = vld [vmem:[#allocation5 + $0x150] sm:$0xff]  ;;  %v4614_v35 = vld [vmem:[#allocation5 + $0x148] sm:$0xff] }
0x1104   :  { %v2059_v51 = vadd.f32 %v2057_v24, %v1816_v36  ;;  %2335 = vmatpush.msra.mxu2 %v4612_v59  ;;  %2356 = vmatpush.msrb.mxu3 %v4614_v35 }
0x1106   :  { %2080 = vrot.lane.b32.xlu0 %v2059_v51, %s3556_s25  ;;  %v3131_v34 = vmul.f32 -1.442695, %v2059_v51 }
0x1108   :  { %3346 = vpow2.f32 %v3131_v34 }
0x110e   :  { %v3347_v32 = vpop.eup %3346 }
0x110f   :  { %v2063_v54 = vadd.f32 1.0, %v3347_v32  ;;  %v3154_v32 = vld [vmem:[#allocation2 + $0xa0] sm:$0xf] }
0x1111   :  { %3348 = vrcp.f32 %v2063_v54  ;;  %v2075_v1 = vand.u32 2147483648, %v2063_v54  ;;  %vm2069_vm9 = vweird.f32 %v2063_v54  ;;  %v2073_v9 = vand.u32 2147483647, %v2063_v54 }
0x1113   :  { %v2076_v52 = vor.u32 1.1754944e-38, %v2075_v1  ;;  %vm2074_vm1 = vcmp.eq.f32.partialorder %v2073_v9, 8.507059e+37  ;;  %v4630_v1 = vld [vmem:[#allocation5 + $0x128] sm:$0xff]  ;;  %v3146_v9 = vld [vmem:[#allocation2 + $0x90] sm:$0xf] }
0x1117   :  { %v3349_v13 = vpop.eup %3348 }
0x1118   :  { %v2065_v42 = vmul.f32 %v3349_v13, %v2063_v54  ;;  %vm2070_vm8 = vweird.f32 %v3349_v13  ;;  %v3227_v54 = vld [vmem:[#allocation2 + $0xa4] sm:$0xf0] }
0x1119   :  { %vm2071_vm11 = vmor %vm2069_vm9, %vm2070_vm8 }
0x111a   :  { %v2066_v60 = vsub.f32 1.0, %v2065_v42  ;;  %v3155_v42 = vor.u32 %v3227_v54, %v3154_v32 }
0x111c   :  { %v2067_v56 = vmul.f32 %v3349_v13, %v2066_v60  ;;  %v3156_v60 = vld [vmem:[#allocation2 + $0xa8] sm:$0xf0]  ;;  %2283 = vmatpush.bf16.msra.mxu0 %v3155_v42 }
0x111e   :  { %v2068_v11 = vadd.f32 %v3349_v13, %v2067_v56  ;;  %v4622_v56 = vld [vmem:[#allocation5 + $0x140] sm:$0xff] }
0x111f   :  { %2336 = vmatpush.msra.mxu2 %v4622_v56 }
0x1120   :  { %v2072_v47 = vsel %vm2071_vm11, %v3349_v13, %v2068_v11  ;;  %v3226_v13 = vld [vmem:[#allocation2 + $0xa4] sm:$0xf]  ;;  %v4628_v11 = vld [vmem:[#allocation5 + $0x130] sm:$0xff] }
0x1121   :  { %v2077_v39 = vsel %vm2074_vm1, %v2076_v52, %v2072_v47  ;;  %v3225_v47 = vld [vmem:[#allocation2 + $0x94] sm:$0xf0]  ;;  %v3224_v52 = vld [vmem:[#allocation2 + $0x94] sm:$0xf]  ;;  %2337 = vmatpush.msra.mxu2 %v4628_v11 }
0x1122   :  { %v2085_v58 = vmul.f32 %v2077_v39, %v2001_v7  ;;  %v2094_v55 = vrot.slane %v2077_v39, 2  ;;  %v3228_v7 = vld [vmem:[#allocation2 + $0xb4] sm:$0xf] }
0x1123   :  { %v3167_v38 = vor.u32 %v3228_v7, %v3164_v3 }
0x1125   :  { %2295 = vmatpush.bf16.msra.mxu1 %v3167_v38 }
0x1178   :  { %v2081_v37 = vpop.permute.xlu0 %2080 }
0x1179   :  { %v2082_v40 = vrot.slane %v2081_v37, 2  ;;  %v4624_v37 = vld [vmem:[#allocation5 + $0x138] sm:$0xff] }
0x117a   :  { %2357 = vmatpush.msrb.mxu3 %v4624_v37 }
0x117b   :  { %3350 = vtanh.f32 %v2082_v40  ;;  %v3159_v40 = vor.u32 %v3226_v13, %v3156_v60 }
0x117c   :  { %2358 = vmatpush.msrb.mxu3 %v4630_v1 }
0x117d   :  { %2296 = vmatpush.bf16.msra.mxu1 %v3159_v40 }
0x1181   :  { %v3351_v26 = vpop.eup %3350 }
0x1182   :  { %v2086_v57 = vmul.f32 %v3351_v26, %v2077_v39  ;;  %v3148_v26 = vld [vmem:[#allocation2 + $0x98] sm:$0xf0]  ;;  %v3147_v39 = vor.u32 %v3225_v47, %v3146_v9 }
0x1184   :  { %2088 = vrot.lane.b32.xlu2 %v2086_v57, %s3556_s25  ;;  %v3151_v57 = vor.u32 %v3224_v52, %v3148_v26  ;;  %2284 = vmatpush.bf16.msra.mxu0 %v3147_v39 }
0x1186   :  { %2297 = vmatpush.bf16.msra.mxu1 %v3151_v57 }
0x11de   :  { %v2089_v23 = vpop.permute.xlu2 %2088 }
0x11df   :  { %v4585_v31 = vadd.f32 %v2089_v23, %v2085_v58  ;;  %v4633_v58 = vld [vmem:[#allocation5 + $0x120] sm:$0xff]  ;;  %v4635_v23 = vld [vmem:[#allocation5 + $0x118] sm:$0xff] }
0x11e0   :  { %2338 = vmatpush.msra.mxu2 %v4633_v58  ;;  %2359 = vmatpush.msrb.mxu3 %v4635_v23 }
0x11e1   :  { %3352 = vtanh.f32 %v4585_v31 }
0x11e7   :  { %v3353_v0 = vpop.eup %3352 }
0x11e8   :  { %2097 = vrot.lane.b32.xlu1 %v3353_v0, %s3556_s25  ;;  %v4640_v0 = vld [vmem:[#allocation5 + $0x108] sm:$0xff] }
0x11e9   :  { %2360 = vmatpush.msrb.mxu3 %v4640_v0 }
0x125a   :  { %v2098_v21 = vpop.permute.xlu1 %2097 }
0x125b   :  { %v2100_v27 = vmul.f32 %v2098_v21, %v2094_v55  ;;  %v3138_v55 = vld [vmem:[#allocation2 + $0x80] sm:$0xf]  ;;  %v3223_v21 = vld [vmem:[#allocation2 + $0x84] sm:$0xf0] }
0x125d   :  { %2224 = vst [vmem:[#allocation1 + $0x2] ss:$4 sm:$0xff] %v2100_v27  ;;  %3132 = vmatmul.msk.f32.vlgmr.msrb.gmra.mxu2 %vm163_vm0, %v2100_v27  ;;  %3133 = vmatmul.msk.f32.vlgmr.msra.gmra.mxu3 %vm163_vm0, %v2100_v27  ;;  %v3222_v27 = vld [vmem:[#allocation2 + $0x84] sm:$0xf] }
0x125e   :  { %2537 = vmatpush.msra.mxu3 %v4598_v25 }
0x1260   :  { %2538 = vmatpush.msra.mxu3 %v4602_v62 }
0x1262   :  { %2539 = vmatpush.msra.mxu3 %v4608_v19 }
0x1264   :  { %2540 = vmatpush.msra.mxu3 %v4614_v35 }
0x1266   :  { %2541 = vmatpush.msra.mxu3 %v4624_v37 }
0x1268   :  { %2542 = vmatpush.msra.mxu3 %v4630_v1 }
0x126a   :  { %2543 = vmatpush.msra.mxu3 %v4635_v23 }
0x126c   :  { %2544 = vmatpush.msra.mxu3 %v4640_v0 }
0x12e0   :  { %v2141_v29 = vpop.f32.mrf.mxu3  ;;  %v2121_v10 = vpop.f32.mrf.mxu2 }
0x12e1   :  { %v2146_v28 = vrot.slane %v2141_v29, 6  ;;  %v3140_v29 = vld [vmem:[#allocation2 + $0x88] sm:$0xf0] }
0x12e3   :  { %v2147_v43 = vsel %vm1315_vm10, %v2121_v10, %v2146_v28  ;;  %v3170_v28 = vld [vmem:[%s4849_s6 + $0x4] sm:$0x3]  ;;  %v3139_v10 = vor.u32 %v3223_v21, %v3138_v55 }
0x12e4   :  { %v2149_v2 = vadd.f32 %v2147_v43, %v1818_v22  ;;  %v4647_v22 = vld [vmem:[#allocation5 + $0x100] sm:$0xff]  ;;  %v3143_v43 = vor.u32 %v3222_v27, %v3140_v29  ;;  %3173 = vmatmul.msk.f32.vlgmr.msrb.gmra.mxu3 %vm163_vm0, %v3170_v28 }
0x12e5   :  { %2285 = vmatpush.bf16.msra.mxu0 %v3139_v10 }
0x12e6   :  { %2170 = vrot.lane.b32.xlu0 %v2149_v2, %s3556_s25  ;;  %v3134_v17 = vmul.f32 -1.442695, %v2149_v2  ;;  %v3171_v2 = vld [vmem:[%s4850_s7 + $0x4] sm:$0x3]  ;;  %2298 = vmatpush.bf16.msra.mxu1 %v3143_v43 }
0x12e8   :  { %3354 = vpow2.f32 %v3134_v17 }
0x12e9   :  { %2427 = vmatpush.msrb.mxu0 %v4600_v5 }
0x12ea   :  { %2447 = vmatpush.msrb.mxu1 %v4598_v25 }
0x12eb   :  { %2428 = vmatpush.msrb.mxu0 %v4606_v44 }
0x12ec   :  { %2448 = vmatpush.msrb.mxu1 %v4602_v62 }
0x12ed   :  { %2429 = vmatpush.msrb.mxu0 %v4612_v59 }
0x12ee   :  { %v3355_v41 = vpop.eup %3354  ;;  %2449 = vmatpush.msrb.mxu1 %v4608_v19 }
0x12ef   :  { %v2153_v4 = vadd.f32 1.0, %v3355_v41  ;;  %2430 = vmatpush.msrb.mxu0 %v4622_v56 }
0x12f0   :  { %2450 = vmatpush.msrb.mxu1 %v4614_v35 }
0x12f1   :  { %3356 = vrcp.f32 %v2153_v4  ;;  %v2165_v46 = vand.u32 2147483648, %v2153_v4  ;;  %vm2159_vm13 = vweird.f32 %v2153_v4  ;;  %v2163_v33 = vand.u32 2147483647, %v2153_v4  ;;  %2431 = vmatpush.msrb.mxu0 %v4628_v11 }
0x12f2   :  { %2451 = vmatpush.msrb.mxu1 %v4624_v37 }
0x12f3   :  { %v2166_v50 = vor.u32 1.1754944e-38, %v2165_v46  ;;  %vm2164_vm8 = vcmp.eq.f32.partialorder %v2163_v33, 8.507059e+37  ;;  %2432 = vmatpush.msrb.mxu0 %v4633_v58 }
0x12f4   :  { %2452 = vmatpush.msrb.mxu1 %v4630_v1 }
0x12f6   :  { %2453 = vmatpush.msrb.mxu1 %v4635_v23 }
0x12f7   :  { %v3357_v48 = vpop.eup %3356 }
0x12f8   :  { %v2155_v49 = vmul.f32 %v3357_v48, %v2153_v4  ;;  %vm2160_vm12 = vweird.f32 %v3357_v48  ;;  %2454 = vmatpush.msrb.mxu1 %v4640_v0 }
0x12f9   :  { %vm2161_vm6 = vmor %vm2159_vm13, %vm2160_vm12 }
0x12fa   :  { %v2156_v30 = vsub.f32 1.0, %v2155_v49 }
0x12fc   :  { %v2157_v53 = vmul.f32 %v3357_v48, %v2156_v30 }
0x12fe   :  { %v2158_v12 = vadd.f32 %v3357_v48, %v2157_v53 }
0x1300   :  { %v2162_v20 = vsel %vm2161_vm6, %v3357_v48, %v2158_v12  ;;  %vm2689_vm6 = vcmask 1040384  }
0x1301   :  { %v4594_v16 = vsel %vm2164_vm8, %v2166_v50, %v2162_v20  ;;  %vm2695_vm8 = vcmask 1042433  }
0x1302   :  { %v2175_v36 = vmul.f32 %v4594_v16, %v4585_v31  ;;  %v4638_v31 = vld [vmem:[#allocation5 + $0x110] sm:$0xff]  ;;  %v2184_v17 = vrot.slane %v4594_v16, 2 }
0x1303   :  { %2339 = vmatpush.msra.mxu2 %v4638_v31  ;;  %2433 = vmatpush.msrb.mxu0 %v4638_v31 }
0x1305   :  { %2340 = vmatpush.msra.mxu2 %v4647_v22  ;;  %2434 = vmatpush.msrb.mxu0 %v4647_v22 }
0x1306   :  { %3172 = vmatmul.msk.f32.vlgmr.msra.gmra.mxu2 %vm163_vm0, %v3170_v28 }
0x1307   :  { %2517 = vmatpush.msrb.mxu2 %v4600_v5 }
0x1309   :  { %2518 = vmatpush.msrb.mxu2 %v4606_v44 }
0x130b   :  { %2519 = vmatpush.msrb.mxu2 %v4612_v59 }
0x130d   :  { %2520 = vmatpush.msrb.mxu2 %v4622_v56 }
0x130f   :  { %2521 = vmatpush.msrb.mxu2 %v4628_v11 }
0x1311   :  { %2522 = vmatpush.msrb.mxu2 %v4633_v58 }
0x1313   :  { %2523 = vmatpush.msrb.mxu2 %v4638_v31 }
0x1315   :  { %2524 = vmatpush.msrb.mxu2 %v4647_v22 }
0x1358   :  { %v2171_v6 = vpop.permute.xlu0 %2170 }
0x1359   :  { %v2172_v15 = vrot.slane %v2171_v6, 2 }
0x135b   :  { %3358 = vtanh.f32 %v2172_v15 }
0x1361   :  { %v3359_v45 = vpop.eup %3358 }
0x1362   :  { %v2176_v18 = vmul.f32 %v3359_v45, %v4594_v16 }
0x1364   :  { %2178 = vrot.lane.b32.xlu2 %v2176_v18, %s3556_s25 }
0x1367   :  { %v2362_v30 = vpop.f32.mrf.mxu3 }
0x1368   :  { %v2367_v15 = vrot.slane %v2362_v30, 6 }
0x136c   :  { %2397 = vrot.lane.b32.xlu2 %v3171_v2, %s3556_s25 }
0x1389   :  { %v2342_v12 = vpop.f32.mrf.mxu2 }
0x138a   :  { %v2368_v16 = vsel %vm1315_vm10, %v2342_v12, %v2367_v15 }
0x13be   :  { %v2179_v24 = vpop.permute.xlu2 %2178 }
0x13bf   :  { %v2181_v51 = vadd.f32 %v2179_v24, %v2175_v36 }
0x13c1   :  { %3360 = vtanh.f32 %v2181_v51  ;;  %2763 = vst [vmem:[#allocation1 + $0x20] ss:$4 sm:$0xff] %v2181_v51 }
0x13c7   :  { %v3361_v34 = vpop.eup %3360 }
0x13c8   :  { %2187 = vrot.lane.b32.xlu1 %v3361_v34, %s3556_s25 }
0x143a   :  { %v2188_v41 = vpop.permute.xlu1 %2187 }
0x143b   :  { %v2190_v4 = vmul.f32 %v2188_v41, %v2184_v17 }
0x143d   :  { %2226 = vst [vmem:[#allocation1 + $0x3] ss:$4 sm:$0xff] %v2190_v4 }
0x143e   :  { %2755 = vst.msk [vmem:[#allocation10 + $0x2] sm:$0x3] %vm2753_vm7, %v2190_v4 }
0x1444   :  { %v2227_v48 = vld.sshfl [vmem:[#allocation1] sm:$0xff pattern:$0x73625140] }
0x1445   :  { %v2229_v49 = vpack.c.bf16 %v2227_v48, %v2227_v48  ;;  %2760 = vst [vmem:[#allocation1] ss:$4 sm:$0xff] %v4457_v63  ;;  %v3135_v63 = vld [vmem:[%s4848_s5 + $0x2] ss:$4 sm:$0x3] }
0x1446   :  { %v2232_v53 = vperm.slane %v3135_v63, 1  ;;  %v2231_v6 = vperm.slane %v3135_v63, 0 }
0x1447   :  { %3168 = vmatmul.msk.bf16.vlgmr.msra.gmra.mxu0 %vm163_vm0, %v2229_v49  ;;  %3169 = vmatmul.msk.bf16.vlgmr.msra.gmra.mxu1 %vm163_vm0, %v2229_v49 }
0x1448   :  { %2607 = vmatpush.msra.mxu0 %v4600_v5  ;;  %2627 = vmatpush.msra.mxu1 %v4598_v25 }
0x144a   :  { %2608 = vmatpush.msra.mxu0 %v4606_v44  ;;  %2628 = vmatpush.msra.mxu1 %v4602_v62 }
0x144c   :  { %2609 = vmatpush.msra.mxu0 %v4612_v59  ;;  %2629 = vmatpush.msra.mxu1 %v4608_v19 }
0x144e   :  { %2610 = vmatpush.msra.mxu0 %v4622_v56  ;;  %2630 = vmatpush.msra.mxu1 %v4614_v35 }
0x1450   :  { %2611 = vmatpush.msra.mxu0 %v4628_v11  ;;  %2631 = vmatpush.msra.mxu1 %v4624_v37  ;;  %v2398_v37 = vpop.permute.xlu2 %2397 }
0x1452   :  { %2612 = vmatpush.msra.mxu0 %v4633_v58  ;;  %2632 = vmatpush.msra.mxu1 %v4630_v1 }
0x1454   :  { %2613 = vmatpush.msra.mxu0 %v4638_v31  ;;  %2633 = vmatpush.msra.mxu1 %v4635_v23 }
0x1456   :  { %2614 = vmatpush.msra.mxu0 %v4647_v22  ;;  %2634 = vmatpush.msra.mxu1 %v4640_v0 }
0x14c4   :  { %v2287_v46 = vpop.f32.mrf.mxu0  ;;  %v2300_v33 = vpop.f32.mrf.mxu1 }
0x14c5   :  { %v2301_v20 = vadd.f32 %v2300_v33, %v2232_v53  ;;  %v2288_v50 = vadd.f32 %v2287_v46, %v2231_v6 }
0x14c7   :  { %v2306_v45 = vrot.slane %v2301_v20, 6 }
0x14c9   :  { %v2307_v18 = vsel %vm1315_vm10, %v2288_v50, %v2306_v45  ;;  %v2308_v25 = vsel %vm1317_vm5, %v2288_v50, %v2306_v45  ;;  %v4718_v5 = vsel %vm1320_vm14, %v2288_v50, %v2306_v45  ;;  %v4721_v62 = vsel %vm1323_vm15, %v2306_v45, %v2288_v50 }
0x14ca   :  { %v2370_v14 = vadd.f32 %v2368_v16, %v2307_v18  ;;  %v2309_v23 = vrot.slane %v2308_v25, 2 }
0x14cc   :  { %v2289_v61 = vpop.f32.mrf.mxu0  ;;  %v2302_v7 = vpop.f32.mrf.mxu1  ;;  %2391 = vrot.lane.b32.xlu0 %v2370_v14, %s3556_s25  ;;  %v3174_v8 = vmul.f32 -1.442695, %v2370_v14 }
0x14ce   :  { %3362 = vpow2.f32 %v3174_v8 }
0x14d4   :  { %v3363_v3 = vpop.eup %3362 }
0x14d5   :  { %v2374_v44 = vadd.f32 1.0, %v3363_v3 }
0x14d7   :  { %3364 = vrcp.f32 %v2374_v44  ;;  %v2386_v34 = vand.u32 2147483648, %v2374_v44  ;;  %vm2380_vm14 = vweird.f32 %v2374_v44  ;;  %v2384_v32 = vand.u32 2147483647, %v2374_v44 }
0x14d9   :  { %v2387_v13 = vor.u32 1.1754944e-38, %v2386_v34  ;;  %vm2385_vm9 = vcmp.eq.f32.partialorder %v2384_v32, 8.507059e+37 }
0x14dd   :  { %v3365_v19 = vpop.eup %3364 }
0x14de   :  { %v2376_v38 = vmul.f32 %v3365_v19, %v2374_v44  ;;  %vm2381_vm5 = vweird.f32 %v3365_v19 }
0x14df   :  { %vm2382_vm15 = vmor %vm2380_vm14, %vm2381_vm5 }
0x14e0   :  { %v2377_v59 = vsub.f32 1.0, %v2376_v38 }
0x14e2   :  { %v2378_v35 = vmul.f32 %v3365_v19, %v2377_v59 }
0x14e4   :  { %v2379_v51 = vadd.f32 %v3365_v19, %v2378_v35 }
0x14e6   :  { %v2383_v54 = vsel %vm2382_vm15, %v3365_v19, %v2379_v51 }
0x14e7   :  { %v2388_v60 = vsel %vm2385_vm9, %v2387_v13, %v2383_v54 }
0x14e8   :  { %v2400_v40 = vmul.f32 %v2398_v37, %v2388_v60  ;;  %v2409_v47 = vrot.slane %v2388_v60, 2 }
0x153e   :  { %v2392_v36 = vpop.permute.xlu0 %2391 }
0x153f   :  { %v2393_v24 = vrot.slane %v2392_v36, 2 }
0x1541   :  { %3366 = vtanh.f32 %v2393_v24 }
0x1547   :  { %v3367_v42 = vpop.eup %3366 }
0x1548   :  { %v2401_v56 = vmul.f32 %v3367_v42, %v2388_v60 }
0x154a   :  { %2403 = vrot.lane.b32.xlu1 %v2401_v56, %s3556_s25 }
0x15bc   :  { %v2404_v11 = vpop.permute.xlu1 %2403 }
0x15bd   :  { %v2406_v1 = vadd.f32 %v2404_v11, %v2400_v40 }
0x15bf   :  { %3368 = vtanh.f32 %v2406_v1 }
0x15c5   :  { %v3369_v9 = vpop.eup %3368 }
0x15c6   :  { %2412 = vrot.lane.b32.xlu0 %v3369_v9, %s3556_s25 }
0x1638   :  { %v2413_v52 = vpop.permute.xlu0 %2412 }
0x1639   :  { %v2415_v26 = vmul.f32 %v2413_v52, %v2409_v47 }
0x163b   :  { %3175 = vmatmul.msk.f32.vlgmr.msrb.gmra.mxu0 %vm163_vm0, %v2415_v26  ;;  %3176 = vmatmul.msk.f32.vlgmr.msrb.gmra.mxu1 %vm163_vm0, %v2415_v26  ;;  %v2686_v33 = vrot.slane %v2415_v26, 1  ;;  %v2687_v20 = vrot.slane %v2415_v26, 2  ;;  %v2688_v50 = vrot.slane %v2415_v26, 3 }
0x163d   :  { %v2693_v25 = vsel %vm645_vm2, %v2415_v26, %v2686_v33  ;;  %v2694_v14 = vsel %vm649_vm4, %v2687_v20, %v2688_v50  ;;  %v2690_v3 = vsel %vm2689_vm6, %v2415_v26, %v2686_v33  ;;  %v2691_v44 = vsel %vm647_vm3, %v2687_v20, %v2688_v50 }
0x163e   :  { %v2696_v24 = vsel %vm2695_vm8, %v2693_v25, %v2694_v14  ;;  %v2692_v54 = vsel %vm1315_vm10, %v2690_v3, %v2691_v44  ;;  %v2313_v3 = vrot.slane %v4721_v62, 6 }
0x163f   :  { %v2697_v13 = vrot.slane %v2696_v24, 1 }
0x16b8   :  { %v2456_v39 = vpop.f32.mrf.mxu1  ;;  %v2436_v58 = vpop.f32.mrf.mxu0 }
0x16b9   :  { %v2461_v57 = vrot.slane %v2456_v39, 6 }
0x16bb   :  { %v2462_v31 = vsel %vm1315_vm10, %v2436_v58, %v2461_v57 }
0x16bc   :  { %v2464_v0 = vadd.f32 %v2462_v31, %v2309_v23 }
0x16be   :  { %2485 = vrot.lane.b32.xlu2 %v2464_v0, %s3556_s25  ;;  %v3177_v55 = vmul.f32 -1.442695, %v2464_v0 }
0x16c0   :  { %3370 = vpow2.f32 %v3177_v55 }
0x16c6   :  { %v3371_v21 = vpop.eup %3370 }
0x16c7   :  { %v2468_v27 = vadd.f32 1.0, %v3371_v21 }
0x16c9   :  { %3372 = vrcp.f32 %v2468_v27  ;;  %v2480_v41 = vand.u32 2147483648, %v2468_v27  ;;  %vm2474_vm1 = vweird.f32 %v2468_v27  ;;  %v2478_v4 = vand.u32 2147483647, %v2468_v27 }
0x16cb   :  { %v2481_v49 = vor.u32 1.1754944e-38, %v2480_v41  ;;  %vm2479_vm13 = vcmp.eq.f32.partialorder %v2478_v4, 8.507059e+37 }
0x16cf   :  { %v3373_v29 = vpop.eup %3372 }
0x16d0   :  { %v2470_v28 = vmul.f32 %v3373_v29, %v2468_v27  ;;  %vm2475_vm11 = vweird.f32 %v3373_v29 }
0x16d1   :  { %vm2476_vm12 = vmor %vm2474_vm1, %vm2475_vm11 }
0x16d2   :  { %v2471_v10 = vsub.f32 1.0, %v2470_v28 }
0x16d4   :  { %v2472_v22 = vmul.f32 %v3373_v29, %v2471_v10 }
0x16d6   :  { %v2473_v17 = vadd.f32 %v3373_v29, %v2472_v22 }
0x16d8   :  { %v2477_v48 = vsel %vm2476_vm12, %v3373_v29, %v2473_v17 }
0x16d9   :  { %v2482_v30 = vsel %vm2479_vm13, %v2481_v49, %v2477_v48 }
0x16da   :  { %v2490_v6 = vmul.f32 %v2482_v30, %v2406_v1  ;;  %v2499_v45 = vrot.slane %v2482_v30, 2  ;;  %v2311_v1 = vrot.slane %v4718_v5, 4 }
0x1718   :  { %v2486_v43 = vpop.permute.xlu2 %2485 }
0x1719   :  { %v2487_v2 = vrot.slane %v2486_v43, 2 }
0x171b   :  { %3374 = vtanh.f32 %v2487_v2 }
0x1721   :  { %v3375_v63 = vpop.eup %3374 }
0x1722   :  { %v2491_v53 = vmul.f32 %v3375_v63, %v2482_v30 }
0x1724   :  { %2493 = vrot.lane.b32.xlu1 %v2491_v53, %s3556_s25 }
0x1796   :  { %v2494_v15 = vpop.permute.xlu1 %2493 }
0x1797   :  { %v4731_v12 = vadd.f32 %v2494_v15, %v2490_v6 }
0x1799   :  { %3376 = vtanh.f32 %v4731_v12 }
0x179f   :  { %v3377_v46 = vpop.eup %3376 }
0x17a0   :  { %2502 = vrot.lane.b32.xlu0 %v3377_v46, %s3556_s25 }
0x1812   :  { %v2503_v16 = vpop.permute.xlu0 %2502 }
0x1813   :  { %v2505_v18 = vmul.f32 %v2503_v16, %v2499_v45 }
0x1815   :  { %v2700_v61 = vrot.slane %v2505_v18, 1  ;;  %v2701_v7 = vrot.slane %v2505_v18, 2  ;;  %v2702_v8 = vrot.slane %v2505_v18, 3  ;;  %3178 = vmatmul.msk.f32.vlgmr.msrb.gmra.mxu2 %vm163_vm0, %v2505_v18  ;;  %3179 = vmatmul.msk.f32.vlgmr.msra.gmra.mxu3 %vm163_vm0, %v2505_v18 }
0x1817   :  { %v2703_v19 = vsel %vm2689_vm6, %v2505_v18, %v2700_v61  ;;  %v2704_v38 = vsel %vm647_vm3, %v2701_v7, %v2702_v8  ;;  %v2706_v59 = vsel %vm645_vm2, %v2505_v18, %v2700_v61  ;;  %v2707_v35 = vsel %vm649_vm4, %v2701_v7, %v2702_v8 }
0x1818   :  { %v2705_v36 = vsel %vm1315_vm10, %v2703_v19, %v2704_v38  ;;  %v2708_v51 = vsel %vm2695_vm8, %v2706_v59, %v2707_v35  ;;  %v2761_v38 = vld.sshfl [vmem:[#allocation1] sm:$0xff pattern:$0x73625140] }
0x1819   :  { %v2731_v34 = vperm.slane %v2705_v36, 0  ;;  %v2709_v32 = vrot.slane %v2708_v51, 1 }
0x181b   :  { %v2732_v42 = vperm.slane %v2709_v32, 0  ;;  %v2743_v60 = vsel %vm2689_vm6, %v2692_v54, %v2731_v34 }
0x181d   :  { %v2744_v56 = vsel %vm2689_vm6, %v2697_v13, %v2732_v42 }
0x1898   :  { %v2546_v37 = vpop.f32.mrf.mxu3  ;;  %v2526_v11 = vpop.f32.mrf.mxu2 }
0x1899   :  { %v2551_v40 = vrot.slane %v2546_v37, 6 }
0x189b   :  { %v2552_v9 = vsel %vm1315_vm10, %v2526_v11, %v2551_v40 }
0x189c   :  { %v2554_v47 = vadd.f32 %v2552_v9, %v2311_v1 }
0x189e   :  { %2575 = vrot.lane.b32.xlu2 %v2554_v47, %s3556_s25  ;;  %v3180_v52 = vmul.f32 -1.442695, %v2554_v47  ;;  %v2764_v47 = vld.sshfl [vmem:[#allocation1 + $0x20] sm:$0xff pattern:$0x73625140] }
0x18a0   :  { %3378 = vpow2.f32 %v3180_v52 }
0x18a6   :  { %v3379_v26 = vpop.eup %3378 }
0x18a7   :  { %v2558_v39 = vadd.f32 1.0, %v3379_v26 }
0x18a9   :  { %3380 = vrcp.f32 %v2558_v39  ;;  %v2570_v5 = vand.u32 2147483648, %v2558_v39  ;;  %vm2564_vm14 = vweird.f32 %v2558_v39  ;;  %v2568_v27 = vand.u32 2147483647, %v2558_v39 }
0x18ab   :  { %v2571_v28 = vor.u32 1.1754944e-38, %v2570_v5  ;;  %vm2569_vm9 = vcmp.eq.f32.partialorder %v2568_v27, 8.507059e+37  ;;  %v2782_v5 = vld [vmem:[%s4851_s8 + $0x18] sm:$0xff]  ;;  %v2781_v27 = vld [vmem:[%s4851_s8 + $0x10] sm:$0xff] }
0x18af   :  { %v3381_v57 = vpop.eup %3380 }
0x18b0   :  { %v2560_v58 = vmul.f32 %v3381_v57, %v2558_v39  ;;  %vm2565_vm5 = vweird.f32 %v3381_v57 }
0x18b1   :  { %vm2566_vm15 = vmor %vm2564_vm14, %vm2565_vm5  ;;  %vm2747_vm5 = vcmask 1042432   ;;  %vm2750_vm14 = vcmask 519168  }
0x18b2   :  { %v2561_v23 = vsub.f32 1.0, %v2560_v58 }
0x18b4   :  { %v2562_v31 = vmul.f32 %v3381_v57, %v2561_v23 }
0x18b6   :  { %v2563_v21 = vadd.f32 %v3381_v57, %v2562_v31  ;;  %v2786_v31 = vld [vmem:[%s4851_s8 + $0x38] sm:$0xff] }
0x18b7   :  { %2806 = vmatpush.msra.mxu2 %v2786_v31 }
0x18b8   :  { %v2567_v29 = vsel %vm2566_vm15, %v3381_v57, %v2563_v21  ;;  %v2783_v21 = vld [vmem:[%s4851_s8 + $0x20] sm:$0xff] }
0x18b9   :  { %v2572_v22 = vsel %vm2569_vm9, %v2571_v28, %v2567_v29  ;;  %v2788_v29 = vld [vmem:[%s4851_s8 + $0x48] sm:$0xff] }
0x18ba   :  { %v2580_v2 = vmul.f32 %v2572_v22, %v4731_v12  ;;  %v2589_v48 = vrot.slane %v2572_v22, 2  ;;  %2837 = vmatpush.msrb.mxu3 %v2788_v29  ;;  %v2780_v28 = vld [vmem:[%s4851_s8 + $0x8] sm:$0xff] }
0x18f8   :  { %v2576_v0 = vpop.permute.xlu2 %2575 }
0x18f9   :  { %v2577_v55 = vrot.slane %v2576_v0, 2  ;;  %v2785_v0 = vld [vmem:[%s4851_s8 + $0x30] sm:$0xff] }
0x18fa   :  { %2807 = vmatpush.msra.mxu2 %v2785_v0 }
0x18fb   :  { %3382 = vtanh.f32 %v2577_v55  ;;  %v2784_v55 = vld [vmem:[%s4851_s8 + $0x28] sm:$0xff] }
0x18fc   :  { %2808 = vmatpush.msra.mxu2 %v2784_v55 }
0x18fe   :  { %2809 = vmatpush.msra.mxu2 %v2783_v21 }
0x1900   :  { %2810 = vmatpush.msra.mxu2 %v2782_v5 }
0x1901   :  { %v3383_v10 = vpop.eup %3382 }
0x1902   :  { %v2581_v43 = vmul.f32 %v3383_v10, %v2572_v22  ;;  %2811 = vmatpush.msra.mxu2 %v2781_v27  ;;  %v2779_v10 = vld [vmem:[%s4851_s8] sm:$0xff] }
0x1904   :  { %2583 = vrot.lane.b32.xlu1 %v2581_v43, %s3556_s25  ;;  %2812 = vmatpush.msra.mxu2 %v2780_v28 }
0x1906   :  { %2813 = vmatpush.msra.mxu2 %v2779_v10 }
0x1976   :  { %v2584_v17 = vpop.permute.xlu1 %2583 }
0x1977   :  { %v2586_v41 = vadd.f32 %v2584_v17, %v2580_v2 }
0x1979   :  { %3384 = vtanh.f32 %v2586_v41 }
0x197f   :  { %v3385_v4 = vpop.eup %3384 }
0x1980   :  { %2592 = vrot.lane.b32.xlu0 %v3385_v4, %s3556_s25 }
0x19f2   :  { %v2593_v49 = vpop.permute.xlu0 %2592 }
0x19f3   :  { %v2595_v63 = vmul.f32 %v2593_v49, %v2589_v48 }
0x19f5   :  { %v2710_v30 = vrot.slane %v2595_v63, 1  ;;  %v2711_v53 = vrot.slane %v2595_v63, 2  ;;  %v2712_v6 = vrot.slane %v2595_v63, 3  ;;  %3181 = vmatmul.msk.f32.vlgmr.msra.gmra.mxu0 %vm163_vm0, %v2595_v63  ;;  %3182 = vmatmul.msk.f32.vlgmr.msra.gmra.mxu1 %vm163_vm0, %v2595_v63 }
0x19f7   :  { %v2713_v15 = vsel %vm2689_vm6, %v2595_v63, %v2710_v30  ;;  %v2714_v12 = vsel %vm647_vm3, %v2711_v53, %v2712_v6  ;;  %v2716_v46 = vsel %vm645_vm2, %v2595_v63, %v2710_v30  ;;  %v2717_v33 = vsel %vm649_vm4, %v2711_v53, %v2712_v6 }
0x19f8   :  { %v2715_v20 = vsel %vm1315_vm10, %v2713_v15, %v2714_v12  ;;  %v2718_v50 = vsel %vm2695_vm8, %v2716_v46, %v2717_v33 }
0x19f9   :  { %v2735_v45 = vperm.slane %v2715_v20, 0  ;;  %v2719_v16 = vrot.slane %v2718_v50, 1 }
0x19fb   :  { %v2736_v18 = vperm.slane %v2719_v16, 0  ;;  %v4766_v25 = vsel %vm1315_vm10, %v2743_v60, %v2735_v45  ;;  %v2787_v16 = vld [vmem:[%s4851_s8 + $0x40] sm:$0xff]  ;;  %s3558_s8 = smov [#allocation7]  }
0x19fc   :  { %2838 = vmatpush.msrb.mxu3 %v2787_v16  ;;  %s2849_s1 = sshll.u32 %s3558_s8, 4  ;;  %s2850_s1 = int_to_ptr.vmem [resolvable:$true] %s2849_s1 }
0x19fd   :  { %v4769_v14 = vsel %vm1315_vm10, %v2744_v56, %v2736_v18  ;;  %v3394_v18 = vld [vmem:[%s4845_s2] sm:$0xff]  ;;  %s2851_s2 = sshll.u32 %s4852_s9, 4  ;;  %s2890_s9 = sshll.u32 %s4856_s13, 4  ;;  %s2852_s2 = int_to_ptr.hbm [resolvable:$true] %s2851_s2  ;;  %s2891_s9 = int_to_ptr.hbm [resolvable:$true] %s2890_s9 }
0x1a72   :  { %v2636_v61 = vpop.f32.mrf.mxu1  ;;  %v2616_v8 = vpop.f32.mrf.mxu0 }
0x1a73   :  { %v2641_v7 = vrot.slane %v2636_v61, 6 }
0x1a75   :  { %v2642_v44 = vsel %vm1315_vm10, %v2616_v8, %v2641_v7 }
0x1a76   :  { %v2644_v19 = vadd.f32 %v2642_v44, %v2313_v3 }
0x1a78   :  { %2665 = vrot.lane.b32.xlu2 %v2644_v19, %s3556_s25  ;;  %v3183_v59 = vmul.f32 -1.442695, %v2644_v19 }
0x1a7a   :  { %3386 = vpow2.f32 %v3183_v59 }
0x1a80   :  { %2767 = vrot.lane.b32.xlu2 %v2761_v38, %s3556_s25  ;;  %v3387_v35 = vpop.eup %3386 }
0x1a81   :  { %v2648_v36 = vadd.f32 1.0, %v3387_v35 }
0x1a83   :  { %3388 = vrcp.f32 %v2648_v36  ;;  %v2660_v42 = vand.u32 2147483648, %v2648_v36  ;;  %vm2654_vm1 = vweird.f32 %v2648_v36  ;;  %v2658_v60 = vand.u32 2147483647, %v2648_v36 }
0x1a85   :  { %v2661_v37 = vor.u32 1.1754944e-38, %v2660_v42  ;;  %vm2659_vm13 = vcmp.eq.f32.partialorder %v2658_v60, 8.507059e+37 }
0x1a89   :  { %v3389_v24 = vpop.eup %3388 }
0x1a8a   :  { %v2650_v51 = vmul.f32 %v3389_v24, %v2648_v36  ;;  %vm2655_vm11 = vweird.f32 %v3389_v24 }
0x1a8b   :  { %vm2656_vm12 = vmor %vm2654_vm1, %vm2655_vm11 }
0x1a8c   :  { %v2651_v34 = vsub.f32 1.0, %v2650_v51 }
0x1a8e   :  { %v2652_v32 = vmul.f32 %v3389_v24, %v2651_v34 }
0x1a90   :  { %v2653_v62 = vadd.f32 %v3389_v24, %v2652_v32 }
0x1a92   :  { %v2657_v56 = vsel %vm2656_vm12, %v3389_v24, %v2653_v62 }
0x1a93   :  { %v2662_v1 = vsel %vm2659_vm13, %v2661_v37, %v2657_v56 }
0x1a94   :  { %v2670_v52 = vmul.f32 %v2662_v1, %v2586_v41  ;;  %v2679_v22 = vrot.slane %v2662_v1, 2 }
0x1ad2   :  { %v2666_v54 = vpop.permute.xlu2 %2665 }
0x1ad3   :  { %v2667_v13 = vrot.slane %v2666_v54, 2 }
0x1ad5   :  { %3390 = vtanh.f32 %v2667_v13 }
0x1ada   :  { %v2768_v40 = vpop.permute.xlu2 %2767 }
0x1adb   :  { %v3391_v11 = vpop.eup %3390  ;;  %2776 = vst.msk [vmem:[#allocation11] sm:$0x3] %vm2753_vm7, %v2768_v40 }
0x1adc   :  { %v2671_v9 = vmul.f32 %v3391_v11, %v2662_v1 }
0x1ade   :  { %2673 = vrot.lane.b32.xlu1 %v2671_v9, %s3556_s25 }
0x1ae6   :  { %2769 = vrot.lane.b32.xlu1 %v2764_v47, %s3556_s25 }
0x1b50   :  { %v2674_v26 = vpop.permute.xlu1 %2673 }
0x1b51   :  { %v2676_v39 = vadd.f32 %v2674_v26, %v2670_v52 }
0x1b53   :  { %3392 = vtanh.f32 %v2676_v39  ;;  %2765 = vst [vmem:[#allocation1] ss:$4 sm:$0xff] %v2676_v39 }
0x1b58   :  { %v2770_v57 = vpop.permute.xlu1 %2769 }
0x1b59   :  { %v3393_v58 = vpop.eup %3392  ;;  %2777 = vst.msk [vmem:[#allocation11 + $0x2] sm:$0x3] %vm2753_vm7, %v2770_v57 }
0x1b5a   :  { %2682 = vrot.lane.b32.xlu0 %v3393_v58, %s3556_s25  ;;  %v2766_v23 = vld.sshfl [vmem:[#allocation1] sm:$0xff pattern:$0x73625140] }
0x1b62   :  { %2771 = vrot.lane.b32.xlu0 %v2766_v23, %s3556_s25 }
0x1bcc   :  { %v2683_v43 = vpop.permute.xlu0 %2682 }
0x1bcd   :  { %v2685_v2 = vmul.f32 %v2683_v43, %v2679_v22 }
0x1bcf   :  { %v2721_v17 = vrot.slane %v2685_v2, 1  ;;  %v2722_v41 = vrot.slane %v2685_v2, 2  ;;  %v2723_v4 = vrot.slane %v2685_v2, 3  ;;  %2756 = vst.msk [vmem:[#allocation10 + $0x4] sm:$0x3] %vm2753_vm7, %v2685_v2 }
0x1bd0   :  { %2883 = dma.vmem_to_hbm [thread:$0]  %s2876_s28, 96, %s2878_s30, [#allocation9], %s3561_s14, %s3561_s14, %s3562_s15  }
0x1bd1   :  { %v2724_v48 = vsel %vm2689_vm6, %v2685_v2, %v2721_v17  ;;  %v2725_v49 = vsel %vm647_vm3, %v2722_v41, %v2723_v4  ;;  %v2727_v63 = vsel %vm645_vm2, %v2685_v2, %v2721_v17  ;;  %v2728_v30 = vsel %vm649_vm4, %v2722_v41, %v2723_v4 }
0x1bd2   :  { %v2726_v53 = vsel %vm1315_vm10, %v2724_v48, %v2725_v49  ;;  %v2729_v6 = vsel %vm2695_vm8, %v2727_v63, %v2728_v30  ;;  %vm4900_vm2 = vcmask 130048  }
0x1bd3   :  { %v2730_v15 = vrot.slane %v2729_v6, 1  ;;  %v2739_v12 = vperm.slane %v2726_v53, 0 }
0x1bd4   :  { %v2772_v46 = vpop.permute.xlu0 %2771 }
0x1bd5   :  { %v2740_v33 = vperm.slane %v2730_v15, 0  ;;  %v2748_v20 = vsel %vm2747_vm5, %v4766_v25, %v2739_v12  ;;  %2778 = vst.msk [vmem:[#allocation11 + $0x4] sm:$0x3] %vm2753_vm7, %v2772_v46  ;;  %v2789_v25 = vperm.slane %v3394_v18, 4 }
0x1bd6   :  { %2792 = vst [vmem:[#allocation1] ss:$2 sm:$0xff] %v2748_v20  ;;  %2896 = dma.vmem_to_hbm [thread:$0]  %s2889_s18, 96, %s2891_s9, [#allocation12], %s3561_s14, %s3561_s14, %s3562_s15  }
0x1bd7   :  { %v2749_v50 = vsel %vm2747_vm5, %v4769_v14, %v2740_v33  ;;  %2751 = vst.msk [vmem:[#allocation7] sm:$0xf] %vm2750_vm14, %v2748_v20  ;;  %v2819_v14 = vperm.slane %v3394_v18, 5 }
0x1bd8   :  { %2794 = vst [vmem:[#allocation1 + $0x1] ss:$2 sm:$0xff] %v2749_v50 }
0x1bd9   :  { %2752 = vst.msk [vmem:[#allocation7 + $0x4] sm:$0xf] %vm2750_vm14, %v2749_v50 }
0x1bda   :  { %2857 = dma.vmem_to_hbm [thread:$0]  %s2850_s1, 128, %s2852_s2, [#allocation4], %s3556_s25, %s3556_s25, %s3559_s26  }
0x1bdf   :  { %v2795_v45 = vld.sshfl [vmem:[#allocation1] sm:$0xff pattern:$0x75316420] }
0x1be0   :  { %3184 = vmatmul.msk.f32.vlgmr.msra.gmra.mxu2 %vm163_vm0, %v2795_v45  ;;  %vm2843_vm0 = vcmask 15360  }
0x1c63   :  { %v2815_v61 = vpop.f32.mrf.mxu2 }
0x1c64   :  { %v2816_v7 = vadd.f32 %v2815_v61, %v2789_v25 }
0x1c66   :  { %v2818_v8 = vmax.f32 %v2816_v7, 0.0 }
0x1c68   :  { %3185 = vmatmul.msk.f32.vlgmr.msrb.gmra.mxu3 %vm4900_vm2, %v2818_v8 }
0x1ceb   :  { %v2840_v3 = vpop.f32.mrf.mxu3 }
0x1cec   :  { %v2841_v44 = vadd.f32 %v2840_v3, %v2819_v14 }
0x1cee   :  { %2844 = vst.msk [vmem:[%s4853_s10] sm:$0xff] %vm2843_vm0, %v2841_v44 }
0x1cef   :  { %3543 = dma.done.wait [#allocation4], 128  }
0x1cf0   :  { %3544 = vsyncadd [#allocation4], 4294967168 }
0x1cf1   :  { %3545 = dma.done.wait [#allocation9], 224  }
0x1cf2   :  { %3546 = vsyncadd [#allocation9], 4294967072 }
0x1cf3   :  { %3547 = dma.done.wait [#allocation12], 96  }
0x1cf4   :  { %3548 = vsyncadd [#allocation12], 4294967200 }
0x1cf5   :  { %2915 = vsyncpa [#allocation3], 1 }
0x1cf6   :  { %2916 = vsyncpa [#allocation6], 1 }
0x1cf7   :  { %2917 = vsyncpa [#allocation4], 1 }
0x1cf8   :  { %2918 = vsyncpa [#allocation9], 1 }
0x1cf9   :  { %2919 = vsyncpa [#allocation12], 1 }

</bundles_post_ra>
